<compile_context>
chip_gen: v5e
topology: v5e:2x2
jax: 0.10.0
libtpu: 0.0.40
codegen_flags: <defaults>
</compile_context>

<pallas_src>
import math
from functools import partial

import jax
import jax.numpy as jnp
from jax.experimental import pallas as pl
from jax.experimental.pallas import tpu as pltpu


# MXU operand dtype (f32 accumulation is always kept via preferred_element_type).
MATMUL_DTYPE = jnp.bfloat16

LN_EPS = 1e-5              # nn.LayerNorm default
DEFAULT_ROW_TILE = 512     # row tile for B*T-tiled kernels (v6e sweet spot; use 256
                           # on v7x if the 64 MiB VMEM budget gets tight)
DEFAULT_FF_TILE = 1024     # FF-dimension chunk for the fused FFN kernel
VMEM_LIMIT_BYTES = 64 * 1024 * 1024


def _cparams(*sem):
    return pltpu.CompilerParams(dimension_semantics=sem,
                                vmem_limit_bytes=VMEM_LIMIT_BYTES)


# ----------------------------- Pallas kernels -----------------------------

def _ln_proj_kernel(*refs, eps, n_out, do_ln):
    """(optional LayerNorm, f32) -> bf16 matmul -> split into n_out outputs."""
    if do_ln:
        x_ref, g_ref, b_ref, w_ref, wb_ref = refs[:5]
        out_refs = refs[5:]
    else:
        x_ref, w_ref, wb_ref = refs[:3]
        out_refs = refs[3:]

    x = x_ref[...].astype(jnp.float32)
    if do_ln:
        mu = jnp.mean(x, axis=-1, keepdims=True)
        var = jnp.mean((x - mu) ** 2, axis=-1, keepdims=True)
        x = (x - mu) * jax.lax.rsqrt(var + eps) * g_ref[...] + b_ref[...]

    y = jnp.dot(x.astype(MATMUL_DTYPE), w_ref[...],
                preferred_element_type=jnp.float32) + wb_ref[...]
    n = y.shape[-1] // n_out
    for i, o_ref in enumerate(out_refs):
        o_ref[...] = y[:, i * n:(i + 1) * n].astype(o_ref.dtype)


def _attn_kernel(q_ref, k_ref, v_ref, mask_ref, wo_ref, bo_ref, res_ref, o_ref,
                 heads_ref, *, n_heads, causal):
    """Multi-head attention + output projection + residual add on one [tq, D] tile.

    q/k/v arrive in bf16 with 1/sqrt(dk) already folded into the q projection.
    mask_ref is a compact [1, S] int32 key-padding mask; the causal structure of
    the decoder self-attention mask is regenerated in-kernel from iota (no
    [B, T, T] mask DMA).  Per-head PV results go into a VMEM scratch so only one
    head is live at a time and the final output projection contracts over full D.
    """
    q = q_ref[...]                      # [tq, D] bf16
    k = k_ref[...]                      # [S,  D] bf16
    v = v_ref[...]                      # [S,  D] bf16
    tq, d_model = q.shape
    s_len = k.shape[0]
    dk = d_model // n_heads

    # Additive mask bias, built once (hoisted out of the per-head loop).
    valid = jnp.broadcast_to(mask_ref[...] > 0, (tq, s_len))
    if causal:
        row = (jax.lax.broadcasted_iota(jnp.int32, (tq, s_len), 0)
               + pl.program_id(1) * tq)
        col = jax.lax.broadcasted_iota(jnp.int32, (tq, s_len), 1)
        valid = jnp.logical_and(valid, row >= col)
    bias = jnp.where(valid, 0.0, -1e9)

    # TODO(synk): for long S on v7x, add an in-kernel S-block loop with online
    # softmax (flash-style) instead of holding the full [tq, S] score tile.
    for h in range(n_heads):
        lo = h * dk
        s = jax.lax.dot_general(q[:, lo:lo + dk], k[:, lo:lo + dk],
                                (((1,), (1,)), ((), ())),
                                preferred_element_type=jnp.float32) + bias
        s = s - jnp.max(s, axis=-1, keepdims=True)
        p = jnp.exp(s)
        # exact reciprocal: approx=True would drift vs the PyTorch reference
        p = p * pl.reciprocal(jnp.sum(p, axis=-1, keepdims=True), approx=False)
        pv = jnp.dot(p.astype(MATMUL_DTYPE), v[:, lo:lo + dk],
                     preferred_element_type=jnp.float32)
        heads_ref[:, lo:lo + dk] = pv                       # one head live at a time

    out = jnp.dot(heads_ref[...].astype(MATMUL_DTYPE), wo_ref[...],
                  preferred_element_type=jnp.float32)
    o_ref[...] = (res_ref[...] + out + bo_ref[...]).astype(o_ref.dtype)


def _ln_ffn_kernel(x_ref, g_ref, b_ref, w1_ref, b1_ref, w2_ref, b2_ref, o_ref,
                   y_ref, acc_ref, *, eps):
    """LayerNorm -> W1 -> ReLU -> W2 -> residual add, fused and FF-chunked.

    Grid axis 1 ("arbitrary") walks FF-dimension chunks so W1/W2 residency stays
    bounded.  The normalized input is computed once at fc == 0 and cached in a
    bf16 scratch; partial products accumulate into an f32 scratch; the residual
    add + store happens at the last chunk.
    """
    fc = pl.program_id(1)

    @pl.when(fc == 0)
    def _():
        x = x_ref[...]
        mu = jnp.mean(x, axis=-1, keepdims=True)
        var = jnp.mean((x - mu) ** 2, axis=-1, keepdims=True)
        y = (x - mu) * jax.lax.rsqrt(var + eps) * g_ref[...] + b_ref[...]
        y_ref[...] = y.astype(y_ref.dtype)
        acc_ref[...] = jnp.zeros_like(acc_ref)

    h = jnp.maximum(
        jnp.dot(y_ref[...], w1_ref[...], preferred_element_type=jnp.float32)
        + b1_ref[...], 0.0)
    acc_ref[...] += jnp.dot(h.astype(MATMUL_DTYPE), w2_ref[...],
                            preferred_element_type=jnp.float32)

    @pl.when(fc == pl.num_programs(1) - 1)
    def _():
        o_ref[...] = (x_ref[...] + acc_ref[...] + b2_ref[...]).astype(o_ref.dtype)


# ----------------------------- kernel wrappers -----------------------------

def _row_tile(M, target=DEFAULT_ROW_TILE):
    # Block 2nd-to-last dim must be a multiple of 8 or equal the full extent.
    return M if M <= target else target


def pallas_ln_proj(x2d, w, wb, *, g=None, b=None, n_out=1, out_dtype=None,
                   tm=DEFAULT_ROW_TILE):
    """(optional LN) + fused matmul, split into n_out outputs. Row-tiled; bf16
    weights resident (constant block index => DMA'd once per core)."""
    M, D = x2d.shape
    N = w.shape[1]
    do_ln = g is not None
    tm = _row_tile(M, tm)
    n_each = N // n_out
    out_dtype = x2d.dtype if out_dtype is None else out_dtype

    const = lambda shape: pl.BlockSpec(shape, lambda i: (0, 0))
    in_specs = [pl.BlockSpec((tm, D), lambda i: (i, 0))]
    args = [x2d]
    if do_ln:
        in_specs += [const((1, D)), const((1, D))]
        args += [g, b]
    in_specs += [const((D, N)), const((1, N))]
    args += [w, wb]

    out_shape = tuple(jax.ShapeDtypeStruct((M, n_each), out_dtype)
                      for _ in range(n_out))
    out_specs = tuple(pl.BlockSpec((tm, n_each), lambda i: (i, 0))
                      for _ in range(n_out))

    outs = pl.pallas_call(
        partial(_ln_proj_kernel, eps=LN_EPS, n_out=n_out, do_ln=do_ln),
        out_shape=out_shape,
        grid=(pl.cdiv(M, tm),),
        in_specs=in_specs,
        out_specs=out_specs,
        compiler_params=_cparams("parallel"),
    )(*args)
    return outs[0] if n_out == 1 else outs


def pallas_attention(q, k, v, pad_mask, wo, bo, residual, *, n_heads, causal):
    """Fused MHA + output projection + residual add.

    q: [B, Tq, D] bf16, k/v: [B, S, D] bf16, pad_mask: [B, 1, S] int32,
    residual: [B, Tq, D] f32.  Grid = (B, Tq tiles), both parallel.
    """
    B, Tq, D = q.shape
    S = k.shape[1]
    tq = Tq if Tq <= 128 else 128
    return pl.pallas_call(
        partial(_attn_kernel, n_heads=n_heads, causal=causal),
        out_shape=jax.ShapeDtypeStruct((B, Tq, D), residual.dtype),
        grid=(B, pl.cdiv(Tq, tq)),
        in_specs=[pl.BlockSpec((None, tq, D), lambda bi, qi: (bi, qi, 0)),
                  pl.BlockSpec((None, S, D), lambda bi, qi: (bi, 0, 0)),
                  pl.BlockSpec((None, S, D), lambda bi, qi: (bi, 0, 0)),
                  pl.BlockSpec((None, 1, S), lambda bi, qi: (bi, 0, 0)),
                  pl.BlockSpec((D, D), lambda bi, qi: (0, 0)),
                  pl.BlockSpec((1, D), lambda bi, qi: (0, 0)),
                  pl.BlockSpec((None, tq, D), lambda bi, qi: (bi, qi, 0))],
        out_specs=pl.BlockSpec((None, tq, D), lambda bi, qi: (bi, qi, 0)),
        scratch_shapes=[pltpu.VMEM((tq, D), jnp.float32)],   # per-head staging
        compiler_params=_cparams("parallel", "parallel"),
    )(q, k, v, pad_mask, wo, bo, residual)


def pallas_ln_ffn_residual(x2d, g, b, w1, b1, w2, b2, *, tm=DEFAULT_ROW_TILE,
                           tf=DEFAULT_FF_TILE):
    M, D = x2d.shape
    F = w1.shape[1]
    tm = _row_tile(M, tm)
    tf = F if F <= tf else tf
    assert F % tf == 0, "d_ff must be a multiple of the FF chunk size"
    return pl.pallas_call(
        partial(_ln_ffn_kernel, eps=LN_EPS),
        out_shape=jax.ShapeDtypeStruct((M, D), x2d.dtype),
        grid=(pl.cdiv(M, tm), F // tf),
        in_specs=[pl.BlockSpec((tm, D), lambda i, fc: (i, 0)),
                  pl.BlockSpec((1, D), lambda i, fc: (0, 0)),
                  pl.BlockSpec((1, D), lambda i, fc: (0, 0)),
                  pl.BlockSpec((D, tf), lambda i, fc: (0, fc)),
                  pl.BlockSpec((1, tf), lambda i, fc: (0, fc)),
                  pl.BlockSpec((tf, D), lambda i, fc: (fc, 0)),
                  pl.BlockSpec((1, D), lambda i, fc: (0, 0))],
        out_specs=pl.BlockSpec((tm, D), lambda i, fc: (i, 0)),
        scratch_shapes=[pltpu.VMEM((tm, D), MATMUL_DTYPE),   # cached LN(x)
                        pltpu.VMEM((tm, D), jnp.float32)],   # accumulator
        compiler_params=_cparams("parallel", "arbitrary"),
    )(x2d, g, b, w1, b1, w2, b2)


# ----------------------------- model glue -----------------------------

def sinusoidal_pe(T, D):
    pos = jnp.arange(T, dtype=jnp.float32)[:, None]
    i = jnp.arange(0, D, 2, dtype=jnp.float32)
    div = jnp.exp(-jnp.log(10000.0) * i / D)
    pe = jnp.zeros((T, D), jnp.float32)
    pe = pe.at[:, 0::2].set(jnp.sin(pos * div))
    pe = pe.at[:, 1::2].set(jnp.cos(pos * div))
    return pe


def decoder_forward(params, x_tokens, m, e_mask, d_mask, *, n_heads):
    """Pre-norm decoder forward.  `params` must come from prepare_params()."""
    B, T = x_tokens.shape
    S = m.shape[1]
    D = params['emb'].shape[1]
    M = B * T

    # Embeddings (plain-JAX gather glue).
    x = jnp.take(params['emb'], x_tokens, axis=0) * jnp.sqrt(jnp.float32(D))
    x = x + sinusoidal_pe(T, D)[None]

    # Compact int32 key-padding masks; the causal part of d_mask is regenerated
    # in-kernel (no [B,T,T] f32 mask DMA).
    # TODO(synk): assumes d_mask == causal & key-padding (recovered from its last
    # row); a fully arbitrary per-element mask would need the full-mask DMA path.
    e_pad = e_mask.astype(jnp.int32).reshape(B, 1, S)
    d_pad = d_mask[:, -1:, :].astype(jnp.int32)            # [B, 1, T]

    m2d = m.reshape(B * S, D)

    # n_layers is small; layers are unrolled under jit.
    for lp in params['layers']:
        # ---- sublayer 0: self attention (LN + fused QKV, residual fused) ----
        x2d = x.reshape(M, D)
        q, k, v = pallas_ln_proj(x2d, lp['wqkv'], lp['bqkv'],
                                 g=lp['ln0_g'], b=lp['ln0_b'], n_out=3,
                                 out_dtype=MATMUL_DTYPE)
        x = pallas_attention(q.reshape(B, T, D), k.reshape(B, T, D),
                             v.reshape(B, T, D), d_pad,
                             lp['self_wo'], lp['self_bo'], x,
                             n_heads=n_heads, causal=True)

        # ---- sublayer 1: source (cross) attention ----
        x2d = x.reshape(M, D)
        q = pallas_ln_proj(x2d, lp['src_wq'], lp['src_bq'],
                           g=lp['ln1_g'], b=lp['ln1_b'], n_out=1,
                           out_dtype=MATMUL_DTYPE)
        k, v = pallas_ln_proj(m2d, lp['src_wkv'], lp['src_bkv'], n_out=2,
                              out_dtype=MATMUL_DTYPE)       # memory: no LN
        x = pallas_attention(q.reshape(B, T, D), k.reshape(B, S, D),
                             v.reshape(B, S, D), e_pad,
                             lp['src_wo'], lp['src_bo'], x,
                             n_heads=n_heads, causal=False)

        # ---- sublayer 2: position-wise feed-forward (LN + FFN + residual) ----
        x2d = x.reshape(M, D)
        x = pallas_ln_ffn_residual(x2d, lp['ln2_g'], lp['ln2_b'],
                                   lp['ff_w1'], lp['ff_b1'],
                                   lp['ff_w2'], lp['ff_b2']).reshape(B, T, D)
    return x


# ----------------------------- parameter prep -----------------------------

def init_params(key, *, vocab, d_model, d_ff, n_layers):
    """f32 'PyTorch-equivalent' parameters."""
    def dense(k, fan_in, fan_out):
        w = jax.random.normal(k, (fan_in, fan_out), jnp.float32) * 0.02
        b = jnp.zeros((1, fan_out), jnp.float32)
        return w, b

    keys = jax.random.split(key, 1 + n_layers)
    emb = jax.random.normal(keys[0], (vocab, d_model), jnp.float32) * 0.02

    ones = lambda: jnp.ones((1, d_model), jnp.float32)
    zeros = lambda: jnp.zeros((1, d_model), jnp.float32)

    layers = []
    for li in range(n_layers):
        lk = jax.random.split(keys[1 + li], 7)
        wqkv, bqkv = dense(lk[0], d_model, 3 * d_model)       # fused wq|wk|wv
        self_wo, self_bo = dense(lk[1], d_model, d_model)
        src_wq, src_bq = dense(lk[2], d_model, d_model)
        src_wkv, src_bkv = dense(lk[3], d_model, 2 * d_model)  # fused wk|wv
        src_wo, src_bo = dense(lk[4], d_model, d_model)
        w1, b1 = dense(lk[5], d_model, d_ff)
        w2, b2 = dense(lk[6], d_ff, d_model)
        layers.append(dict(
            wqkv=wqkv, bqkv=bqkv, self_wo=self_wo, self_bo=self_bo,
            src_wq=src_wq, src_bq=src_bq, src_wkv=src_wkv, src_bkv=src_bkv,
            src_wo=src_wo, src_bo=src_bo,
            ff_w1=w1, ff_b1=b1, ff_w2=w2, ff_b2=b2,
            ln0_g=ones(), ln0_b=zeros(),
            ln1_g=ones(), ln1_b=zeros(),
            ln2_g=ones(), ln2_b=zeros(),
        ))
    return dict(emb=emb, layers=layers)


def prepare_params(params, *, n_heads):
    """Offline prep: fold 1/sqrt(dk) into the q projections and cast matmul
    weights to bf16.  Biases, LN params and the embedding table stay f32."""
    D = params['emb'].shape[1]
    scale = 1.0 / math.sqrt(D // n_heads)
    bf = lambda a: a.astype(MATMUL_DTYPE)
    new_layers = []
    for lp in params['layers']:
        lp = dict(lp)
        wqkv = lp['wqkv'].at[:, :D].multiply(scale)   # scale q columns of wq|wk|wv
        bqkv = lp['bqkv'].at[:, :D].multiply(scale)
        lp.update(
            wqkv=bf(wqkv), bqkv=bqkv,
            self_wo=bf(lp['self_wo']),
            src_wq=bf(lp['src_wq'] * scale), src_bq=lp['src_bq'] * scale,
            src_wkv=bf(lp['src_wkv']),
            src_wo=bf(lp['src_wo']),
            ff_w1=bf(lp['ff_w1']), ff_w2=bf(lp['ff_w2']),
        )
        new_layers.append(lp)
    return dict(emb=params['emb'], layers=new_layers)


# ----------------------------- main -----------------------------

if __name__ == "__main__":
    B, T, S = 2, 8, 8            # batch, decoder seq, encoder (memory) seq
    D, H, FF = 128, 4, 512       # d_model (128-aligned), n_heads, d_ff
    VOCAB, N_LAYERS = 64, 2

    root = jax.random.PRNGKey(0)
    k_par, k_tok, k_mem = jax.random.split(root, 3)

    params = prepare_params(
        init_params(k_par, vocab=VOCAB, d_model=D, d_ff=FF, n_layers=N_LAYERS),
        n_heads=H)

    x_tokens = jax.random.randint(k_tok, (B, T), 0, VOCAB, dtype=jnp.int32)
    memory = jax.random.normal(k_mem, (B, S, D), jnp.float32)

    # encoder padding mask [B, 1, S]: mask out last position of batch element 1
    e_mask = jnp.ones((B, 1, S), dtype=bool).at[1, 0, S - 1].set(False)
    # decoder causal mask [B, T, T]
    d_mask = jnp.broadcast_to(jnp.tril(jnp.ones((T, T), dtype=bool)), (B, T, T))

    fwd = jax.jit(partial(decoder_forward, n_heads=H))
    out = jax.block_until_ready(fwd(params, x_tokens, memory, e_mask, d_mask))
    assert out.shape == (B, T, D) and out.dtype == jnp.float32
    assert bool(jnp.all(jnp.isfinite(out)))
    print("KERNEL_OK")
</pallas_src>

<mosaic_0001>
module attributes {stable_mosaic.version = 11 : i64} {
  func.func @_ln_proj_kernel(%arg0: i32, %arg1: memref<16x128xf32, #tpu.memory_space<vmem>>, %arg2: memref<1x128xf32, #tpu.memory_space<vmem>>, %arg3: memref<1x128xf32, #tpu.memory_space<vmem>>, %arg4: memref<128x384xbf16, #tpu.memory_space<vmem>>, %arg5: memref<1x384xf32, #tpu.memory_space<vmem>>, %arg6: memref<16x128xbf16, #tpu.memory_space<vmem>>, %arg7: memref<16x128xbf16, #tpu.memory_space<vmem>>, %arg8: memref<16x128xbf16, #tpu.memory_space<vmem>>) attributes {dimension_semantics = [#tpu.dimension_semantics<parallel>], iteration_bounds = array<i64: 1>, scalar_prefetch = 0 : i64, scratch_operands = 0 : i64, tpu.core_type = #tpu.core_type<tc>, window_params = [{transform_indices = @transform_0, window_bounds = array<i64: 16, 128>}, {pipeline_mode = #tpu.pipeline_mode<synchronous>, transform_indices = @transform_1, window_bounds = array<i64: 1, 128>}, {pipeline_mode = #tpu.pipeline_mode<synchronous>, transform_indices = @transform_2, window_bounds = array<i64: 1, 128>}, {pipeline_mode = #tpu.pipeline_mode<synchronous>, transform_indices = @transform_3, window_bounds = array<i64: 128, 384>}, {pipeline_mode = #tpu.pipeline_mode<synchronous>, transform_indices = @transform_4, window_bounds = array<i64: 1, 384>}, {transform_indices = @transform_5, window_bounds = array<i64: 16, 128>}, {transform_indices = @transform_6, window_bounds = array<i64: 16, 128>}, {transform_indices = @transform_7, window_bounds = array<i64: 16, 128>}]} {
    %c0 = arith.constant 0 : index
    %c0_0 = arith.constant 0 : index
    %0 = vector.load %arg1[%c0, %c0_0] : memref<16x128xf32, #tpu.memory_space<vmem>>, vector<16x128xf32>
    %cst = arith.constant dense<0.000000e+00> : vector<16xf32>
    %1 = vector.multi_reduction <add>, %0, %cst [1] : vector<16x128xf32> to vector<16xf32>
    %2 = vector.shape_cast %1 : vector<16xf32> to vector<16x1xf32>
    %cst_1 = arith.constant 1.280000e+02 : f32
    %3 = vector.broadcast %cst_1 : f32 to vector<16x1xf32>
    %4 = arith.divf %2, %3 : vector<16x1xf32>
    %5 = vector.broadcast %4 : vector<16x1xf32> to vector<16x128xf32>
    %6 = arith.subf %0, %5 : vector<16x128xf32>
    %7 = arith.mulf %6, %6 : vector<16x128xf32>
    %cst_2 = arith.constant dense<0.000000e+00> : vector<16xf32>
    %8 = vector.multi_reduction <add>, %7, %cst_2 [1] : vector<16x128xf32> to vector<16xf32>
    %9 = vector.shape_cast %8 : vector<16xf32> to vector<16x1xf32>
    %cst_3 = arith.constant 1.280000e+02 : f32
    %10 = vector.broadcast %cst_3 : f32 to vector<16x1xf32>
    %11 = arith.divf %9, %10 : vector<16x1xf32>
    %12 = vector.broadcast %4 : vector<16x1xf32> to vector<16x128xf32>
    %13 = arith.subf %0, %12 : vector<16x128xf32>
    %cst_4 = arith.constant 9.99999974E-6 : f32
    %14 = vector.broadcast %cst_4 : f32 to vector<16x1xf32>
    %15 = arith.addf %11, %14 : vector<16x1xf32>
    %16 = math.rsqrt %15 : vector<16x1xf32>
    %17 = vector.broadcast %16 : vector<16x1xf32> to vector<16x128xf32>
    %18 = arith.mulf %13, %17 : vector<16x128xf32>
    %c0_5 = arith.constant 0 : index
    %c0_6 = arith.constant 0 : index
    %19 = vector.load %arg2[%c0_5, %c0_6] : memref<1x128xf32, #tpu.memory_space<vmem>>, vector<1x128xf32>
    %20 = vector.broadcast %19 : vector<1x128xf32> to vector<16x128xf32>
    %21 = arith.mulf %18, %20 : vector<16x128xf32>
    %c0_7 = arith.constant 0 : index
    %c0_8 = arith.constant 0 : index
    %22 = vector.load %arg3[%c0_7, %c0_8] : memref<1x128xf32, #tpu.memory_space<vmem>>, vector<1x128xf32>
    %23 = vector.broadcast %22 : vector<1x128xf32> to vector<16x128xf32>
    %24 = arith.addf %21, %23 : vector<16x128xf32>
    %25 = arith.truncf %24 : vector<16x128xf32> to vector<16x128xbf16>
    %c0_9 = arith.constant 0 : index
    %c0_10 = arith.constant 0 : index
    %26 = vector.load %arg4[%c0_9, %c0_10] : memref<128x384xbf16, #tpu.memory_space<vmem>>, vector<128x384xbf16>
    %cst_11 = arith.constant dense<0.000000e+00> : vector<16x384xf32>
    %27 = tpu.matmul %25, %26, %cst_11 {dimension_numbers = #tpu.dot_dimension_numbers<[1], [0], [0], [1], [0, 0, 1, 1], [], []>} : vector<16x128xbf16>, vector<128x384xbf16>, vector<16x384xf32> -> vector<16x384xf32>
    %c0_12 = arith.constant 0 : index
    %c0_13 = arith.constant 0 : index
    %28 = vector.load %arg5[%c0_12, %c0_13] : memref<1x384xf32, #tpu.memory_space<vmem>>, vector<1x384xf32>
    %29 = vector.broadcast %28 : vector<1x384xf32> to vector<16x384xf32>
    %30 = arith.addf %27, %29 : vector<16x384xf32>
    %31 = vector.extract_strided_slice %30 {offsets = [0, 0], sizes = [16, 128], strides = [1, 1]} : vector<16x384xf32> to vector<16x128xf32>
    %32 = arith.truncf %31 : vector<16x128xf32> to vector<16x128xbf16>
    %c0_14 = arith.constant 0 : index
    %c0_15 = arith.constant 0 : index
    %33 = vector.load %arg6[%c0_14, %c0_15] : memref<16x128xbf16, #tpu.memory_space<vmem>>, vector<16x128xbf16>
    tpu.vector_store %arg6[%c0_14, %c0_15], %32 {strides = array<i32>} : memref<16x128xbf16, #tpu.memory_space<vmem>>, vector<16x128xbf16>,
    %34 = vector.extract_strided_slice %30 {offsets = [0, 128], sizes = [16, 128], strides = [1, 1]} : vector<16x384xf32> to vector<16x128xf32>
    %35 = arith.truncf %34 : vector<16x128xf32> to vector<16x128xbf16>
    %c0_16 = arith.constant 0 : index
    %c0_17 = arith.constant 0 : index
    %36 = vector.load %arg7[%c0_16, %c0_17] : memref<16x128xbf16, #tpu.memory_space<vmem>>, vector<16x128xbf16>
    tpu.vector_store %arg7[%c0_16, %c0_17], %35 {strides = array<i32>} : memref<16x128xbf16, #tpu.memory_space<vmem>>, vector<16x128xbf16>,
    %37 = vector.extract_strided_slice %30 {offsets = [0, 256], sizes = [16, 128], strides = [1, 1]} : vector<16x384xf32> to vector<16x128xf32>
    %38 = arith.truncf %37 : vector<16x128xf32> to vector<16x128xbf16>
    %c0_18 = arith.constant 0 : index
    %c0_19 = arith.constant 0 : index
    %39 = vector.load %arg8[%c0_18, %c0_19] : memref<16x128xbf16, #tpu.memory_space<vmem>>, vector<16x128xbf16>
    tpu.vector_store %arg8[%c0_18, %c0_19], %38 {strides = array<i32>} : memref<16x128xbf16, #tpu.memory_space<vmem>>, vector<16x128xbf16>,
    return
  }
  func.func @transform_0(%arg0: i32) -> (i32, i32) {
    %c0_i32 = arith.constant 0 : i32
    %c0_i32_0 = arith.constant 0 : i32
    return %arg0, %c0_i32 : i32, i32
  }
  func.func @transform_1(%arg0: i32) -> (i32, i32) {
    %c0_i32 = arith.constant 0 : i32
    %c0_i32_0 = arith.constant 0 : i32
    %c0_i32_1 = arith.constant 0 : i32
    return %c0_i32, %c0_i32_0 : i32, i32
  }
  func.func @transform_2(%arg0: i32) -> (i32, i32) {
    %c0_i32 = arith.constant 0 : i32
    %c0_i32_0 = arith.constant 0 : i32
    %c0_i32_1 = arith.constant 0 : i32
    return %c0_i32, %c0_i32_0 : i32, i32
  }
  func.func @transform_3(%arg0: i32) -> (i32, i32) {
    %c0_i32 = arith.constant 0 : i32
    %c0_i32_0 = arith.constant 0 : i32
    %c0_i32_1 = arith.constant 0 : i32
    return %c0_i32, %c0_i32_0 : i32, i32
  }
  func.func @transform_4(%arg0: i32) -> (i32, i32) {
    %c0_i32 = arith.constant 0 : i32
    %c0_i32_0 = arith.constant 0 : i32
    %c0_i32_1 = arith.constant 0 : i32
    return %c0_i32, %c0_i32_0 : i32, i32
  }
  func.func @transform_5(%arg0: i32) -> (i32, i32) {
    %c0_i32 = arith.constant 0 : i32
    %c0_i32_0 = arith.constant 0 : i32
    return %arg0, %c0_i32 : i32, i32
  }
  func.func @transform_6(%arg0: i32) -> (i32, i32) {
    %c0_i32 = arith.constant 0 : i32
    %c0_i32_0 = arith.constant 0 : i32
    return %arg0, %c0_i32 : i32, i32
  }
  func.func @transform_7(%arg0: i32) -> (i32, i32) {
    %c0_i32 = arith.constant 0 : i32
    %c0_i32_0 = arith.constant 0 : i32
    return %arg0, %c0_i32 : i32, i32
  }
}

module attributes {stable_mosaic.version = 11 : i64} {
  func.func @_attn_kernel(%arg0: i32, %arg1: i32, %arg2: memref<1x8x128xbf16, #tpu.memory_space<vmem>>, %arg3: memref<1x8x128xbf16, #tpu.memory_space<vmem>>, %arg4: memref<1x8x128xbf16, #tpu.memory_space<vmem>>, %arg5: memref<1x1x8xi32, #tpu.memory_space<vmem>>, %arg6: memref<128x128xbf16, #tpu.memory_space<vmem>>, %arg7: memref<1x128xf32, #tpu.memory_space<vmem>>, %arg8: memref<1x8x128xf32, #tpu.memory_space<vmem>>, %arg9: memref<1x8x128xf32, #tpu.memory_space<vmem>>, %arg10: memref<8x128xf32, #tpu.memory_space<vmem>>) attributes {dimension_semantics = [#tpu.dimension_semantics<parallel>, #tpu.dimension_semantics<parallel>], iteration_bounds = array<i64: 2, 1>, scalar_prefetch = 0 : i64, scratch_operands = 1 : i64, tpu.core_type = #tpu.core_type<tc>, window_params = [{transform_indices = @transform_0, window_bounds = array<i64: 1, 8, 128>}, {transform_indices = @transform_1, window_bounds = array<i64: 1, 8, 128>}, {transform_indices = @transform_2, window_bounds = array<i64: 1, 8, 128>}, {transform_indices = @transform_3, window_bounds = array<i64: 1, 1, 8>}, {pipeline_mode = #tpu.pipeline_mode<synchronous>, transform_indices = @transform_4, window_bounds = array<i64: 128, 128>}, {pipeline_mode = #tpu.pipeline_mode<synchronous>, transform_indices = @transform_5, window_bounds = array<i64: 1, 128>}, {transform_indices = @transform_6, window_bounds = array<i64: 1, 8, 128>}, {transform_indices = @transform_7, window_bounds = array<i64: 1, 8, 128>}]} {
    %c0 = arith.constant 0 : index
    %c0_0 = arith.constant 0 : index
    %c0_1 = arith.constant 0 : index
    %0 = vector.load %arg2[%c0, %c0_0, %c0_1] : memref<1x8x128xbf16, #tpu.memory_space<vmem>>, vector<1x8x128xbf16>
    %1 = vector.shape_cast %0 : vector<1x8x128xbf16> to vector<8x128xbf16>
    %c0_2 = arith.constant 0 : index
    %c0_3 = arith.constant 0 : index
    %c0_4 = arith.constant 0 : index
    %2 = vector.load %arg3[%c0_2, %c0_3, %c0_4] : memref<1x8x128xbf16, #tpu.memory_space<vmem>>, vector<1x8x128xbf16>
    %3 = vector.shape_cast %2 : vector<1x8x128xbf16> to vector<8x128xbf16>
    %c0_5 = arith.constant 0 : index
    %c0_6 = arith.constant 0 : index
    %c0_7 = arith.constant 0 : index
    %4 = vector.load %arg4[%c0_5, %c0_6, %c0_7] : memref<1x8x128xbf16, #tpu.memory_space<vmem>>, vector<1x8x128xbf16>
    %5 = vector.shape_cast %4 : vector<1x8x128xbf16> to vector<8x128xbf16>
    %c0_8 = arith.constant 0 : index
    %c0_9 = arith.constant 0 : index
    %c0_10 = arith.constant 0 : index
    %6 = vector.load %arg5[%c0_8, %c0_9, %c0_10] : memref<1x1x8xi32, #tpu.memory_space<vmem>>, vector<1x1x8xi32>
    %7 = vector.shape_cast %6 : vector<1x1x8xi32> to vector<1x8xi32>
    %c0_i32 = arith.constant 0 : i32
    %8 = vector.broadcast %c0_i32 : i32 to vector<1x8xi32>
    %9 = arith.cmpi sgt, %7, %8 : vector<1x8xi32>
    %10 = vector.shape_cast %9 : vector<1x8xi1> to vector<1x8xi1>
    %11 = vector.broadcast %10 : vector<1x8xi1> to vector<8x8xi1>
    %12 = tpu.iota {dimensions = array<i32: 0>} : vector<8x8xi32>
    %c8_i32 = arith.constant 8 : i32
    %13 = arith.muli %arg1, %c8_i32 : i32
    %14 = vector.broadcast %13 : i32 to vector<8x8xi32>
    %15 = arith.addi %12, %14 : vector<8x8xi32>
    %16 = tpu.iota {dimensions = array<i32: 1>} : vector<8x8xi32>
    %17 = arith.cmpi sge, %15, %16 : vector<8x8xi32>
    %18 = arith.andi %11, %17 : vector<8x8xi1>
    %cst = arith.constant 0.000000e+00 : f32
    %cst_11 = arith.constant -1.000000e+09 : f32
    %19 = vector.broadcast %cst : f32 to vector<8x8xf32>
    %20 = vector.broadcast %cst_11 : f32 to vector<8x8xf32>
    %21 = arith.select %18, %19, %20 : vector<8x8xi1>, vector<8x8xf32>
    %22 = vector.extract_strided_slice %1 {offsets = [0, 0], sizes = [8, 32], strides = [1, 1]} : vector<8x128xbf16> to vector<8x32xbf16>
    %23 = vector.extract_strided_slice %3 {offsets = [0, 0], sizes = [8, 32], strides = [1, 1]} : vector<8x128xbf16> to vector<8x32xbf16>
    %cst_12 = arith.constant dense<0.000000e+00> : vector<8x8xf32>
    %24 = tpu.matmul %22, %23, %cst_12 {dimension_numbers = #tpu.dot_dimension_numbers<[1], [1], [0], [0], [0, 0, 1, 0], [], []>} : vector<8x32xbf16>, vector<8x32xbf16>, vector<8x8xf32> -> vector<8x8xf32>
    %25 = arith.addf %24, %21 : vector<8x8xf32>
    %cst_13 = arith.constant dense<0xFF800000> : vector<8xf32>
    %26 = vector.multi_reduction <maximumf>, %25, %cst_13 [1] : vector<8x8xf32> to vector<8xf32>
    %27 = vector.shape_cast %26 : vector<8xf32> to vector<8x1xf32>
    %28 = vector.broadcast %27 : vector<8x1xf32> to vector<8x8xf32>
    %29 = arith.subf %25, %28 : vector<8x8xf32>
    %30 = math.exp %29 : vector<8x8xf32>
    %cst_14 = arith.constant dense<0.000000e+00> : vector<8xf32>
    %31 = vector.multi_reduction <add>, %30, %cst_14 [1] : vector<8x8xf32> to vector<8xf32>
    %32 = vector.shape_cast %31 : vector<8xf32> to vector<8x1xf32>
    %33 = tpu.reciprocal %32 : vector<8x1xf32> -> vector<8x1xf32>
    %34 = vector.broadcast %33 : vector<8x1xf32> to vector<8x8xf32>
    %35 = arith.mulf %30, %34 : vector<8x8xf32>
    %36 = arith.truncf %35 : vector<8x8xf32> to vector<8x8xbf16>
    %37 = vector.extract_strided_slice %5 {offsets = [0, 0], sizes = [8, 32], strides = [1, 1]} : vector<8x128xbf16> to vector<8x32xbf16>
    %cst_15 = arith.constant dense<0.000000e+00> : vector<8x32xf32>
    %38 = tpu.matmul %36, %37, %cst_15 {dimension_numbers = #tpu.dot_dimension_numbers<[1], [0], [0], [1], [0, 0, 1, 1], [], []>} : vector<8x8xbf16>, vector<8x32xbf16>, vector<8x32xf32> -> vector<8x32xf32>
    %c0_16 = arith.constant 0 : index
    %c0_17 = arith.constant 0 : index
    %39 = vector.load %arg10[%c0_16, %c0_17] : memref<8x128xf32, #tpu.memory_space<vmem>>, vector<8x32xf32>
    tpu.vector_store %arg10[%c0_16, %c0_17], %38 {strides = array<i32>} : memref<8x128xf32, #tpu.memory_space<vmem>>, vector<8x32xf32>,
    %40 = vector.extract_strided_slice %1 {offsets = [0, 32], sizes = [8, 32], strides = [1, 1]} : vector<8x128xbf16> to vector<8x32xbf16>
    %41 = vector.extract_strided_slice %3 {offsets = [0, 32], sizes = [8, 32], strides = [1, 1]} : vector<8x128xbf16> to vector<8x32xbf16>
    %cst_18 = arith.constant dense<0.000000e+00> : vector<8x8xf32>
    %42 = tpu.matmul %40, %41, %cst_18 {dimension_numbers = #tpu.dot_dimension_numbers<[1], [1], [0], [0], [0, 0, 1, 0], [], []>} : vector<8x32xbf16>, vector<8x32xbf16>, vector<8x8xf32> -> vector<8x8xf32>
    %43 = arith.addf %42, %21 : vector<8x8xf32>
    %cst_19 = arith.constant dense<0xFF800000> : vector<8xf32>
    %44 = vector.multi_reduction <maximumf>, %43, %cst_19 [1] : vector<8x8xf32> to vector<8xf32>
    %45 = vector.shape_cast %44 : vector<8xf32> to vector<8x1xf32>
    %46 = vector.broadcast %45 : vector<8x1xf32> to vector<8x8xf32>
    %47 = arith.subf %43, %46 : vector<8x8xf32>
    %48 = math.exp %47 : vector<8x8xf32>
    %cst_20 = arith.constant dense<0.000000e+00> : vector<8xf32>
    %49 = vector.multi_reduction <add>, %48, %cst_20 [1] : vector<8x8xf32> to vector<8xf32>
    %50 = vector.shape_cast %49 : vector<8xf32> to vector<8x1xf32>
    %51 = tpu.reciprocal %50 : vector<8x1xf32> -> vector<8x1xf32>
    %52 = vector.broadcast %51 : vector<8x1xf32> to vector<8x8xf32>
    %53 = arith.mulf %48, %52 : vector<8x8xf32>
    %54 = arith.truncf %53 : vector<8x8xf32> to vector<8x8xbf16>
    %55 = vector.extract_strided_slice %5 {offsets = [0, 32], sizes = [8, 32], strides = [1, 1]} : vector<8x128xbf16> to vector<8x32xbf16>
    %cst_21 = arith.constant dense<0.000000e+00> : vector<8x32xf32>
    %56 = tpu.matmul %54, %55, %cst_21 {dimension_numbers = #tpu.dot_dimension_numbers<[1], [0], [0], [1], [0, 0, 1, 1], [], []>} : vector<8x8xbf16>, vector<8x32xbf16>, vector<8x32xf32> -> vector<8x32xf32>
    %c0_22 = arith.constant 0 : index
    %c32 = arith.constant 32 : index
    %57 = vector.load %arg10[%c0_22, %c32] : memref<8x128xf32, #tpu.memory_space<vmem>>, vector<8x32xf32>
    tpu.vector_store %arg10[%c0_22, %c32], %56 {strides = array<i32>} : memref<8x128xf32, #tpu.memory_space<vmem>>, vector<8x32xf32>,
    %58 = vector.extract_strided_slice %1 {offsets = [0, 64], sizes = [8, 32], strides = [1, 1]} : vector<8x128xbf16> to vector<8x32xbf16>
    %59 = vector.extract_strided_slice %3 {offsets = [0, 64], sizes = [8, 32], strides = [1, 1]} : vector<8x128xbf16> to vector<8x32xbf16>
    %cst_23 = arith.constant dense<0.000000e+00> : vector<8x8xf32>
    %60 = tpu.matmul %58, %59, %cst_23 {dimension_numbers = #tpu.dot_dimension_numbers<[1], [1], [0], [0], [0, 0, 1, 0], [], []>} : vector<8x32xbf16>, vector<8x32xbf16>, vector<8x8xf32> -> vector<8x8xf32>
    %61 = arith.addf %60, %21 : vector<8x8xf32>
    %cst_24 = arith.constant dense<0xFF800000> : vector<8xf32>
    %62 = vector.multi_reduction <maximumf>, %61, %cst_24 [1] : vector<8x8xf32> to vector<8xf32>
    %63 = vector.shape_cast %62 : vector<8xf32> to vector<8x1xf32>
    %64 = vector.broadcast %63 : vector<8x1xf32> to vector<8x8xf32>
    %65 = arith.subf %61, %64 : vector<8x8xf32>
    %66 = math.exp %65 : vector<8x8xf32>
    %cst_25 = arith.constant dense<0.000000e+00> : vector<8xf32>
    %67 = vector.multi_reduction <add>, %66, %cst_25 [1] : vector<8x8xf32> to vector<8xf32>
    %68 = vector.shape_cast %67 : vector<8xf32> to vector<8x1xf32>
    %69 = tpu.reciprocal %68 : vector<8x1xf32> -> vector<8x1xf32>
    %70 = vector.broadcast %69 : vector<8x1xf32> to vector<8x8xf32>
    %71 = arith.mulf %66, %70 : vector<8x8xf32>
    %72 = arith.truncf %71 : vector<8x8xf32> to vector<8x8xbf16>
    %73 = vector.extract_strided_slice %5 {offsets = [0, 64], sizes = [8, 32], strides = [1, 1]} : vector<8x128xbf16> to vector<8x32xbf16>
    %cst_26 = arith.constant dense<0.000000e+00> : vector<8x32xf32>
    %74 = tpu.matmul %72, %73, %cst_26 {dimension_numbers = #tpu.dot_dimension_numbers<[1], [0], [0], [1], [0, 0, 1, 1], [], []>} : vector<8x8xbf16>, vector<8x32xbf16>, vector<8x32xf32> -> vector<8x32xf32>
    %c0_27 = arith.constant 0 : index
    %c64 = arith.constant 64 : index
    %75 = vector.load %arg10[%c0_27, %c64] : memref<8x128xf32, #tpu.memory_space<vmem>>, vector<8x32xf32>
    tpu.vector_store %arg10[%c0_27, %c64], %74 {strides = array<i32>} : memref<8x128xf32, #tpu.memory_space<vmem>>, vector<8x32xf32>,
    %76 = vector.extract_strided_slice %1 {offsets = [0, 96], sizes = [8, 32], strides = [1, 1]} : vector<8x128xbf16> to vector<8x32xbf16>
    %77 = vector.extract_strided_slice %3 {offsets = [0, 96], sizes = [8, 32], strides = [1, 1]} : vector<8x128xbf16> to vector<8x32xbf16>
    %cst_28 = arith.constant dense<0.000000e+00> : vector<8x8xf32>
    %78 = tpu.matmul %76, %77, %cst_28 {dimension_numbers = #tpu.dot_dimension_numbers<[1], [1], [0], [0], [0, 0, 1, 0], [], []>} : vector<8x32xbf16>, vector<8x32xbf16>, vector<8x8xf32> -> vector<8x8xf32>
    %79 = arith.addf %78, %21 : vector<8x8xf32>
    %cst_29 = arith.constant dense<0xFF800000> : vector<8xf32>
    %80 = vector.multi_reduction <maximumf>, %79, %cst_29 [1] : vector<8x8xf32> to vector<8xf32>
    %81 = vector.shape_cast %80 : vector<8xf32> to vector<8x1xf32>
    %82 = vector.broadcast %81 : vector<8x1xf32> to vector<8x8xf32>
    %83 = arith.subf %79, %82 : vector<8x8xf32>
    %84 = math.exp %83 : vector<8x8xf32>
    %cst_30 = arith.constant dense<0.000000e+00> : vector<8xf32>
    %85 = vector.multi_reduction <add>, %84, %cst_30 [1] : vector<8x8xf32> to vector<8xf32>
    %86 = vector.shape_cast %85 : vector<8xf32> to vector<8x1xf32>
    %87 = tpu.reciprocal %86 : vector<8x1xf32> -> vector<8x1xf32>
    %88 = vector.broadcast %87 : vector<8x1xf32> to vector<8x8xf32>
    %89 = arith.mulf %84, %88 : vector<8x8xf32>
    %90 = arith.truncf %89 : vector<8x8xf32> to vector<8x8xbf16>
    %91 = vector.extract_strided_slice %5 {offsets = [0, 96], sizes = [8, 32], strides = [1, 1]} : vector<8x128xbf16> to vector<8x32xbf16>
    %cst_31 = arith.constant dense<0.000000e+00> : vector<8x32xf32>
    %92 = tpu.matmul %90, %91, %cst_31 {dimension_numbers = #tpu.dot_dimension_numbers<[1], [0], [0], [1], [0, 0, 1, 1], [], []>} : vector<8x8xbf16>, vector<8x32xbf16>, vector<8x32xf32> -> vector<8x32xf32>
    %c0_32 = arith.constant 0 : index
    %c96 = arith.constant 96 : index
    %93 = vector.load %arg10[%c0_32, %c96] : memref<8x128xf32, #tpu.memory_space<vmem>>, vector<8x32xf32>
    tpu.vector_store %arg10[%c0_32, %c96], %92 {strides = array<i32>} : memref<8x128xf32, #tpu.memory_space<vmem>>, vector<8x32xf32>,
    %c0_33 = arith.constant 0 : index
    %c0_34 = arith.constant 0 : index
    %94 = vector.load %arg10[%c0_33, %c0_34] : memref<8x128xf32, #tpu.memory_space<vmem>>, vector<8x128xf32>
    %95 = arith.truncf %94 : vector<8x128xf32> to vector<8x128xbf16>
    %c0_35 = arith.constant 0 : index
    %c0_36 = arith.constant 0 : index
    %96 = vector.load %arg6[%c0_35, %c0_36] : memref<128x128xbf16, #tpu.memory_space<vmem>>, vector<128x128xbf16>
    %cst_37 = arith.constant dense<0.000000e+00> : vector<8x128xf32>
    %97 = tpu.matmul %95, %96, %cst_37 {dimension_numbers = #tpu.dot_dimension_numbers<[1], [0], [0], [1], [0, 0, 1, 1], [], []>} : vector<8x128xbf16>, vector<128x128xbf16>, vector<8x128xf32> -> vector<8x128xf32>
    %c0_38 = arith.constant 0 : index
    %c0_39 = arith.constant 0 : index
    %c0_40 = arith.constant 0 : index
    %98 = vector.load %arg8[%c0_38, %c0_39, %c0_40] : memref<1x8x128xf32, #tpu.memory_space<vmem>>, vector<1x8x128xf32>
    %99 = vector.shape_cast %98 : vector<1x8x128xf32> to vector<8x128xf32>
    %100 = arith.addf %99, %97 : vector<8x128xf32>
    %c0_41 = arith.constant 0 : index
    %c0_42 = arith.constant 0 : index
    %101 = vector.load %arg7[%c0_41, %c0_42] : memref<1x128xf32, #tpu.memory_space<vmem>>, vector<1x128xf32>
    %102 = vector.broadcast %101 : vector<1x128xf32> to vector<8x128xf32>
    %103 = arith.addf %100, %102 : vector<8x128xf32>
    %c0_43 = arith.constant 0 : index
    %c0_44 = arith.constant 0 : index
    %c0_45 = arith.constant 0 : index
    %104 = vector.load %arg9[%c0_43, %c0_44, %c0_45] : memref<1x8x128xf32, #tpu.memory_space<vmem>>, vector<1x8x128xf32>
    %105 = vector.shape_cast %104 : vector<1x8x128xf32> to vector<8x128xf32>
    %106 = vector.shape_cast %103 : vector<8x128xf32> to vector<1x8x128xf32>
    tpu.vector_store %arg9[%c0_43, %c0_44, %c0_45], %106 {strides = array<i32>} : memref<1x8x128xf32, #tpu.memory_space<vmem>>, vector<1x8x128xf32>,
    return
  }
  func.func @transform_0(%arg0: i32, %arg1: i32) -> (i32, i32, i32) {
    %c0_i32 = arith.constant 0 : i32
    %c0_i32_0 = arith.constant 0 : i32
    return %arg0, %arg1, %c0_i32 : i32, i32, i32
  }
  func.func @transform_1(%arg0: i32, %arg1: i32) -> (i32, i32, i32) {
    %c0_i32 = arith.constant 0 : i32
    %c0_i32_0 = arith.constant 0 : i32
    %c0_i32_1 = arith.constant 0 : i32
    return %arg0, %c0_i32, %c0_i32_0 : i32, i32, i32
  }
  func.func @transform_2(%arg0: i32, %arg1: i32) -> (i32, i32, i32) {
    %c0_i32 = arith.constant 0 : i32
    %c0_i32_0 = arith.constant 0 : i32
    %c0_i32_1 = arith.constant 0 : i32
    return %arg0, %c0_i32, %c0_i32_0 : i32, i32, i32
  }
  func.func @transform_3(%arg0: i32, %arg1: i32) -> (i32, i32, i32) {
    %c0_i32 = arith.constant 0 : i32
    %c0_i32_0 = arith.constant 0 : i32
    %c0_i32_1 = arith.constant 0 : i32
    return %arg0, %c0_i32, %c0_i32_0 : i32, i32, i32
  }
  func.func @transform_4(%arg0: i32, %arg1: i32) -> (i32, i32) {
    %c0_i32 = arith.constant 0 : i32
    %c0_i32_0 = arith.constant 0 : i32
    %c0_i32_1 = arith.constant 0 : i32
    return %c0_i32, %c0_i32_0 : i32, i32
  }
  func.func @transform_5(%arg0: i32, %arg1: i32) -> (i32, i32) {
    %c0_i32 = arith.constant 0 : i32
    %c0_i32_0 = arith.constant 0 : i32
    %c0_i32_1 = arith.constant 0 : i32
    return %c0_i32, %c0_i32_0 : i32, i32
  }
  func.func @transform_6(%arg0: i32, %arg1: i32) -> (i32, i32, i32) {
    %c0_i32 = arith.constant 0 : i32
    %c0_i32_0 = arith.constant 0 : i32
    return %arg0, %arg1, %c0_i32 : i32, i32, i32
  }
  func.func @transform_7(%arg0: i32, %arg1: i32) -> (i32, i32, i32) {
    %c0_i32 = arith.constant 0 : i32
    %c0_i32_0 = arith.constant 0 : i32
    return %arg0, %arg1, %c0_i32 : i32, i32, i32
  }
}

module attributes {stable_mosaic.version = 11 : i64} {
  func.func @_ln_proj_kernel(%arg0: i32, %arg1: memref<16x128xf32, #tpu.memory_space<vmem>>, %arg2: memref<128x256xbf16, #tpu.memory_space<vmem>>, %arg3: memref<1x256xf32, #tpu.memory_space<vmem>>, %arg4: memref<16x128xbf16, #tpu.memory_space<vmem>>, %arg5: memref<16x128xbf16, #tpu.memory_space<vmem>>) attributes {dimension_semantics = [#tpu.dimension_semantics<parallel>], iteration_bounds = array<i64: 1>, scalar_prefetch = 0 : i64, scratch_operands = 0 : i64, tpu.core_type = #tpu.core_type<tc>, window_params = [{transform_indices = @transform_0, window_bounds = array<i64: 16, 128>}, {pipeline_mode = #tpu.pipeline_mode<synchronous>, transform_indices = @transform_1, window_bounds = array<i64: 128, 256>}, {pipeline_mode = #tpu.pipeline_mode<synchronous>, transform_indices = @transform_2, window_bounds = array<i64: 1, 256>}, {transform_indices = @transform_3, window_bounds = array<i64: 16, 128>}, {transform_indices = @transform_4, window_bounds = array<i64: 16, 128>}]} {
    %c0 = arith.constant 0 : index
    %c0_0 = arith.constant 0 : index
    %0 = vector.load %arg1[%c0, %c0_0] : memref<16x128xf32, #tpu.memory_space<vmem>>, vector<16x128xf32>
    %1 = arith.truncf %0 : vector<16x128xf32> to vector<16x128xbf16>
    %c0_1 = arith.constant 0 : index
    %c0_2 = arith.constant 0 : index
    %2 = vector.load %arg2[%c0_1, %c0_2] : memref<128x256xbf16, #tpu.memory_space<vmem>>, vector<128x256xbf16>
    %cst = arith.constant dense<0.000000e+00> : vector<16x256xf32>
    %3 = tpu.matmul %1, %2, %cst {dimension_numbers = #tpu.dot_dimension_numbers<[1], [0], [0], [1], [0, 0, 1, 1], [], []>} : vector<16x128xbf16>, vector<128x256xbf16>, vector<16x256xf32> -> vector<16x256xf32>
    %c0_3 = arith.constant 0 : index
    %c0_4 = arith.constant 0 : index
    %4 = vector.load %arg3[%c0_3, %c0_4] : memref<1x256xf32, #tpu.memory_space<vmem>>, vector<1x256xf32>
    %5 = vector.broadcast %4 : vector<1x256xf32> to vector<16x256xf32>
    %6 = arith.addf %3, %5 : vector<16x256xf32>
    %7 = vector.extract_strided_slice %6 {offsets = [0, 0], sizes = [16, 128], strides = [1, 1]} : vector<16x256xf32> to vector<16x128xf32>
    %8 = arith.truncf %7 : vector<16x128xf32> to vector<16x128xbf16>
    %c0_5 = arith.constant 0 : index
    %c0_6 = arith.constant 0 : index
    %9 = vector.load %arg4[%c0_5, %c0_6] : memref<16x128xbf16, #tpu.memory_space<vmem>>, vector<16x128xbf16>
    tpu.vector_store %arg4[%c0_5, %c0_6], %8 {strides = array<i32>} : memref<16x128xbf16, #tpu.memory_space<vmem>>, vector<16x128xbf16>,
    %10 = vector.extract_strided_slice %6 {offsets = [0, 128], sizes = [16, 128], strides = [1, 1]} : vector<16x256xf32> to vector<16x128xf32>
    %11 = arith.truncf %10 : vector<16x128xf32> to vector<16x128xbf16>
    %c0_7 = arith.constant 0 : index
    %c0_8 = arith.constant 0 : index
    %12 = vector.load %arg5[%c0_7, %c0_8] : memref<16x128xbf16, #tpu.memory_space<vmem>>, vector<16x128xbf16>
    tpu.vector_store %arg5[%c0_7, %c0_8], %11 {strides = array<i32>} : memref<16x128xbf16, #tpu.memory_space<vmem>>, vector<16x128xbf16>,
    return
  }
  func.func @transform_0(%arg0: i32) -> (i32, i32) {
    %c0_i32 = arith.constant 0 : i32
    %c0_i32_0 = arith.constant 0 : i32
    return %arg0, %c0_i32 : i32, i32
  }
  func.func @transform_1(%arg0: i32) -> (i32, i32) {
    %c0_i32 = arith.constant 0 : i32
    %c0_i32_0 = arith.constant 0 : i32
    %c0_i32_1 = arith.constant 0 : i32
    return %c0_i32, %c0_i32_0 : i32, i32
  }
  func.func @transform_2(%arg0: i32) -> (i32, i32) {
    %c0_i32 = arith.constant 0 : i32
    %c0_i32_0 = arith.constant 0 : i32
    %c0_i32_1 = arith.constant 0 : i32
    return %c0_i32, %c0_i32_0 : i32, i32
  }
  func.func @transform_3(%arg0: i32) -> (i32, i32) {
    %c0_i32 = arith.constant 0 : i32
    %c0_i32_0 = arith.constant 0 : i32
    return %arg0, %c0_i32 : i32, i32
  }
  func.func @transform_4(%arg0: i32) -> (i32, i32) {
    %c0_i32 = arith.constant 0 : i32
    %c0_i32_0 = arith.constant 0 : i32
    return %arg0, %c0_i32 : i32, i32
  }
}

module attributes {stable_mosaic.version = 11 : i64} {
  func.func @_ln_proj_kernel(%arg0: i32, %arg1: memref<16x128xf32, #tpu.memory_space<vmem>>, %arg2: memref<1x128xf32, #tpu.memory_space<vmem>>, %arg3: memref<1x128xf32, #tpu.memory_space<vmem>>, %arg4: memref<128x128xbf16, #tpu.memory_space<vmem>>, %arg5: memref<1x128xf32, #tpu.memory_space<vmem>>, %arg6: memref<16x128xbf16, #tpu.memory_space<vmem>>) attributes {dimension_semantics = [#tpu.dimension_semantics<parallel>], iteration_bounds = array<i64: 1>, scalar_prefetch = 0 : i64, scratch_operands = 0 : i64, tpu.core_type = #tpu.core_type<tc>, window_params = [{transform_indices = @transform_0, window_bounds = array<i64: 16, 128>}, {pipeline_mode = #tpu.pipeline_mode<synchronous>, transform_indices = @transform_1, window_bounds = array<i64: 1, 128>}, {pipeline_mode = #tpu.pipeline_mode<synchronous>, transform_indices = @transform_2, window_bounds = array<i64: 1, 128>}, {pipeline_mode = #tpu.pipeline_mode<synchronous>, transform_indices = @transform_3, window_bounds = array<i64: 128, 128>}, {pipeline_mode = #tpu.pipeline_mode<synchronous>, transform_indices = @transform_4, window_bounds = array<i64: 1, 128>}, {transform_indices = @transform_5, window_bounds = array<i64: 16, 128>}]} {
    %c0 = arith.constant 0 : index
    %c0_0 = arith.constant 0 : index
    %0 = vector.load %arg1[%c0, %c0_0] : memref<16x128xf32, #tpu.memory_space<vmem>>, vector<16x128xf32>
    %cst = arith.constant dense<0.000000e+00> : vector<16xf32>
    %1 = vector.multi_reduction <add>, %0, %cst [1] : vector<16x128xf32> to vector<16xf32>
    %2 = vector.shape_cast %1 : vector<16xf32> to vector<16x1xf32>
    %cst_1 = arith.constant 1.280000e+02 : f32
    %3 = vector.broadcast %cst_1 : f32 to vector<16x1xf32>
    %4 = arith.divf %2, %3 : vector<16x1xf32>
    %5 = vector.broadcast %4 : vector<16x1xf32> to vector<16x128xf32>
    %6 = arith.subf %0, %5 : vector<16x128xf32>
    %7 = arith.mulf %6, %6 : vector<16x128xf32>
    %cst_2 = arith.constant dense<0.000000e+00> : vector<16xf32>
    %8 = vector.multi_reduction <add>, %7, %cst_2 [1] : vector<16x128xf32> to vector<16xf32>
    %9 = vector.shape_cast %8 : vector<16xf32> to vector<16x1xf32>
    %cst_3 = arith.constant 1.280000e+02 : f32
    %10 = vector.broadcast %cst_3 : f32 to vector<16x1xf32>
    %11 = arith.divf %9, %10 : vector<16x1xf32>
    %12 = vector.broadcast %4 : vector<16x1xf32> to vector<16x128xf32>
    %13 = arith.subf %0, %12 : vector<16x128xf32>
    %cst_4 = arith.constant 9.99999974E-6 : f32
    %14 = vector.broadcast %cst_4 : f32 to vector<16x1xf32>
    %15 = arith.addf %11, %14 : vector<16x1xf32>
    %16 = math.rsqrt %15 : vector<16x1xf32>
    %17 = vector.broadcast %16 : vector<16x1xf32> to vector<16x128xf32>
    %18 = arith.mulf %13, %17 : vector<16x128xf32>
    %c0_5 = arith.constant 0 : index
    %c0_6 = arith.constant 0 : index
    %19 = vector.load %arg2[%c0_5, %c0_6] : memref<1x128xf32, #tpu.memory_space<vmem>>, vector<1x128xf32>
    %20 = vector.broadcast %19 : vector<1x128xf32> to vector<16x128xf32>
    %21 = arith.mulf %18, %20 : vector<16x128xf32>
    %c0_7 = arith.constant 0 : index
    %c0_8 = arith.constant 0 : index
    %22 = vector.load %arg3[%c0_7, %c0_8] : memref<1x128xf32, #tpu.memory_space<vmem>>, vector<1x128xf32>
    %23 = vector.broadcast %22 : vector<1x128xf32> to vector<16x128xf32>
    %24 = arith.addf %21, %23 : vector<16x128xf32>
    %25 = arith.truncf %24 : vector<16x128xf32> to vector<16x128xbf16>
    %c0_9 = arith.constant 0 : index
    %c0_10 = arith.constant 0 : index
    %26 = vector.load %arg4[%c0_9, %c0_10] : memref<128x128xbf16, #tpu.memory_space<vmem>>, vector<128x128xbf16>
    %cst_11 = arith.constant dense<0.000000e+00> : vector<16x128xf32>
    %27 = tpu.matmul %25, %26, %cst_11 {dimension_numbers = #tpu.dot_dimension_numbers<[1], [0], [0], [1], [0, 0, 1, 1], [], []>} : vector<16x128xbf16>, vector<128x128xbf16>, vector<16x128xf32> -> vector<16x128xf32>
    %c0_12 = arith.constant 0 : index
    %c0_13 = arith.constant 0 : index
    %28 = vector.load %arg5[%c0_12, %c0_13] : memref<1x128xf32, #tpu.memory_space<vmem>>, vector<1x128xf32>
    %29 = vector.broadcast %28 : vector<1x128xf32> to vector<16x128xf32>
    %30 = arith.addf %27, %29 : vector<16x128xf32>
    %31 = arith.truncf %30 : vector<16x128xf32> to vector<16x128xbf16>
    %c0_14 = arith.constant 0 : index
    %c0_15 = arith.constant 0 : index
    %32 = vector.load %arg6[%c0_14, %c0_15] : memref<16x128xbf16, #tpu.memory_space<vmem>>, vector<16x128xbf16>
    tpu.vector_store %arg6[%c0_14, %c0_15], %31 {strides = array<i32>} : memref<16x128xbf16, #tpu.memory_space<vmem>>, vector<16x128xbf16>,
    return
  }
  func.func @transform_0(%arg0: i32) -> (i32, i32) {
    %c0_i32 = arith.constant 0 : i32
    %c0_i32_0 = arith.constant 0 : i32
    return %arg0, %c0_i32 : i32, i32
  }
  func.func @transform_1(%arg0: i32) -> (i32, i32) {
    %c0_i32 = arith.constant 0 : i32
    %c0_i32_0 = arith.constant 0 : i32
    %c0_i32_1 = arith.constant 0 : i32
    return %c0_i32, %c0_i32_0 : i32, i32
  }
  func.func @transform_2(%arg0: i32) -> (i32, i32) {
    %c0_i32 = arith.constant 0 : i32
    %c0_i32_0 = arith.constant 0 : i32
    %c0_i32_1 = arith.constant 0 : i32
    return %c0_i32, %c0_i32_0 : i32, i32
  }
  func.func @transform_3(%arg0: i32) -> (i32, i32) {
    %c0_i32 = arith.constant 0 : i32
    %c0_i32_0 = arith.constant 0 : i32
    %c0_i32_1 = arith.constant 0 : i32
    return %c0_i32, %c0_i32_0 : i32, i32
  }
  func.func @transform_4(%arg0: i32) -> (i32, i32) {
    %c0_i32 = arith.constant 0 : i32
    %c0_i32_0 = arith.constant 0 : i32
    %c0_i32_1 = arith.constant 0 : i32
    return %c0_i32, %c0_i32_0 : i32, i32
  }
  func.func @transform_5(%arg0: i32) -> (i32, i32) {
    %c0_i32 = arith.constant 0 : i32
    %c0_i32_0 = arith.constant 0 : i32
    return %arg0, %c0_i32 : i32, i32
  }
}

module attributes {stable_mosaic.version = 11 : i64} {
  func.func @_attn_kernel(%arg0: i32, %arg1: i32, %arg2: memref<1x8x128xbf16, #tpu.memory_space<vmem>>, %arg3: memref<1x8x128xbf16, #tpu.memory_space<vmem>>, %arg4: memref<1x8x128xbf16, #tpu.memory_space<vmem>>, %arg5: memref<1x1x8xi32, #tpu.memory_space<vmem>>, %arg6: memref<128x128xbf16, #tpu.memory_space<vmem>>, %arg7: memref<1x128xf32, #tpu.memory_space<vmem>>, %arg8: memref<1x8x128xf32, #tpu.memory_space<vmem>>, %arg9: memref<1x8x128xf32, #tpu.memory_space<vmem>>, %arg10: memref<8x128xf32, #tpu.memory_space<vmem>>) attributes {dimension_semantics = [#tpu.dimension_semantics<parallel>, #tpu.dimension_semantics<parallel>], iteration_bounds = array<i64: 2, 1>, scalar_prefetch = 0 : i64, scratch_operands = 1 : i64, tpu.core_type = #tpu.core_type<tc>, window_params = [{transform_indices = @transform_0, window_bounds = array<i64: 1, 8, 128>}, {transform_indices = @transform_1, window_bounds = array<i64: 1, 8, 128>}, {transform_indices = @transform_2, window_bounds = array<i64: 1, 8, 128>}, {transform_indices = @transform_3, window_bounds = array<i64: 1, 1, 8>}, {pipeline_mode = #tpu.pipeline_mode<synchronous>, transform_indices = @transform_4, window_bounds = array<i64: 128, 128>}, {pipeline_mode = #tpu.pipeline_mode<synchronous>, transform_indices = @transform_5, window_bounds = array<i64: 1, 128>}, {transform_indices = @transform_6, window_bounds = array<i64: 1, 8, 128>}, {transform_indices = @transform_7, window_bounds = array<i64: 1, 8, 128>}]} {
    %c0 = arith.constant 0 : index
    %c0_0 = arith.constant 0 : index
    %c0_1 = arith.constant 0 : index
    %0 = vector.load %arg2[%c0, %c0_0, %c0_1] : memref<1x8x128xbf16, #tpu.memory_space<vmem>>, vector<1x8x128xbf16>
    %1 = vector.shape_cast %0 : vector<1x8x128xbf16> to vector<8x128xbf16>
    %c0_2 = arith.constant 0 : index
    %c0_3 = arith.constant 0 : index
    %c0_4 = arith.constant 0 : index
    %2 = vector.load %arg3[%c0_2, %c0_3, %c0_4] : memref<1x8x128xbf16, #tpu.memory_space<vmem>>, vector<1x8x128xbf16>
    %3 = vector.shape_cast %2 : vector<1x8x128xbf16> to vector<8x128xbf16>
    %c0_5 = arith.constant 0 : index
    %c0_6 = arith.constant 0 : index
    %c0_7 = arith.constant 0 : index
    %4 = vector.load %arg4[%c0_5, %c0_6, %c0_7] : memref<1x8x128xbf16, #tpu.memory_space<vmem>>, vector<1x8x128xbf16>
    %5 = vector.shape_cast %4 : vector<1x8x128xbf16> to vector<8x128xbf16>
    %c0_8 = arith.constant 0 : index
    %c0_9 = arith.constant 0 : index
    %c0_10 = arith.constant 0 : index
    %6 = vector.load %arg5[%c0_8, %c0_9, %c0_10] : memref<1x1x8xi32, #tpu.memory_space<vmem>>, vector<1x1x8xi32>
    %7 = vector.shape_cast %6 : vector<1x1x8xi32> to vector<1x8xi32>
    %c0_i32 = arith.constant 0 : i32
    %8 = vector.broadcast %c0_i32 : i32 to vector<1x8xi32>
    %9 = arith.cmpi sgt, %7, %8 : vector<1x8xi32>
    %10 = vector.shape_cast %9 : vector<1x8xi1> to vector<1x8xi1>
    %11 = vector.broadcast %10 : vector<1x8xi1> to vector<8x8xi1>
    %cst = arith.constant 0.000000e+00 : f32
    %cst_11 = arith.constant -1.000000e+09 : f32
    %12 = vector.broadcast %cst : f32 to vector<8x8xf32>
    %13 = vector.broadcast %cst_11 : f32 to vector<8x8xf32>
    %14 = arith.select %11, %12, %13 : vector<8x8xi1>, vector<8x8xf32>
    %15 = vector.extract_strided_slice %1 {offsets = [0, 0], sizes = [8, 32], strides = [1, 1]} : vector<8x128xbf16> to vector<8x32xbf16>
    %16 = vector.extract_strided_slice %3 {offsets = [0, 0], sizes = [8, 32], strides = [1, 1]} : vector<8x128xbf16> to vector<8x32xbf16>
    %cst_12 = arith.constant dense<0.000000e+00> : vector<8x8xf32>
    %17 = tpu.matmul %15, %16, %cst_12 {dimension_numbers = #tpu.dot_dimension_numbers<[1], [1], [0], [0], [0, 0, 1, 0], [], []>} : vector<8x32xbf16>, vector<8x32xbf16>, vector<8x8xf32> -> vector<8x8xf32>
    %18 = arith.addf %17, %14 : vector<8x8xf32>
    %cst_13 = arith.constant dense<0xFF800000> : vector<8xf32>
    %19 = vector.multi_reduction <maximumf>, %18, %cst_13 [1] : vector<8x8xf32> to vector<8xf32>
    %20 = vector.shape_cast %19 : vector<8xf32> to vector<8x1xf32>
    %21 = vector.broadcast %20 : vector<8x1xf32> to vector<8x8xf32>
    %22 = arith.subf %18, %21 : vector<8x8xf32>
    %23 = math.exp %22 : vector<8x8xf32>
    %cst_14 = arith.constant dense<0.000000e+00> : vector<8xf32>
    %24 = vector.multi_reduction <add>, %23, %cst_14 [1] : vector<8x8xf32> to vector<8xf32>
    %25 = vector.shape_cast %24 : vector<8xf32> to vector<8x1xf32>
    %26 = tpu.reciprocal %25 : vector<8x1xf32> -> vector<8x1xf32>
    %27 = vector.broadcast %26 : vector<8x1xf32> to vector<8x8xf32>
    %28 = arith.mulf %23, %27 : vector<8x8xf32>
    %29 = arith.truncf %28 : vector<8x8xf32> to vector<8x8xbf16>
    %30 = vector.extract_strided_slice %5 {offsets = [0, 0], sizes = [8, 32], strides = [1, 1]} : vector<8x128xbf16> to vector<8x32xbf16>
    %cst_15 = arith.constant dense<0.000000e+00> : vector<8x32xf32>
    %31 = tpu.matmul %29, %30, %cst_15 {dimension_numbers = #tpu.dot_dimension_numbers<[1], [0], [0], [1], [0, 0, 1, 1], [], []>} : vector<8x8xbf16>, vector<8x32xbf16>, vector<8x32xf32> -> vector<8x32xf32>
    %c0_16 = arith.constant 0 : index
    %c0_17 = arith.constant 0 : index
    %32 = vector.load %arg10[%c0_16, %c0_17] : memref<8x128xf32, #tpu.memory_space<vmem>>, vector<8x32xf32>
    tpu.vector_store %arg10[%c0_16, %c0_17], %31 {strides = array<i32>} : memref<8x128xf32, #tpu.memory_space<vmem>>, vector<8x32xf32>,
    %33 = vector.extract_strided_slice %1 {offsets = [0, 32], sizes = [8, 32], strides = [1, 1]} : vector<8x128xbf16> to vector<8x32xbf16>
    %34 = vector.extract_strided_slice %3 {offsets = [0, 32], sizes = [8, 32], strides = [1, 1]} : vector<8x128xbf16> to vector<8x32xbf16>
    %cst_18 = arith.constant dense<0.000000e+00> : vector<8x8xf32>
    %35 = tpu.matmul %33, %34, %cst_18 {dimension_numbers = #tpu.dot_dimension_numbers<[1], [1], [0], [0], [0, 0, 1, 0], [], []>} : vector<8x32xbf16>, vector<8x32xbf16>, vector<8x8xf32> -> vector<8x8xf32>
    %36 = arith.addf %35, %14 : vector<8x8xf32>
    %cst_19 = arith.constant dense<0xFF800000> : vector<8xf32>
    %37 = vector.multi_reduction <maximumf>, %36, %cst_19 [1] : vector<8x8xf32> to vector<8xf32>
    %38 = vector.shape_cast %37 : vector<8xf32> to vector<8x1xf32>
    %39 = vector.broadcast %38 : vector<8x1xf32> to vector<8x8xf32>
    %40 = arith.subf %36, %39 : vector<8x8xf32>
    %41 = math.exp %40 : vector<8x8xf32>
    %cst_20 = arith.constant dense<0.000000e+00> : vector<8xf32>
    %42 = vector.multi_reduction <add>, %41, %cst_20 [1] : vector<8x8xf32> to vector<8xf32>
    %43 = vector.shape_cast %42 : vector<8xf32> to vector<8x1xf32>
    %44 = tpu.reciprocal %43 : vector<8x1xf32> -> vector<8x1xf32>
    %45 = vector.broadcast %44 : vector<8x1xf32> to vector<8x8xf32>
    %46 = arith.mulf %41, %45 : vector<8x8xf32>
    %47 = arith.truncf %46 : vector<8x8xf32> to vector<8x8xbf16>
    %48 = vector.extract_strided_slice %5 {offsets = [0, 32], sizes = [8, 32], strides = [1, 1]} : vector<8x128xbf16> to vector<8x32xbf16>
    %cst_21 = arith.constant dense<0.000000e+00> : vector<8x32xf32>
    %49 = tpu.matmul %47, %48, %cst_21 {dimension_numbers = #tpu.dot_dimension_numbers<[1], [0], [0], [1], [0, 0, 1, 1], [], []>} : vector<8x8xbf16>, vector<8x32xbf16>, vector<8x32xf32> -> vector<8x32xf32>
    %c0_22 = arith.constant 0 : index
    %c32 = arith.constant 32 : index
    %50 = vector.load %arg10[%c0_22, %c32] : memref<8x128xf32, #tpu.memory_space<vmem>>, vector<8x32xf32>
    tpu.vector_store %arg10[%c0_22, %c32], %49 {strides = array<i32>} : memref<8x128xf32, #tpu.memory_space<vmem>>, vector<8x32xf32>,
    %51 = vector.extract_strided_slice %1 {offsets = [0, 64], sizes = [8, 32], strides = [1, 1]} : vector<8x128xbf16> to vector<8x32xbf16>
    %52 = vector.extract_strided_slice %3 {offsets = [0, 64], sizes = [8, 32], strides = [1, 1]} : vector<8x128xbf16> to vector<8x32xbf16>
    %cst_23 = arith.constant dense<0.000000e+00> : vector<8x8xf32>
    %53 = tpu.matmul %51, %52, %cst_23 {dimension_numbers = #tpu.dot_dimension_numbers<[1], [1], [0], [0], [0, 0, 1, 0], [], []>} : vector<8x32xbf16>, vector<8x32xbf16>, vector<8x8xf32> -> vector<8x8xf32>
    %54 = arith.addf %53, %14 : vector<8x8xf32>
    %cst_24 = arith.constant dense<0xFF800000> : vector<8xf32>
    %55 = vector.multi_reduction <maximumf>, %54, %cst_24 [1] : vector<8x8xf32> to vector<8xf32>
    %56 = vector.shape_cast %55 : vector<8xf32> to vector<8x1xf32>
    %57 = vector.broadcast %56 : vector<8x1xf32> to vector<8x8xf32>
    %58 = arith.subf %54, %57 : vector<8x8xf32>
    %59 = math.exp %58 : vector<8x8xf32>
    %cst_25 = arith.constant dense<0.000000e+00> : vector<8xf32>
    %60 = vector.multi_reduction <add>, %59, %cst_25 [1] : vector<8x8xf32> to vector<8xf32>
    %61 = vector.shape_cast %60 : vector<8xf32> to vector<8x1xf32>
    %62 = tpu.reciprocal %61 : vector<8x1xf32> -> vector<8x1xf32>
    %63 = vector.broadcast %62 : vector<8x1xf32> to vector<8x8xf32>
    %64 = arith.mulf %59, %63 : vector<8x8xf32>
    %65 = arith.truncf %64 : vector<8x8xf32> to vector<8x8xbf16>
    %66 = vector.extract_strided_slice %5 {offsets = [0, 64], sizes = [8, 32], strides = [1, 1]} : vector<8x128xbf16> to vector<8x32xbf16>
    %cst_26 = arith.constant dense<0.000000e+00> : vector<8x32xf32>
    %67 = tpu.matmul %65, %66, %cst_26 {dimension_numbers = #tpu.dot_dimension_numbers<[1], [0], [0], [1], [0, 0, 1, 1], [], []>} : vector<8x8xbf16>, vector<8x32xbf16>, vector<8x32xf32> -> vector<8x32xf32>
    %c0_27 = arith.constant 0 : index
    %c64 = arith.constant 64 : index
    %68 = vector.load %arg10[%c0_27, %c64] : memref<8x128xf32, #tpu.memory_space<vmem>>, vector<8x32xf32>
    tpu.vector_store %arg10[%c0_27, %c64], %67 {strides = array<i32>} : memref<8x128xf32, #tpu.memory_space<vmem>>, vector<8x32xf32>,
    %69 = vector.extract_strided_slice %1 {offsets = [0, 96], sizes = [8, 32], strides = [1, 1]} : vector<8x128xbf16> to vector<8x32xbf16>
    %70 = vector.extract_strided_slice %3 {offsets = [0, 96], sizes = [8, 32], strides = [1, 1]} : vector<8x128xbf16> to vector<8x32xbf16>
    %cst_28 = arith.constant dense<0.000000e+00> : vector<8x8xf32>
    %71 = tpu.matmul %69, %70, %cst_28 {dimension_numbers = #tpu.dot_dimension_numbers<[1], [1], [0], [0], [0, 0, 1, 0], [], []>} : vector<8x32xbf16>, vector<8x32xbf16>, vector<8x8xf32> -> vector<8x8xf32>
    %72 = arith.addf %71, %14 : vector<8x8xf32>
    %cst_29 = arith.constant dense<0xFF800000> : vector<8xf32>
    %73 = vector.multi_reduction <maximumf>, %72, %cst_29 [1] : vector<8x8xf32> to vector<8xf32>
    %74 = vector.shape_cast %73 : vector<8xf32> to vector<8x1xf32>
    %75 = vector.broadcast %74 : vector<8x1xf32> to vector<8x8xf32>
    %76 = arith.subf %72, %75 : vector<8x8xf32>
    %77 = math.exp %76 : vector<8x8xf32>
    %cst_30 = arith.constant dense<0.000000e+00> : vector<8xf32>
    %78 = vector.multi_reduction <add>, %77, %cst_30 [1] : vector<8x8xf32> to vector<8xf32>
    %79 = vector.shape_cast %78 : vector<8xf32> to vector<8x1xf32>
    %80 = tpu.reciprocal %79 : vector<8x1xf32> -> vector<8x1xf32>
    %81 = vector.broadcast %80 : vector<8x1xf32> to vector<8x8xf32>
    %82 = arith.mulf %77, %81 : vector<8x8xf32>
    %83 = arith.truncf %82 : vector<8x8xf32> to vector<8x8xbf16>
    %84 = vector.extract_strided_slice %5 {offsets = [0, 96], sizes = [8, 32], strides = [1, 1]} : vector<8x128xbf16> to vector<8x32xbf16>
    %cst_31 = arith.constant dense<0.000000e+00> : vector<8x32xf32>
    %85 = tpu.matmul %83, %84, %cst_31 {dimension_numbers = #tpu.dot_dimension_numbers<[1], [0], [0], [1], [0, 0, 1, 1], [], []>} : vector<8x8xbf16>, vector<8x32xbf16>, vector<8x32xf32> -> vector<8x32xf32>
    %c0_32 = arith.constant 0 : index
    %c96 = arith.constant 96 : index
    %86 = vector.load %arg10[%c0_32, %c96] : memref<8x128xf32, #tpu.memory_space<vmem>>, vector<8x32xf32>
    tpu.vector_store %arg10[%c0_32, %c96], %85 {strides = array<i32>} : memref<8x128xf32, #tpu.memory_space<vmem>>, vector<8x32xf32>,
    %c0_33 = arith.constant 0 : index
    %c0_34 = arith.constant 0 : index
    %87 = vector.load %arg10[%c0_33, %c0_34] : memref<8x128xf32, #tpu.memory_space<vmem>>, vector<8x128xf32>
    %88 = arith.truncf %87 : vector<8x128xf32> to vector<8x128xbf16>
    %c0_35 = arith.constant 0 : index
    %c0_36 = arith.constant 0 : index
    %89 = vector.load %arg6[%c0_35, %c0_36] : memref<128x128xbf16, #tpu.memory_space<vmem>>, vector<128x128xbf16>
    %cst_37 = arith.constant dense<0.000000e+00> : vector<8x128xf32>
    %90 = tpu.matmul %88, %89, %cst_37 {dimension_numbers = #tpu.dot_dimension_numbers<[1], [0], [0], [1], [0, 0, 1, 1], [], []>} : vector<8x128xbf16>, vector<128x128xbf16>, vector<8x128xf32> -> vector<8x128xf32>
    %c0_38 = arith.constant 0 : index
    %c0_39 = arith.constant 0 : index
    %c0_40 = arith.constant 0 : index
    %91 = vector.load %arg8[%c0_38, %c0_39, %c0_40] : memref<1x8x128xf32, #tpu.memory_space<vmem>>, vector<1x8x128xf32>
    %92 = vector.shape_cast %91 : vector<1x8x128xf32> to vector<8x128xf32>
    %93 = arith.addf %92, %90 : vector<8x128xf32>
    %c0_41 = arith.constant 0 : index
    %c0_42 = arith.constant 0 : index
    %94 = vector.load %arg7[%c0_41, %c0_42] : memref<1x128xf32, #tpu.memory_space<vmem>>, vector<1x128xf32>
    %95 = vector.broadcast %94 : vector<1x128xf32> to vector<8x128xf32>
    %96 = arith.addf %93, %95 : vector<8x128xf32>
    %c0_43 = arith.constant 0 : index
    %c0_44 = arith.constant 0 : index
    %c0_45 = arith.constant 0 : index
    %97 = vector.load %arg9[%c0_43, %c0_44, %c0_45] : memref<1x8x128xf32, #tpu.memory_space<vmem>>, vector<1x8x128xf32>
    %98 = vector.shape_cast %97 : vector<1x8x128xf32> to vector<8x128xf32>
    %99 = vector.shape_cast %96 : vector<8x128xf32> to vector<1x8x128xf32>
    tpu.vector_store %arg9[%c0_43, %c0_44, %c0_45], %99 {strides = array<i32>} : memref<1x8x128xf32, #tpu.memory_space<vmem>>, vector<1x8x128xf32>,
    return
  }
  func.func @transform_0(%arg0: i32, %arg1: i32) -> (i32, i32, i32) {
    %c0_i32 = arith.constant 0 : i32
    %c0_i32_0 = arith.constant 0 : i32
    return %arg0, %arg1, %c0_i32 : i32, i32, i32
  }
  func.func @transform_1(%arg0: i32, %arg1: i32) -> (i32, i32, i32) {
    %c0_i32 = arith.constant 0 : i32
    %c0_i32_0 = arith.constant 0 : i32
    %c0_i32_1 = arith.constant 0 : i32
    return %arg0, %c0_i32, %c0_i32_0 : i32, i32, i32
  }
  func.func @transform_2(%arg0: i32, %arg1: i32) -> (i32, i32, i32) {
    %c0_i32 = arith.constant 0 : i32
    %c0_i32_0 = arith.constant 0 : i32
    %c0_i32_1 = arith.constant 0 : i32
    return %arg0, %c0_i32, %c0_i32_0 : i32, i32, i32
  }
  func.func @transform_3(%arg0: i32, %arg1: i32) -> (i32, i32, i32) {
    %c0_i32 = arith.constant 0 : i32
    %c0_i32_0 = arith.constant 0 : i32
    %c0_i32_1 = arith.constant 0 : i32
    return %arg0, %c0_i32, %c0_i32_0 : i32, i32, i32
  }
  func.func @transform_4(%arg0: i32, %arg1: i32) -> (i32, i32) {
    %c0_i32 = arith.constant 0 : i32
    %c0_i32_0 = arith.constant 0 : i32
    %c0_i32_1 = arith.constant 0 : i32
    return %c0_i32, %c0_i32_0 : i32, i32
  }
  func.func @transform_5(%arg0: i32, %arg1: i32) -> (i32, i32) {
    %c0_i32 = arith.constant 0 : i32
    %c0_i32_0 = arith.constant 0 : i32
    %c0_i32_1 = arith.constant 0 : i32
    return %c0_i32, %c0_i32_0 : i32, i32
  }
  func.func @transform_6(%arg0: i32, %arg1: i32) -> (i32, i32, i32) {
    %c0_i32 = arith.constant 0 : i32
    %c0_i32_0 = arith.constant 0 : i32
    return %arg0, %arg1, %c0_i32 : i32, i32, i32
  }
  func.func @transform_7(%arg0: i32, %arg1: i32) -> (i32, i32, i32) {
    %c0_i32 = arith.constant 0 : i32
    %c0_i32_0 = arith.constant 0 : i32
    return %arg0, %arg1, %c0_i32 : i32, i32, i32
  }
}

module attributes {stable_mosaic.version = 11 : i64} {
  func.func @_ln_ffn_kernel(%arg0: i32, %arg1: i32, %arg2: memref<16x128xf32, #tpu.memory_space<vmem>>, %arg3: memref<1x128xf32, #tpu.memory_space<vmem>>, %arg4: memref<1x128xf32, #tpu.memory_space<vmem>>, %arg5: memref<128x512xbf16, #tpu.memory_space<vmem>>, %arg6: memref<1x512xf32, #tpu.memory_space<vmem>>, %arg7: memref<512x128xbf16, #tpu.memory_space<vmem>>, %arg8: memref<1x128xf32, #tpu.memory_space<vmem>>, %arg9: memref<16x128xf32, #tpu.memory_space<vmem>>, %arg10: memref<16x128xbf16, #tpu.memory_space<vmem>>, %arg11: memref<16x128xf32, #tpu.memory_space<vmem>>) attributes {dimension_semantics = [#tpu.dimension_semantics<parallel>, #tpu.dimension_semantics<arbitrary>], iteration_bounds = array<i64: 1, 1>, scalar_prefetch = 0 : i64, scratch_operands = 2 : i64, tpu.core_type = #tpu.core_type<tc>, window_params = [{transform_indices = @transform_0, window_bounds = array<i64: 16, 128>}, {pipeline_mode = #tpu.pipeline_mode<synchronous>, transform_indices = @transform_1, window_bounds = array<i64: 1, 128>}, {pipeline_mode = #tpu.pipeline_mode<synchronous>, transform_indices = @transform_2, window_bounds = array<i64: 1, 128>}, {transform_indices = @transform_3, window_bounds = array<i64: 128, 512>}, {transform_indices = @transform_4, window_bounds = array<i64: 1, 512>}, {transform_indices = @transform_5, window_bounds = array<i64: 512, 128>}, {pipeline_mode = #tpu.pipeline_mode<synchronous>, transform_indices = @transform_6, window_bounds = array<i64: 1, 128>}, {transform_indices = @transform_7, window_bounds = array<i64: 16, 128>}]} {
    %c0_i32 = arith.constant 0 : i32
    %0 = arith.cmpi eq, %arg1, %c0_i32 : i32
    %1 = arith.extui %0 : i1 to i32
    %c0_i32_0 = arith.constant 0 : i32
    %2 = arith.cmpi ne, %1, %c0_i32_0 : i32
    scf.if %2 {
      %c0_16 = arith.constant 0 : index
      %c0_17 = arith.constant 0 : index
      %20 = vector.load %arg2[%c0_16, %c0_17] : memref<16x128xf32, #tpu.memory_space<vmem>>, vector<16x128xf32>
      %cst_18 = arith.constant dense<0.000000e+00> : vector<16xf32>
      %21 = vector.multi_reduction <add>, %20, %cst_18 [1] : vector<16x128xf32> to vector<16xf32>
      %22 = vector.shape_cast %21 : vector<16xf32> to vector<16x1xf32>
      %cst_19 = arith.constant 1.280000e+02 : f32
      %23 = vector.broadcast %cst_19 : f32 to vector<16x1xf32>
      %24 = arith.divf %22, %23 : vector<16x1xf32>
      %25 = vector.broadcast %24 : vector<16x1xf32> to vector<16x128xf32>
      %26 = arith.subf %20, %25 : vector<16x128xf32>
      %27 = arith.mulf %26, %26 : vector<16x128xf32>
      %cst_20 = arith.constant dense<0.000000e+00> : vector<16xf32>
      %28 = vector.multi_reduction <add>, %27, %cst_20 [1] : vector<16x128xf32> to vector<16xf32>
      %29 = vector.shape_cast %28 : vector<16xf32> to vector<16x1xf32>
      %cst_21 = arith.constant 1.280000e+02 : f32
      %30 = vector.broadcast %cst_21 : f32 to vector<16x1xf32>
      %31 = arith.divf %29, %30 : vector<16x1xf32>
      %32 = vector.broadcast %24 : vector<16x1xf32> to vector<16x128xf32>
      %33 = arith.subf %20, %32 : vector<16x128xf32>
      %cst_22 = arith.constant 9.99999974E-6 : f32
      %34 = vector.broadcast %cst_22 : f32 to vector<16x1xf32>
      %35 = arith.addf %31, %34 : vector<16x1xf32>
      %36 = math.rsqrt %35 : vector<16x1xf32>
      %37 = vector.broadcast %36 : vector<16x1xf32> to vector<16x128xf32>
      %38 = arith.mulf %33, %37 : vector<16x128xf32>
      %c0_23 = arith.constant 0 : index
      %c0_24 = arith.constant 0 : index
      %39 = vector.load %arg3[%c0_23, %c0_24] : memref<1x128xf32, #tpu.memory_space<vmem>>, vector<1x128xf32>
      %40 = vector.broadcast %39 : vector<1x128xf32> to vector<16x128xf32>
      %41 = arith.mulf %38, %40 : vector<16x128xf32>
      %c0_25 = arith.constant 0 : index
      %c0_26 = arith.constant 0 : index
      %42 = vector.load %arg4[%c0_25, %c0_26] : memref<1x128xf32, #tpu.memory_space<vmem>>, vector<1x128xf32>
      %43 = vector.broadcast %42 : vector<1x128xf32> to vector<16x128xf32>
      %44 = arith.addf %41, %43 : vector<16x128xf32>
      %45 = arith.truncf %44 : vector<16x128xf32> to vector<16x128xbf16>
      %c0_27 = arith.constant 0 : index
      %c0_28 = arith.constant 0 : index
      %46 = vector.load %arg10[%c0_27, %c0_28] : memref<16x128xbf16, #tpu.memory_space<vmem>>, vector<16x128xbf16>
      tpu.vector_store %arg10[%c0_27, %c0_28], %45 {strides = array<i32>} : memref<16x128xbf16, #tpu.memory_space<vmem>>, vector<16x128xbf16>,
      %cst_29 = arith.constant 0.000000e+00 : f32
      %47 = vector.broadcast %cst_29 : f32 to vector<16x128xf32>
      %c0_30 = arith.constant 0 : index
      %c0_31 = arith.constant 0 : index
      %48 = vector.load %arg11[%c0_30, %c0_31] : memref<16x128xf32, #tpu.memory_space<vmem>>, vector<16x128xf32>
      tpu.vector_store %arg11[%c0_30, %c0_31], %47 {strides = array<i32>} : memref<16x128xf32, #tpu.memory_space<vmem>>, vector<16x128xf32>,
    } else {
    }
    %c0 = arith.constant 0 : index
    %c0_1 = arith.constant 0 : index
    %3 = vector.load %arg10[%c0, %c0_1] : memref<16x128xbf16, #tpu.memory_space<vmem>>, vector<16x128xbf16>
    %c0_2 = arith.constant 0 : index
    %c0_3 = arith.constant 0 : index
    %4 = vector.load %arg5[%c0_2, %c0_3] : memref<128x512xbf16, #tpu.memory_space<vmem>>, vector<128x512xbf16>
    %cst = arith.constant dense<0.000000e+00> : vector<16x512xf32>
    %5 = tpu.matmul %3, %4, %cst {dimension_numbers = #tpu.dot_dimension_numbers<[1], [0], [0], [1], [0, 0, 1, 1], [], []>} : vector<16x128xbf16>, vector<128x512xbf16>, vector<16x512xf32> -> vector<16x512xf32>
    %c0_4 = arith.constant 0 : index
    %c0_5 = arith.constant 0 : index
    %6 = vector.load %arg6[%c0_4, %c0_5] : memref<1x512xf32, #tpu.memory_space<vmem>>, vector<1x512xf32>
    %7 = vector.broadcast %6 : vector<1x512xf32> to vector<16x512xf32>
    %8 = arith.addf %5, %7 : vector<16x512xf32>
    %cst_6 = arith.constant 0.000000e+00 : f32
    %9 = vector.broadcast %cst_6 : f32 to vector<16x512xf32>
    %10 = arith.maximumf %8, %9 : vector<16x512xf32>
    %c0_7 = arith.constant 0 : index
    %c0_8 = arith.constant 0 : index
    %11 = vector.load %arg11[%c0_7, %c0_8] : memref<16x128xf32, #tpu.memory_space<vmem>>, vector<16x128xf32>
    %12 = arith.truncf %10 : vector<16x512xf32> to vector<16x512xbf16>
    %c0_9 = arith.constant 0 : index
    %c0_10 = arith.constant 0 : index
    %13 = vector.load %arg7[%c0_9, %c0_10] : memref<512x128xbf16, #tpu.memory_space<vmem>>, vector<512x128xbf16>
    %cst_11 = arith.constant dense<0.000000e+00> : vector<16x128xf32>
    %14 = tpu.matmul %12, %13, %cst_11 {dimension_numbers = #tpu.dot_dimension_numbers<[1], [0], [0], [1], [0, 0, 1, 1], [], []>} : vector<16x512xbf16>, vector<512x128xbf16>, vector<16x128xf32> -> vector<16x128xf32>
    %15 = arith.addf %11, %14 : vector<16x128xf32>
    %c0_12 = arith.constant 0 : index
    %c0_13 = arith.constant 0 : index
    %16 = vector.load %arg11[%c0_12, %c0_13] : memref<16x128xf32, #tpu.memory_space<vmem>>, vector<16x128xf32>
    tpu.vector_store %arg11[%c0_12, %c0_13], %15 {strides = array<i32>} : memref<16x128xf32, #tpu.memory_space<vmem>>, vector<16x128xf32>,
    %c0_i32_14 = arith.constant 0 : i32
    %17 = arith.cmpi eq, %arg1, %c0_i32_14 : i32
    %18 = arith.extui %17 : i1 to i32
    %c0_i32_15 = arith.constant 0 : i32
    %19 = arith.cmpi ne, %18, %c0_i32_15 : i32
    scf.if %19 {
      %c0_16 = arith.constant 0 : index
      %c0_17 = arith.constant 0 : index
      %20 = vector.load %arg2[%c0_16, %c0_17] : memref<16x128xf32, #tpu.memory_space<vmem>>, vector<16x128xf32>
      %c0_18 = arith.constant 0 : index
      %c0_19 = arith.constant 0 : index
      %21 = vector.load %arg11[%c0_18, %c0_19] : memref<16x128xf32, #tpu.memory_space<vmem>>, vector<16x128xf32>
      %22 = arith.addf %20, %21 : vector<16x128xf32>
      %c0_20 = arith.constant 0 : index
      %c0_21 = arith.constant 0 : index
      %23 = vector.load %arg8[%c0_20, %c0_21] : memref<1x128xf32, #tpu.memory_space<vmem>>, vector<1x128xf32>
      %24 = vector.broadcast %23 : vector<1x128xf32> to vector<16x128xf32>
      %25 = arith.addf %22, %24 : vector<16x128xf32>
      %c0_22 = arith.constant 0 : index
      %c0_23 = arith.constant 0 : index
      %26 = vector.load %arg9[%c0_22, %c0_23] : memref<16x128xf32, #tpu.memory_space<vmem>>, vector<16x128xf32>
      tpu.vector_store %arg9[%c0_22, %c0_23], %25 {strides = array<i32>} : memref<16x128xf32, #tpu.memory_space<vmem>>, vector<16x128xf32>,
    } else {
    }
    return
  }
  func.func @transform_0(%arg0: i32, %arg1: i32) -> (i32, i32) {
    %c0_i32 = arith.constant 0 : i32
    %c0_i32_0 = arith.constant 0 : i32
    return %arg0, %c0_i32 : i32, i32
  }
  func.func @transform_1(%arg0: i32, %arg1: i32) -> (i32, i32) {
    %c0_i32 = arith.constant 0 : i32
    %c0_i32_0 = arith.constant 0 : i32
    %c0_i32_1 = arith.constant 0 : i32
    return %c0_i32, %c0_i32_0 : i32, i32
  }
  func.func @transform_2(%arg0: i32, %arg1: i32) -> (i32, i32) {
    %c0_i32 = arith.constant 0 : i32
    %c0_i32_0 = arith.constant 0 : i32
    %c0_i32_1 = arith.constant 0 : i32
    return %c0_i32, %c0_i32_0 : i32, i32
  }
  func.func @transform_3(%arg0: i32, %arg1: i32) -> (i32, i32) {
    %c0_i32 = arith.constant 0 : i32
    %c0_i32_0 = arith.constant 0 : i32
    return %c0_i32, %arg1 : i32, i32
  }
  func.func @transform_4(%arg0: i32, %arg1: i32) -> (i32, i32) {
    %c0_i32 = arith.constant 0 : i32
    %c0_i32_0 = arith.constant 0 : i32
    return %c0_i32, %arg1 : i32, i32
  }
  func.func @transform_5(%arg0: i32, %arg1: i32) -> (i32, i32) {
    %c0_i32 = arith.constant 0 : i32
    %c0_i32_0 = arith.constant 0 : i32
    return %arg1, %c0_i32 : i32, i32
  }
  func.func @transform_6(%arg0: i32, %arg1: i32) -> (i32, i32) {
    %c0_i32 = arith.constant 0 : i32
    %c0_i32_0 = arith.constant 0 : i32
    %c0_i32_1 = arith.constant 0 : i32
    return %c0_i32, %c0_i32_0 : i32, i32
  }
  func.func @transform_7(%arg0: i32, %arg1: i32) -> (i32, i32) {
    %c0_i32 = arith.constant 0 : i32
    %c0_i32_0 = arith.constant 0 : i32
    return %arg0, %c0_i32 : i32, i32
  }
}

module attributes {stable_mosaic.version = 11 : i64} {
  func.func @_ln_proj_kernel(%arg0: i32, %arg1: memref<16x128xf32, #tpu.memory_space<vmem>>, %arg2: memref<1x128xf32, #tpu.memory_space<vmem>>, %arg3: memref<1x128xf32, #tpu.memory_space<vmem>>, %arg4: memref<128x384xbf16, #tpu.memory_space<vmem>>, %arg5: memref<1x384xf32, #tpu.memory_space<vmem>>, %arg6: memref<16x128xbf16, #tpu.memory_space<vmem>>, %arg7: memref<16x128xbf16, #tpu.memory_space<vmem>>, %arg8: memref<16x128xbf16, #tpu.memory_space<vmem>>) attributes {dimension_semantics = [#tpu.dimension_semantics<parallel>], iteration_bounds = array<i64: 1>, scalar_prefetch = 0 : i64, scratch_operands = 0 : i64, tpu.core_type = #tpu.core_type<tc>, window_params = [{transform_indices = @transform_0, window_bounds = array<i64: 16, 128>}, {pipeline_mode = #tpu.pipeline_mode<synchronous>, transform_indices = @transform_1, window_bounds = array<i64: 1, 128>}, {pipeline_mode = #tpu.pipeline_mode<synchronous>, transform_indices = @transform_2, window_bounds = array<i64: 1, 128>}, {pipeline_mode = #tpu.pipeline_mode<synchronous>, transform_indices = @transform_3, window_bounds = array<i64: 128, 384>}, {pipeline_mode = #tpu.pipeline_mode<synchronous>, transform_indices = @transform_4, window_bounds = array<i64: 1, 384>}, {transform_indices = @transform_5, window_bounds = array<i64: 16, 128>}, {transform_indices = @transform_6, window_bounds = array<i64: 16, 128>}, {transform_indices = @transform_7, window_bounds = array<i64: 16, 128>}]} {
    %c0 = arith.constant 0 : index
    %c0_0 = arith.constant 0 : index
    %0 = vector.load %arg1[%c0, %c0_0] : memref<16x128xf32, #tpu.memory_space<vmem>>, vector<16x128xf32>
    %cst = arith.constant dense<0.000000e+00> : vector<16xf32>
    %1 = vector.multi_reduction <add>, %0, %cst [1] : vector<16x128xf32> to vector<16xf32>
    %2 = vector.shape_cast %1 : vector<16xf32> to vector<16x1xf32>
    %cst_1 = arith.constant 1.280000e+02 : f32
    %3 = vector.broadcast %cst_1 : f32 to vector<16x1xf32>
    %4 = arith.divf %2, %3 : vector<16x1xf32>
    %5 = vector.broadcast %4 : vector<16x1xf32> to vector<16x128xf32>
    %6 = arith.subf %0, %5 : vector<16x128xf32>
    %7 = arith.mulf %6, %6 : vector<16x128xf32>
    %cst_2 = arith.constant dense<0.000000e+00> : vector<16xf32>
    %8 = vector.multi_reduction <add>, %7, %cst_2 [1] : vector<16x128xf32> to vector<16xf32>
    %9 = vector.shape_cast %8 : vector<16xf32> to vector<16x1xf32>
    %cst_3 = arith.constant 1.280000e+02 : f32
    %10 = vector.broadcast %cst_3 : f32 to vector<16x1xf32>
    %11 = arith.divf %9, %10 : vector<16x1xf32>
    %12 = vector.broadcast %4 : vector<16x1xf32> to vector<16x128xf32>
    %13 = arith.subf %0, %12 : vector<16x128xf32>
    %cst_4 = arith.constant 9.99999974E-6 : f32
    %14 = vector.broadcast %cst_4 : f32 to vector<16x1xf32>
    %15 = arith.addf %11, %14 : vector<16x1xf32>
    %16 = math.rsqrt %15 : vector<16x1xf32>
    %17 = vector.broadcast %16 : vector<16x1xf32> to vector<16x128xf32>
    %18 = arith.mulf %13, %17 : vector<16x128xf32>
    %c0_5 = arith.constant 0 : index
    %c0_6 = arith.constant 0 : index
    %19 = vector.load %arg2[%c0_5, %c0_6] : memref<1x128xf32, #tpu.memory_space<vmem>>, vector<1x128xf32>
    %20 = vector.broadcast %19 : vector<1x128xf32> to vector<16x128xf32>
    %21 = arith.mulf %18, %20 : vector<16x128xf32>
    %c0_7 = arith.constant 0 : index
    %c0_8 = arith.constant 0 : index
    %22 = vector.load %arg3[%c0_7, %c0_8] : memref<1x128xf32, #tpu.memory_space<vmem>>, vector<1x128xf32>
    %23 = vector.broadcast %22 : vector<1x128xf32> to vector<16x128xf32>
    %24 = arith.addf %21, %23 : vector<16x128xf32>
    %25 = arith.truncf %24 : vector<16x128xf32> to vector<16x128xbf16>
    %c0_9 = arith.constant 0 : index
    %c0_10 = arith.constant 0 : index
    %26 = vector.load %arg4[%c0_9, %c0_10] : memref<128x384xbf16, #tpu.memory_space<vmem>>, vector<128x384xbf16>
    %cst_11 = arith.constant dense<0.000000e+00> : vector<16x384xf32>
    %27 = tpu.matmul %25, %26, %cst_11 {dimension_numbers = #tpu.dot_dimension_numbers<[1], [0], [0], [1], [0, 0, 1, 1], [], []>} : vector<16x128xbf16>, vector<128x384xbf16>, vector<16x384xf32> -> vector<16x384xf32>
    %c0_12 = arith.constant 0 : index
    %c0_13 = arith.constant 0 : index
    %28 = vector.load %arg5[%c0_12, %c0_13] : memref<1x384xf32, #tpu.memory_space<vmem>>, vector<1x384xf32>
    %29 = vector.broadcast %28 : vector<1x384xf32> to vector<16x384xf32>
    %30 = arith.addf %27, %29 : vector<16x384xf32>
    %31 = vector.extract_strided_slice %30 {offsets = [0, 0], sizes = [16, 128], strides = [1, 1]} : vector<16x384xf32> to vector<16x128xf32>
    %32 = arith.truncf %31 : vector<16x128xf32> to vector<16x128xbf16>
    %c0_14 = arith.constant 0 : index
    %c0_15 = arith.constant 0 : index
    %33 = vector.load %arg6[%c0_14, %c0_15] : memref<16x128xbf16, #tpu.memory_space<vmem>>, vector<16x128xbf16>
    tpu.vector_store %arg6[%c0_14, %c0_15], %32 {strides = array<i32>} : memref<16x128xbf16, #tpu.memory_space<vmem>>, vector<16x128xbf16>,
    %34 = vector.extract_strided_slice %30 {offsets = [0, 128], sizes = [16, 128], strides = [1, 1]} : vector<16x384xf32> to vector<16x128xf32>
    %35 = arith.truncf %34 : vector<16x128xf32> to vector<16x128xbf16>
    %c0_16 = arith.constant 0 : index
    %c0_17 = arith.constant 0 : index
    %36 = vector.load %arg7[%c0_16, %c0_17] : memref<16x128xbf16, #tpu.memory_space<vmem>>, vector<16x128xbf16>
    tpu.vector_store %arg7[%c0_16, %c0_17], %35 {strides = array<i32>} : memref<16x128xbf16, #tpu.memory_space<vmem>>, vector<16x128xbf16>,
    %37 = vector.extract_strided_slice %30 {offsets = [0, 256], sizes = [16, 128], strides = [1, 1]} : vector<16x384xf32> to vector<16x128xf32>
    %38 = arith.truncf %37 : vector<16x128xf32> to vector<16x128xbf16>
    %c0_18 = arith.constant 0 : index
    %c0_19 = arith.constant 0 : index
    %39 = vector.load %arg8[%c0_18, %c0_19] : memref<16x128xbf16, #tpu.memory_space<vmem>>, vector<16x128xbf16>
    tpu.vector_store %arg8[%c0_18, %c0_19], %38 {strides = array<i32>} : memref<16x128xbf16, #tpu.memory_space<vmem>>, vector<16x128xbf16>,
    return
  }
  func.func @transform_0(%arg0: i32) -> (i32, i32) {
    %c0_i32 = arith.constant 0 : i32
    %c0_i32_0 = arith.constant 0 : i32
    return %arg0, %c0_i32 : i32, i32
  }
  func.func @transform_1(%arg0: i32) -> (i32, i32) {
    %c0_i32 = arith.constant 0 : i32
    %c0_i32_0 = arith.constant 0 : i32
    %c0_i32_1 = arith.constant 0 : i32
    return %c0_i32, %c0_i32_0 : i32, i32
  }
  func.func @transform_2(%arg0: i32) -> (i32, i32) {
    %c0_i32 = arith.constant 0 : i32
    %c0_i32_0 = arith.constant 0 : i32
    %c0_i32_1 = arith.constant 0 : i32
    return %c0_i32, %c0_i32_0 : i32, i32
  }
  func.func @transform_3(%arg0: i32) -> (i32, i32) {
    %c0_i32 = arith.constant 0 : i32
    %c0_i32_0 = arith.constant 0 : i32
    %c0_i32_1 = arith.constant 0 : i32
    return %c0_i32, %c0_i32_0 : i32, i32
  }
  func.func @transform_4(%arg0: i32) -> (i32, i32) {
    %c0_i32 = arith.constant 0 : i32
    %c0_i32_0 = arith.constant 0 : i32
    %c0_i32_1 = arith.constant 0 : i32
    return %c0_i32, %c0_i32_0 : i32, i32
  }
  func.func @transform_5(%arg0: i32) -> (i32, i32) {
    %c0_i32 = arith.constant 0 : i32
    %c0_i32_0 = arith.constant 0 : i32
    return %arg0, %c0_i32 : i32, i32
  }
  func.func @transform_6(%arg0: i32) -> (i32, i32) {
    %c0_i32 = arith.constant 0 : i32
    %c0_i32_0 = arith.constant 0 : i32
    return %arg0, %c0_i32 : i32, i32
  }
  func.func @transform_7(%arg0: i32) -> (i32, i32) {
    %c0_i32 = arith.constant 0 : i32
    %c0_i32_0 = arith.constant 0 : i32
    return %arg0, %c0_i32 : i32, i32
  }
}

module attributes {stable_mosaic.version = 11 : i64} {
  func.func @_ln_proj_kernel(%arg0: i32, %arg1: memref<16x128xf32, #tpu.memory_space<vmem>>, %arg2: memref<128x256xbf16, #tpu.memory_space<vmem>>, %arg3: memref<1x256xf32, #tpu.memory_space<vmem>>, %arg4: memref<16x128xbf16, #tpu.memory_space<vmem>>, %arg5: memref<16x128xbf16, #tpu.memory_space<vmem>>) attributes {dimension_semantics = [#tpu.dimension_semantics<parallel>], iteration_bounds = array<i64: 1>, scalar_prefetch = 0 : i64, scratch_operands = 0 : i64, tpu.core_type = #tpu.core_type<tc>, window_params = [{transform_indices = @transform_0, window_bounds = array<i64: 16, 128>}, {pipeline_mode = #tpu.pipeline_mode<synchronous>, transform_indices = @transform_1, window_bounds = array<i64: 128, 256>}, {pipeline_mode = #tpu.pipeline_mode<synchronous>, transform_indices = @transform_2, window_bounds = array<i64: 1, 256>}, {transform_indices = @transform_3, window_bounds = array<i64: 16, 128>}, {transform_indices = @transform_4, window_bounds = array<i64: 16, 128>}]} {
    %c0 = arith.constant 0 : index
    %c0_0 = arith.constant 0 : index
    %0 = vector.load %arg1[%c0, %c0_0] : memref<16x128xf32, #tpu.memory_space<vmem>>, vector<16x128xf32>
    %1 = arith.truncf %0 : vector<16x128xf32> to vector<16x128xbf16>
    %c0_1 = arith.constant 0 : index
    %c0_2 = arith.constant 0 : index
    %2 = vector.load %arg2[%c0_1, %c0_2] : memref<128x256xbf16, #tpu.memory_space<vmem>>, vector<128x256xbf16>
    %cst = arith.constant dense<0.000000e+00> : vector<16x256xf32>
    %3 = tpu.matmul %1, %2, %cst {dimension_numbers = #tpu.dot_dimension_numbers<[1], [0], [0], [1], [0, 0, 1, 1], [], []>} : vector<16x128xbf16>, vector<128x256xbf16>, vector<16x256xf32> -> vector<16x256xf32>
    %c0_3 = arith.constant 0 : index
    %c0_4 = arith.constant 0 : index
    %4 = vector.load %arg3[%c0_3, %c0_4] : memref<1x256xf32, #tpu.memory_space<vmem>>, vector<1x256xf32>
    %5 = vector.broadcast %4 : vector<1x256xf32> to vector<16x256xf32>
    %6 = arith.addf %3, %5 : vector<16x256xf32>
    %7 = vector.extract_strided_slice %6 {offsets = [0, 0], sizes = [16, 128], strides = [1, 1]} : vector<16x256xf32> to vector<16x128xf32>
    %8 = arith.truncf %7 : vector<16x128xf32> to vector<16x128xbf16>
    %c0_5 = arith.constant 0 : index
    %c0_6 = arith.constant 0 : index
    %9 = vector.load %arg4[%c0_5, %c0_6] : memref<16x128xbf16, #tpu.memory_space<vmem>>, vector<16x128xbf16>
    tpu.vector_store %arg4[%c0_5, %c0_6], %8 {strides = array<i32>} : memref<16x128xbf16, #tpu.memory_space<vmem>>, vector<16x128xbf16>,
    %10 = vector.extract_strided_slice %6 {offsets = [0, 128], sizes = [16, 128], strides = [1, 1]} : vector<16x256xf32> to vector<16x128xf32>
    %11 = arith.truncf %10 : vector<16x128xf32> to vector<16x128xbf16>
    %c0_7 = arith.constant 0 : index
    %c0_8 = arith.constant 0 : index
    %12 = vector.load %arg5[%c0_7, %c0_8] : memref<16x128xbf16, #tpu.memory_space<vmem>>, vector<16x128xbf16>
    tpu.vector_store %arg5[%c0_7, %c0_8], %11 {strides = array<i32>} : memref<16x128xbf16, #tpu.memory_space<vmem>>, vector<16x128xbf16>,
    return
  }
  func.func @transform_0(%arg0: i32) -> (i32, i32) {
    %c0_i32 = arith.constant 0 : i32
    %c0_i32_0 = arith.constant 0 : i32
    return %arg0, %c0_i32 : i32, i32
  }
  func.func @transform_1(%arg0: i32) -> (i32, i32) {
    %c0_i32 = arith.constant 0 : i32
    %c0_i32_0 = arith.constant 0 : i32
    %c0_i32_1 = arith.constant 0 : i32
    return %c0_i32, %c0_i32_0 : i32, i32
  }
  func.func @transform_2(%arg0: i32) -> (i32, i32) {
    %c0_i32 = arith.constant 0 : i32
    %c0_i32_0 = arith.constant 0 : i32
    %c0_i32_1 = arith.constant 0 : i32
    return %c0_i32, %c0_i32_0 : i32, i32
  }
  func.func @transform_3(%arg0: i32) -> (i32, i32) {
    %c0_i32 = arith.constant 0 : i32
    %c0_i32_0 = arith.constant 0 : i32
    return %arg0, %c0_i32 : i32, i32
  }
  func.func @transform_4(%arg0: i32) -> (i32, i32) {
    %c0_i32 = arith.constant 0 : i32
    %c0_i32_0 = arith.constant 0 : i32
    return %arg0, %c0_i32 : i32, i32
  }
}

module attributes {stable_mosaic.version = 11 : i64} {
  func.func @_ln_ffn_kernel(%arg0: i32, %arg1: i32, %arg2: memref<16x128xf32, #tpu.memory_space<vmem>>, %arg3: memref<1x128xf32, #tpu.memory_space<vmem>>, %arg4: memref<1x128xf32, #tpu.memory_space<vmem>>, %arg5: memref<128x512xbf16, #tpu.memory_space<vmem>>, %arg6: memref<1x512xf32, #tpu.memory_space<vmem>>, %arg7: memref<512x128xbf16, #tpu.memory_space<vmem>>, %arg8: memref<1x128xf32, #tpu.memory_space<vmem>>, %arg9: memref<16x128xf32, #tpu.memory_space<vmem>>, %arg10: memref<16x128xbf16, #tpu.memory_space<vmem>>, %arg11: memref<16x128xf32, #tpu.memory_space<vmem>>) attributes {dimension_semantics = [#tpu.dimension_semantics<parallel>, #tpu.dimension_semantics<arbitrary>], iteration_bounds = array<i64: 1, 1>, scalar_prefetch = 0 : i64, scratch_operands = 2 : i64, tpu.core_type = #tpu.core_type<tc>, window_params = [{transform_indices = @transform_0, window_bounds = array<i64: 16, 128>}, {pipeline_mode = #tpu.pipeline_mode<synchronous>, transform_indices = @transform_1, window_bounds = array<i64: 1, 128>}, {pipeline_mode = #tpu.pipeline_mode<synchronous>, transform_indices = @transform_2, window_bounds = array<i64: 1, 128>}, {transform_indices = @transform_3, window_bounds = array<i64: 128, 512>}, {transform_indices = @transform_4, window_bounds = array<i64: 1, 512>}, {transform_indices = @transform_5, window_bounds = array<i64: 512, 128>}, {pipeline_mode = #tpu.pipeline_mode<synchronous>, transform_indices = @transform_6, window_bounds = array<i64: 1, 128>}, {transform_indices = @transform_7, window_bounds = array<i64: 16, 128>}]} {
    %c0_i32 = arith.constant 0 : i32
    %0 = arith.cmpi eq, %arg1, %c0_i32 : i32
    %1 = arith.extui %0 : i1 to i32
    %c0_i32_0 = arith.constant 0 : i32
    %2 = arith.cmpi ne, %1, %c0_i32_0 : i32
    scf.if %2 {
      %c0_16 = arith.constant 0 : index
      %c0_17 = arith.constant 0 : index
      %20 = vector.load %arg2[%c0_16, %c0_17] : memref<16x128xf32, #tpu.memory_space<vmem>>, vector<16x128xf32>
      %cst_18 = arith.constant dense<0.000000e+00> : vector<16xf32>
      %21 = vector.multi_reduction <add>, %20, %cst_18 [1] : vector<16x128xf32> to vector<16xf32>
      %22 = vector.shape_cast %21 : vector<16xf32> to vector<16x1xf32>
      %cst_19 = arith.constant 1.280000e+02 : f32
      %23 = vector.broadcast %cst_19 : f32 to vector<16x1xf32>
      %24 = arith.divf %22, %23 : vector<16x1xf32>
      %25 = vector.broadcast %24 : vector<16x1xf32> to vector<16x128xf32>
      %26 = arith.subf %20, %25 : vector<16x128xf32>
      %27 = arith.mulf %26, %26 : vector<16x128xf32>
      %cst_20 = arith.constant dense<0.000000e+00> : vector<16xf32>
      %28 = vector.multi_reduction <add>, %27, %cst_20 [1] : vector<16x128xf32> to vector<16xf32>
      %29 = vector.shape_cast %28 : vector<16xf32> to vector<16x1xf32>
      %cst_21 = arith.constant 1.280000e+02 : f32
      %30 = vector.broadcast %cst_21 : f32 to vector<16x1xf32>
      %31 = arith.divf %29, %30 : vector<16x1xf32>
      %32 = vector.broadcast %24 : vector<16x1xf32> to vector<16x128xf32>
      %33 = arith.subf %20, %32 : vector<16x128xf32>
      %cst_22 = arith.constant 9.99999974E-6 : f32
      %34 = vector.broadcast %cst_22 : f32 to vector<16x1xf32>
      %35 = arith.addf %31, %34 : vector<16x1xf32>
      %36 = math.rsqrt %35 : vector<16x1xf32>
      %37 = vector.broadcast %36 : vector<16x1xf32> to vector<16x128xf32>
      %38 = arith.mulf %33, %37 : vector<16x128xf32>
      %c0_23 = arith.constant 0 : index
      %c0_24 = arith.constant 0 : index
      %39 = vector.load %arg3[%c0_23, %c0_24] : memref<1x128xf32, #tpu.memory_space<vmem>>, vector<1x128xf32>
      %40 = vector.broadcast %39 : vector<1x128xf32> to vector<16x128xf32>
      %41 = arith.mulf %38, %40 : vector<16x128xf32>
      %c0_25 = arith.constant 0 : index
      %c0_26 = arith.constant 0 : index
      %42 = vector.load %arg4[%c0_25, %c0_26] : memref<1x128xf32, #tpu.memory_space<vmem>>, vector<1x128xf32>
      %43 = vector.broadcast %42 : vector<1x128xf32> to vector<16x128xf32>
      %44 = arith.addf %41, %43 : vector<16x128xf32>
      %45 = arith.truncf %44 : vector<16x128xf32> to vector<16x128xbf16>
      %c0_27 = arith.constant 0 : index
      %c0_28 = arith.constant 0 : index
      %46 = vector.load %arg10[%c0_27, %c0_28] : memref<16x128xbf16, #tpu.memory_space<vmem>>, vector<16x128xbf16>
      tpu.vector_store %arg10[%c0_27, %c0_28], %45 {strides = array<i32>} : memref<16x128xbf16, #tpu.memory_space<vmem>>, vector<16x128xbf16>,
      %cst_29 = arith.constant 0.000000e+00 : f32
      %47 = vector.broadcast %cst_29 : f32 to vector<16x128xf32>
      %c0_30 = arith.constant 0 : index
      %c0_31 = arith.constant 0 : index
      %48 = vector.load %arg11[%c0_30, %c0_31] : memref<16x128xf32, #tpu.memory_space<vmem>>, vector<16x128xf32>
      tpu.vector_store %arg11[%c0_30, %c0_31], %47 {strides = array<i32>} : memref<16x128xf32, #tpu.memory_space<vmem>>, vector<16x128xf32>,
    } else {
    }
    %c0 = arith.constant 0 : index
    %c0_1 = arith.constant 0 : index
    %3 = vector.load %arg10[%c0, %c0_1] : memref<16x128xbf16, #tpu.memory_space<vmem>>, vector<16x128xbf16>
    %c0_2 = arith.constant 0 : index
    %c0_3 = arith.constant 0 : index
    %4 = vector.load %arg5[%c0_2, %c0_3] : memref<128x512xbf16, #tpu.memory_space<vmem>>, vector<128x512xbf16>
    %cst = arith.constant dense<0.000000e+00> : vector<16x512xf32>
    %5 = tpu.matmul %3, %4, %cst {dimension_numbers = #tpu.dot_dimension_numbers<[1], [0], [0], [1], [0, 0, 1, 1], [], []>} : vector<16x128xbf16>, vector<128x512xbf16>, vector<16x512xf32> -> vector<16x512xf32>
    %c0_4 = arith.constant 0 : index
    %c0_5 = arith.constant 0 : index
    %6 = vector.load %arg6[%c0_4, %c0_5] : memref<1x512xf32, #tpu.memory_space<vmem>>, vector<1x512xf32>
    %7 = vector.broadcast %6 : vector<1x512xf32> to vector<16x512xf32>
    %8 = arith.addf %5, %7 : vector<16x512xf32>
    %cst_6 = arith.constant 0.000000e+00 : f32
    %9 = vector.broadcast %cst_6 : f32 to vector<16x512xf32>
    %10 = arith.maximumf %8, %9 : vector<16x512xf32>
    %c0_7 = arith.constant 0 : index
    %c0_8 = arith.constant 0 : index
    %11 = vector.load %arg11[%c0_7, %c0_8] : memref<16x128xf32, #tpu.memory_space<vmem>>, vector<16x128xf32>
    %12 = arith.truncf %10 : vector<16x512xf32> to vector<16x512xbf16>
    %c0_9 = arith.constant 0 : index
    %c0_10 = arith.constant 0 : index
    %13 = vector.load %arg7[%c0_9, %c0_10] : memref<512x128xbf16, #tpu.memory_space<vmem>>, vector<512x128xbf16>
    %cst_11 = arith.constant dense<0.000000e+00> : vector<16x128xf32>
    %14 = tpu.matmul %12, %13, %cst_11 {dimension_numbers = #tpu.dot_dimension_numbers<[1], [0], [0], [1], [0, 0, 1, 1], [], []>} : vector<16x512xbf16>, vector<512x128xbf16>, vector<16x128xf32> -> vector<16x128xf32>
    %15 = arith.addf %11, %14 : vector<16x128xf32>
    %c0_12 = arith.constant 0 : index
    %c0_13 = arith.constant 0 : index
    %16 = vector.load %arg11[%c0_12, %c0_13] : memref<16x128xf32, #tpu.memory_space<vmem>>, vector<16x128xf32>
    tpu.vector_store %arg11[%c0_12, %c0_13], %15 {strides = array<i32>} : memref<16x128xf32, #tpu.memory_space<vmem>>, vector<16x128xf32>,
    %c0_i32_14 = arith.constant 0 : i32
    %17 = arith.cmpi eq, %arg1, %c0_i32_14 : i32
    %18 = arith.extui %17 : i1 to i32
    %c0_i32_15 = arith.constant 0 : i32
    %19 = arith.cmpi ne, %18, %c0_i32_15 : i32
    scf.if %19 {
      %c0_16 = arith.constant 0 : index
      %c0_17 = arith.constant 0 : index
      %20 = vector.load %arg2[%c0_16, %c0_17] : memref<16x128xf32, #tpu.memory_space<vmem>>, vector<16x128xf32>
      %c0_18 = arith.constant 0 : index
      %c0_19 = arith.constant 0 : index
      %21 = vector.load %arg11[%c0_18, %c0_19] : memref<16x128xf32, #tpu.memory_space<vmem>>, vector<16x128xf32>
      %22 = arith.addf %20, %21 : vector<16x128xf32>
      %c0_20 = arith.constant 0 : index
      %c0_21 = arith.constant 0 : index
      %23 = vector.load %arg8[%c0_20, %c0_21] : memref<1x128xf32, #tpu.memory_space<vmem>>, vector<1x128xf32>
      %24 = vector.broadcast %23 : vector<1x128xf32> to vector<16x128xf32>
      %25 = arith.addf %22, %24 : vector<16x128xf32>
      %c0_22 = arith.constant 0 : index
      %c0_23 = arith.constant 0 : index
      %26 = vector.load %arg9[%c0_22, %c0_23] : memref<16x128xf32, #tpu.memory_space<vmem>>, vector<16x128xf32>
      tpu.vector_store %arg9[%c0_22, %c0_23], %25 {strides = array<i32>} : memref<16x128xf32, #tpu.memory_space<vmem>>, vector<16x128xf32>,
    } else {
    }
    return
  }
  func.func @transform_0(%arg0: i32, %arg1: i32) -> (i32, i32) {
    %c0_i32 = arith.constant 0 : i32
    %c0_i32_0 = arith.constant 0 : i32
    return %arg0, %c0_i32 : i32, i32
  }
  func.func @transform_1(%arg0: i32, %arg1: i32) -> (i32, i32) {
    %c0_i32 = arith.constant 0 : i32
    %c0_i32_0 = arith.constant 0 : i32
    %c0_i32_1 = arith.constant 0 : i32
    return %c0_i32, %c0_i32_0 : i32, i32
  }
  func.func @transform_2(%arg0: i32, %arg1: i32) -> (i32, i32) {
    %c0_i32 = arith.constant 0 : i32
    %c0_i32_0 = arith.constant 0 : i32
    %c0_i32_1 = arith.constant 0 : i32
    return %c0_i32, %c0_i32_0 : i32, i32
  }
  func.func @transform_3(%arg0: i32, %arg1: i32) -> (i32, i32) {
    %c0_i32 = arith.constant 0 : i32
    %c0_i32_0 = arith.constant 0 : i32
    return %c0_i32, %arg1 : i32, i32
  }
  func.func @transform_4(%arg0: i32, %arg1: i32) -> (i32, i32) {
    %c0_i32 = arith.constant 0 : i32
    %c0_i32_0 = arith.constant 0 : i32
    return %c0_i32, %arg1 : i32, i32
  }
  func.func @transform_5(%arg0: i32, %arg1: i32) -> (i32, i32) {
    %c0_i32 = arith.constant 0 : i32
    %c0_i32_0 = arith.constant 0 : i32
    return %arg1, %c0_i32 : i32, i32
  }
  func.func @transform_6(%arg0: i32, %arg1: i32) -> (i32, i32) {
    %c0_i32 = arith.constant 0 : i32
    %c0_i32_0 = arith.constant 0 : i32
    %c0_i32_1 = arith.constant 0 : i32
    return %c0_i32, %c0_i32_0 : i32, i32
  }
  func.func @transform_7(%arg0: i32, %arg1: i32) -> (i32, i32) {
    %c0_i32 = arith.constant 0 : i32
    %c0_i32_0 = arith.constant 0 : i32
    return %arg0, %c0_i32 : i32, i32
  }
}

</mosaic_0001>

<bundles_post_ra>
// kernel: decoder_forward.12
= control target key start
LH: loop header
LB: loop body
LE: loop exit
PB: predicated region body
PF: predicated region fallthrough
CT: control target
= control target key end

     0   :  { %13 = vsyncpa [#allocation3], 0  ;;  %s509_s27 = smov [#allocation2]   ;;  %s510_s29 = smov 192   ;;  %s596_s0 = inlined_call_operand.vmem [shape: f32[16,128], index: 0, kind: input, shape index: {}]   ;;  %s597_s1 = inlined_call_operand.vmem [shape: f32[1,128], index: 1, kind: input, shape index: {}]   ;;  %s598_s2 = inlined_call_operand.vmem [shape: f32[1,128], index: 2, kind: input, shape index: {}]   ;;  %s599_s3 = inlined_call_operand.hbm [shape: bf16[128,384], index: 3, kind: input, shape index: {}]   ;;  %s600_s4 = inlined_call_operand.vmem [shape: f32[1,384], index: 4, kind: input, shape index: {}]   ;;  %s601_s5 = inlined_call_operand.vmem [shape: bf16[16,128], index: 5, kind: output, shape index: {0}]   ;;  %s602_s6 = inlined_call_operand.vmem [shape: bf16[16,128], index: 6, kind: output, shape index: {1}]   ;;  %s603_s7 = inlined_call_operand.vmem [shape: bf16[16,128], index: 7, kind: output, shape index: {2}]  }
   0x1   :  { %s24_s26 = sshll.u32 %s599_s3, 4  ;;  %s26_s28 = sshll.u32 %s509_s27, 4  ;;  %s25_s26 = int_to_ptr.hbm [resolvable:$true] %s24_s26  ;;  %s27_s28 = int_to_ptr.vmem [resolvable:$true] %s26_s28 }
   0x2   :  { %s511_s30 = smov 12  }
   0x3   :  { %32 = dma.hbm_to_vmem [thread:$0]  %s25_s26, 3072, %s27_s28, [#allocation3], %s510_s29, %s510_s29, %s511_s30  }
   0x4   :  { %507 = dma.done.wait [#allocation3], 3072  }
   0x5   :  { %508 = vsyncadd [#allocation3], 4294964224  ;;  %v39_v0 = vld [vmem:[%s596_s0] sm:$0xff]  ;;  %v40_v1 = vld [vmem:[%s596_s0 + $0x8] sm:$0xff]  ;;  %v512_v2 = vmov 128.0  }
   0x6   :  { %41 = vadd.xlane.f32.xlu0 %v39_v0  ;;  %477 = vrcp.f32 %v512_v2  ;;  %v422_v17 = vld [vmem:[#allocation2 + $0xa8] sm:$0xf]  ;;  %v454_v18 = vld [vmem:[#allocation2 + $0xb0] sm:$0xf0]  ;;  %v453_v19 = vld [vmem:[#allocation2 + $0xac] sm:$0xf] }
   0x7   :  { %v423_v20 = vor.u32 %v454_v18, %v422_v17  ;;  %v424_v21 = vld [vmem:[#allocation2 + $0xb4] sm:$0xf0]  ;;  %v430_v22 = vld [vmem:[#allocation2 + $0xb0] sm:$0xf]  ;;  %v455_v23 = vld [vmem:[#allocation2 + $0xb8] sm:$0xf0] }
   0x8   :  { %v427_v24 = vor.u32 %v453_v19, %v424_v21  ;;  %v431_v25 = vor.u32 %v455_v23, %v430_v22  ;;  %v410_v26 = vld [vmem:[#allocation2 + $0x90] sm:$0xf]  ;;  %v451_v27 = vld [vmem:[#allocation2 + $0x98] sm:$0xf0]  ;;  %v450_v28 = vld [vmem:[#allocation2 + $0x94] sm:$0xf] }
   0x9   :  { %269 = vmatpush.bf16.msra.mxu0 %v423_v20  ;;  %v411_v29 = vor.u32 %v451_v27, %v410_v26  ;;  %v412_v30 = vld [vmem:[#allocation2 + $0x9c] sm:$0xf0]  ;;  %v418_v31 = vld [vmem:[#allocation2 + $0x98] sm:$0xf]  ;;  %v452_v32 = vld [vmem:[#allocation2 + $0xa0] sm:$0xf0] }
   0xa   :  { %283 = vmatpush.bf16.msra.mxu1 %v427_v24  ;;  %297 = vmatpush.bf16.msra.mxu2 %v431_v25  ;;  %v415_v33 = vor.u32 %v450_v28, %v412_v30  ;;  %v419_v34 = vor.u32 %v452_v32, %v418_v31  ;;  %v398_v35 = vld [vmem:[#allocation2 + $0x78] sm:$0xf]  ;;  %v448_v36 = vld [vmem:[#allocation2 + $0x80] sm:$0xf0]  ;;  %v447_v37 = vld [vmem:[#allocation2 + $0x7c] sm:$0xf] }
   0xb   :  { %v399_v38 = vor.u32 %v448_v36, %v398_v35  ;;  %v400_v39 = vld [vmem:[#allocation2 + $0x84] sm:$0xf0]  ;;  %v406_v40 = vld [vmem:[#allocation2 + $0x80] sm:$0xf]  ;;  %v449_v41 = vld [vmem:[#allocation2 + $0x88] sm:$0xf0] }
   0xc   :  { %v478_v3 = vpop.eup %477  ;;  %v403_v42 = vor.u32 %v447_v37, %v400_v39  ;;  %v407_v43 = vor.u32 %v449_v41, %v406_v40  ;;  %v386_v44 = vld [vmem:[#allocation2 + $0x60] sm:$0xf]  ;;  %v445_v45 = vld [vmem:[#allocation2 + $0x68] sm:$0xf0]  ;;  %v444_v46 = vld [vmem:[#allocation2 + $0x64] sm:$0xf] }
   0xd   :  { %v46_v4 = vmul.f32 128.0, %v478_v3  ;;  %vm50_vm0 = vweird.f32 %v478_v3  ;;  %270 = vmatpush.bf16.msra.mxu0 %v411_v29  ;;  %v387_v47 = vor.u32 %v445_v45, %v386_v44  ;;  %v388_v48 = vld [vmem:[#allocation2 + $0x6c] sm:$0xf0]  ;;  %v394_v49 = vld [vmem:[#allocation2 + $0x68] sm:$0xf] }
   0xe   :  { %43 = vadd.xlane.f32.xlu0 %v40_v1  ;;  %284 = vmatpush.bf16.msra.mxu1 %v415_v33  ;;  %v446_v50 = vld [vmem:[#allocation2 + $0x70] sm:$0xf0]  ;;  %v391_v51 = vor.u32 %v444_v46, %v388_v48  ;;  %v374_v53 = vld [vmem:[#allocation2 + $0x48] sm:$0xf]  ;;  %v441_v55 = vld [vmem:[#allocation2 + $0x4c] sm:$0xf] }
   0xf   :  { %v47_v5 = vsub.f32 1.0, %v46_v4  ;;  %298 = vmatpush.bf16.msra.mxu2 %v419_v34  ;;  %v395_v52 = vor.u32 %v446_v50, %v394_v49  ;;  %v442_v54 = vld [vmem:[#allocation2 + $0x50] sm:$0xf0]  ;;  %v376_v57 = vld [vmem:[#allocation2 + $0x54] sm:$0xf0] }
  0x10   :  { %v375_v56 = vor.u32 %v442_v54, %v374_v53  ;;  %v382_v58 = vld [vmem:[#allocation2 + $0x50] sm:$0xf]  ;;  %v443_v59 = vld [vmem:[#allocation2 + $0x58] sm:$0xf0]  ;;  %v379_v60 = vor.u32 %v441_v55, %v376_v57  ;;  %v364_v2 = vld [vmem:[#allocation2 + $0x3c] sm:$0xf0] }
  0x11   :  { %v48_v6 = vmul.f32 %v478_v3, %v47_v5  ;;  %271 = vmatpush.bf16.msra.mxu0 %v399_v38  ;;  %v383_v61 = vor.u32 %v443_v59, %v382_v58  ;;  %v362_v62 = vld [vmem:[#allocation2 + $0x30] sm:$0xf]  ;;  %v439_v63 = vld [vmem:[#allocation2 + $0x38] sm:$0xf0]  ;;  %v440_v4 = vld [vmem:[#allocation2 + $0x40] sm:$0xf0] }
  0x12   :  { %285 = vmatpush.bf16.msra.mxu1 %v403_v42  ;;  %v338_v19 = vld [vmem:[#allocation2] sm:$0xf]  ;;  %v433_v20 = vld [vmem:[#allocation2 + $0x8] sm:$0xf0]  ;;  %v432_v21 = vld [vmem:[#allocation2 + $0x4] sm:$0xf] }
  0x13   :  { %v49_v7 = vadd.f32 %v478_v3, %v48_v6  ;;  %299 = vmatpush.bf16.msra.mxu2 %v407_v43  ;;  %v339_v23 = vor.u32 %v433_v20, %v338_v19  ;;  %v340_v24 = vld [vmem:[#allocation2 + $0xc] sm:$0xf0]  ;;  %v346_v25 = vld [vmem:[#allocation2 + $0x8] sm:$0xf]  ;;  %v434_v26 = vld [vmem:[#allocation2 + $0x10] sm:$0xf0] }
  0x14   :  { %v343_v28 = vor.u32 %v432_v21, %v340_v24  ;;  %v347_v29 = vor.u32 %v434_v26, %v346_v25  ;;  %v475_v46 = vld [vmem:[%s597_s1] ss:$0 sm:$0xff] }
  0x15   :  { %v562_v8 = vsel %vm50_vm0, %v478_v3, %v49_v7  ;;  %272 = vmatpush.bf16.msra.mxu0 %v387_v47  ;;  %v370_v3 = vld [vmem:[#allocation2 + $0x38] sm:$0xf]  ;;  %v133_v57 = vld [vmem:[%s600_s4] sm:$0x7] }
  0x16   :  { %286 = vmatpush.bf16.msra.mxu1 %v391_v51  ;;  %v371_v6 = vor.u32 %v440_v4, %v370_v3  ;;  %v350_v7 = vld [vmem:[#allocation2 + $0x18] sm:$0xf]  ;;  %v476_v51 = vld [vmem:[%s598_s2] ss:$0 sm:$0xff]  ;;  %v135_v58 = vperm.slane %v133_v57, 0  ;;  %v137_v4 = vperm.slane %v133_v57, 2 }
  0x17   :  { %300 = vmatpush.bf16.msra.mxu2 %v395_v52 }
  0x19   :  { %273 = vmatpush.bf16.msra.mxu0 %v375_v56 }
  0x1a   :  { %287 = vmatpush.bf16.msra.mxu1 %v379_v60 }
  0x1b   :  { %301 = vmatpush.bf16.msra.mxu2 %v383_v61 }
  0x1f   :  { %302 = vmatpush.bf16.msra.mxu2 %v371_v6 }
  0x79   :  { %v42_v9 = vpop.xlane.xlu0 %41 }
  0x7a   :  { %v52_v10 = vmul.f32 %v562_v8, %v42_v9  ;;  %v436_v9 = vld [vmem:[#allocation2 + $0x20] sm:$0xf0] }
  0x7c   :  { %v565_v11 = vsub.f32 %v39_v0, %v52_v10  ;;  %v438_v0 = vld [vmem:[#allocation2 + $0x34] sm:$0xf]  ;;  %v435_v10 = vld [vmem:[#allocation2 + $0x1c] sm:$0xf] }
  0x7d   :  { %v367_v5 = vor.u32 %v438_v0, %v364_v2 }
  0x7e   :  { %v56_v12 = vmul.f32 %v565_v11, %v565_v11 }
  0x7f   :  { %288 = vmatpush.bf16.msra.mxu1 %v367_v5 }
  0x80   :  { %58 = vadd.xlane.f32.xlu1 %v56_v12  ;;  %v351_v12 = vor.u32 %v436_v9, %v350_v7 }
  0x81   :  { %v44_v13 = vpop.xlane.xlu0 %43 }
  0x82   :  { %v53_v14 = vmul.f32 %v562_v8, %v44_v13  ;;  %v352_v13 = vld [vmem:[#allocation2 + $0x24] sm:$0xf0] }
  0x83   :  { %v355_v17 = vor.u32 %v435_v10, %v352_v13 }
  0x84   :  { %v570_v15 = vsub.f32 %v40_v1, %v53_v14  ;;  %v363_v1 = vor.u32 %v439_v63, %v362_v62  ;;  %v358_v14 = vld [vmem:[#allocation2 + $0x20] sm:$0xf] }
  0x85   :  { %289 = vmatpush.bf16.msra.mxu1 %v355_v17 }
  0x86   :  { %v57_v16 = vmul.f32 %v570_v15, %v570_v15  ;;  %274 = vmatpush.bf16.msra.mxu0 %v363_v1 }
  0x88   :  { %60 = vadd.xlane.f32.xlu1 %v57_v16  ;;  %v437_v16 = vld [vmem:[#allocation2 + $0x28] sm:$0xf0] }
  0x89   :  { %v359_v18 = vor.u32 %v437_v16, %v358_v14  ;;  %290 = vmatpush.bf16.msra.mxu1 %v343_v28 }
  0x8a   :  { %275 = vmatpush.bf16.msra.mxu0 %v351_v12 }
  0x8b   :  { %303 = vmatpush.bf16.msra.mxu2 %v359_v18 }
  0x8e   :  { %276 = vmatpush.bf16.msra.mxu0 %v339_v23 }
  0x8f   :  { %304 = vmatpush.bf16.msra.mxu2 %v347_v29 }
  0xf3   :  { %v59_v22 = vpop.xlane.xlu1 %58 }
  0xf4   :  { %v62_v27 = vmul.f32 %v59_v22, %v562_v8 }
  0xf6   :  { %v64_v30 = vadd.f32 1e-05, %v62_v27 }
  0xf8   :  { %479 = vrsqrt.f32 %v64_v30  ;;  %vm72_vm2 = vweird.f32 %v64_v30 }
  0xfb   :  { %v61_v31 = vpop.xlane.xlu1 %60 }
  0xfc   :  { %v63_v32 = vmul.f32 %v61_v31, %v562_v8 }
  0xfe   :  { %v480_v33 = vpop.eup %479  ;;  %v65_v34 = vadd.f32 1e-05, %v63_v32 }
  0xff   :  { %v67_v35 = vmul.f32 %v480_v33, %v64_v30  ;;  %vm73_vm1 = vweird.f32 %v480_v33 }
 0x100   :  { %481 = vrsqrt.f32 %v65_v34  ;;  %vm74_vm3 = vmor %vm72_vm2, %vm73_vm1  ;;  %vm82_vm5 = vweird.f32 %v65_v34 }
 0x101   :  { %v68_v36 = vmul.f32 %v480_v33, %v67_v35 }
 0x103   :  { %v69_v37 = vmul.f32 0.5, %v68_v36 }
 0x105   :  { %v70_v38 = vsub.f32 1.5, %v69_v37 }
 0x106   :  { %v482_v39 = vpop.eup %481 }
 0x107   :  { %v71_v40 = vmul.f32 %v480_v33, %v70_v38  ;;  %v77_v41 = vmul.f32 %v482_v39, %v65_v34  ;;  %vm83_vm4 = vweird.f32 %v482_v39 }
 0x108   :  { %vm84_vm6 = vmor %vm82_vm5, %vm83_vm4 }
 0x109   :  { %v78_v42 = vmul.f32 %v482_v39, %v77_v41  ;;  %v75_v43 = vsel %vm74_vm3, %v480_v33, %v71_v40 }
 0x10a   :  { %v86_v8 = vmul.f32 %v75_v43, %v565_v11 }
 0x10b   :  { %v79_v44 = vmul.f32 0.5, %v78_v42 }
 0x10c   :  { %v92_v50 = vmul.f32 %v475_v46, %v86_v8 }
 0x10d   :  { %v80_v45 = vsub.f32 1.5, %v79_v44 }
 0x10e   :  { %v98_v53 = vadd.f32 %v476_v51, %v92_v50 }
 0x10f   :  { %v81_v47 = vmul.f32 %v482_v39, %v80_v45 }
 0x111   :  { %v85_v48 = vsel %vm84_vm6, %v482_v39, %v81_v47 }
 0x112   :  { %v87_v49 = vmul.f32 %v85_v48, %v570_v15  ;;  %v136_v15 = vperm.slane %v133_v57, 1 }
 0x114   :  { %v93_v52 = vmul.f32 %v475_v46, %v87_v49 }
 0x116   :  { %v99_v54 = vadd.f32 %v476_v51, %v93_v52 }
 0x118   :  { %v100_v55 = vpack.c.bf16 %v99_v54, %v98_v53 }
 0x11a   :  { %277 = vmatmul.bf16.vlgmr.msra.gmra.mxu0 %v100_v55  ;;  %291 = vmatmul.bf16.vlgmr.msra.gmra.mxu1 %v100_v55 }
 0x11b   :  { %305 = vmatmul.bf16.vlgmr.msra.gmra.mxu2 %v100_v55 }
 0x197   :  { %v278_v11 = vpop.f32.mrf.mxu0  ;;  %v292_v56 = vpop.f32.mrf.mxu1 }
 0x198   :  { %v279_v62 = vadd.f32 %v278_v11, %v135_v58  ;;  %v293_v63 = vadd.f32 %v292_v56, %v136_v15 }
 0x19e   :  { %v306_v59 = vpop.f32.mrf.mxu2 }
 0x19f   :  { %v280_v60 = vpop.f32.mrf.mxu0  ;;  %v294_v61 = vpop.f32.mrf.mxu1  ;;  %v307_v6 = vadd.f32 %v306_v59, %v137_v4 }
 0x1a0   :  { %v281_v0 = vadd.f32 %v280_v60, %v135_v58  ;;  %v295_v1 = vadd.f32 %v294_v61, %v136_v15 }
 0x1a2   :  { %v459_v2 = vpack.c.bf16 %v281_v0, %v279_v62  ;;  %v464_v3 = vpack.c.bf16 %v295_v1, %v293_v63 }
 0x1a4   :  { %460 = vst [vmem:[%s601_s5] sm:$0xff] %v459_v2  }
 0x1a5   :  { %465 = vst [vmem:[%s602_s6] sm:$0xff] %v464_v3  }
 0x1a6   :  { %v308_v5 = vpop.f32.mrf.mxu2 }
 0x1a7   :  { %v309_v7 = vadd.f32 %v308_v5, %v137_v4 }
 0x1a9   :  { %v469_v9 = vpack.c.bf16 %v309_v7, %v307_v6 }
 0x1ab   :  { %470 = vst [vmem:[%s603_s7] sm:$0xff] %v469_v9  }
 0x1ac   :  { %335 = vsyncpa [#allocation3], 1 }

// kernel: decoder_forward.13
= control target key start
LH: loop header
LB: loop body
LE: loop exit
PB: predicated region body
PF: predicated region fallthrough
CT: control target
= control target key end

     0   :  { %12 = vsyncpa [#allocation4], 0  ;;  %s1167_s24 = smov 0   ;;  %s1169_s25 = smov 0   ;;  %s1276_s0 = inlined_call_operand.vmem [shape: bf16[2,8,128], index: 0, kind: input, shape index: {}]   ;;  %s1277_s1 = inlined_call_operand.vmem [shape: bf16[2,8,128], index: 1, kind: input, shape index: {}]   ;;  %s1278_s2 = inlined_call_operand.vmem [shape: bf16[2,8,128], index: 2, kind: input, shape index: {}]   ;;  %s1279_s3 = inlined_call_operand.vmem [shape: s32[2,1,8], index: 3, kind: input, shape index: {}]   ;;  %s1280_s4 = inlined_call_operand.hbm [shape: bf16[128,128], index: 4, kind: input, shape index: {}]   ;;  %s1281_s5 = inlined_call_operand.vmem [shape: f32[1,128], index: 5, kind: input, shape index: {}]   ;;  %s1282_s6 = inlined_call_operand.vmem [shape: f32[2,8,128], index: 6, kind: input, shape index: {}]   ;;  %s1283_s7 = inlined_call_operand.vmem [shape: f32[2,8,128], index: 7, kind: output, shape index: {}]  }
   0x1   :  { %s1171_s26 = smov 0  }
   0x2 LB: > { %s940_s27 = sadd.s32 4294967295, %s1117_s26   ;;  %s30_s28 = sadd.s32 1, %s1113_s25  ;;  %s1117_s26 = sphi %s1171_s26, %s18_s26   ;;  %s1113_s25 = sphi %s1169_s25, %s1285_s25   ;;  %s1109_s24 = sphi %s1167_s24, %s1284_s24  }
   0x3   : > { %p32_p0 = scmp.ge.s32.totalorder %s30_s28, 2  ;;  %p942_p1 = scmp.ge.s32.totalorder %s1117_s26, 1 }
   0x4   : > { %p239_p2 = scmp.lt.s32.totalorder %s1117_s26, 3  ;;  %p1010_p4 = scmp.eq.s32.totalorder %s940_s27, 0 }
   0x5   : > { %s1287_s28 = smov (%p32_p0, %s30_s28), 0  ;;  %s250_s8 = sshll.u32 %s1280_s4, 4  ;;  %s251_s8 = int_to_ptr.hbm [resolvable:$true] %s250_s8 }
   0x6   : > { %p240_p3 = pnand %p942_p1, %p239_p2  ;;  %s1119_s9 = smov [#allocation3]  }
   0x7   : > { %s252_s10 = sshll.u32 %s1119_s9, 4  ;;  %s1120_s11 = smov 64   ;;  %s253_s10 = int_to_ptr.vmem [resolvable:$true] %s252_s10 }
   0x8   : > { %p1006_p5 = pneg %p240_p3  ;;  %s1121_s12 = smov 4  }
   0x9   : > { %311 = sbr.rel (%p240_p3) target bundleno = 1356 (0x54c), region = 48 }
   0xa   : > { %p1007_p6 = pnand %p1010_p4, %p1006_p5 }
   0xc   : > { %1009 = dma.hbm_to_vmem [thread:$0]  (!%p1007_p6), %s251_s8, 1024, %s253_s10, [#allocation4], %s1120_s11, %s1120_s11, %s1121_s12  }
   0xe   : > { %1104 = dma.done.wait (%p1010_p4), [#allocation4], 1024  }
   0xf   : > { %1106 = vsyncadd (%p1010_p4), [#allocation4], 4294966272  ;;  %p366_p7 = scmp.lt.s32.totalorder %s1109_s24, 1  ;;  %s1122_s20 = smov 96   ;;  %vm417_vm0 = vcmask 261120   ;;  %v407_v14 = vlaneseq  ;;  %v1124_v15 = vmov 0  }
  0x10   : > { %s1123_s21 = smov 32   ;;  %s1125_s9 = smov 64   ;;  %v1126_v20 = vmov -1e+09   ;;  %vm437_vm5 = vcmask 64512   ;;  %vm466_vm6 = vcmask 1043456  }
  0x11   : > { %s1289_s24 = smov (!%p366_p7, %s1109_s24), 1  ;;  %v408_v18 = vshrl.u32 %v407_v14, 7  ;;  %v413_v19 = vand.u32 127, %v407_v14 }
  0x12   : > { %s947_s13 = sshll.u32 %s1289_s24, 2  ;;  %s383_s8 = scalar_lea.vmem %s1279_s3, %s1289_s24 }
  0x13   : > { %s376_s16 = scalar_lea.vmem %s1277_s1, %s947_s13  ;;  %s372_s19 = scalar_lea.vmem %s1276_s0, %s947_s13  ;;  %v402_v12 = vld [vmem:[%s383_s8] sm:$0x1]  ;;  %vm414_vm3 = vcmp.ge.s32.totalorder %v408_v18, %v413_v19 }
  0x14   : > { %v400_v0 = vld [vmem:[%s376_s16] sm:$0xf]  ;;  %s380_s27 = scalar_lea.vmem %s1278_s2, %s947_s13  ;;  %vm403_vm1 = vcmp.gt.s32.totalorder %v402_v12, 0  ;;  %s950_s10 = sshll.u32 %s1289_s24, 3 }
  0x15   : > { %v490_v1 = vunpack.c.l.b16 %v400_v0  ;;  %v399_v2 = vld [vmem:[%s372_s19] sm:$0xf]  ;;  %v422_v9 = vsel %vm417_vm0, %v400_v0, 0  ;;  %v404_v16 = vsel %vm403_vm1, 1, %v1124_v15  ;;  %s390_s13 = scalar_lea.vmem %s1282_s6, %s950_s10  ;;  %s397_s18 = scalar_lea.vmem %s1283_s7, %s950_s10 }
  0x16   : > { %v485_v4 = vunpack.c.l.b16 %v399_v2  ;;  %v1211_v10 = vld [vmem:[%s380_s27] sm:$0xf]  ;;  %431 = vmatpush.bf16.xpose.msra.mxu0 %v422_v9  ;;  %v405_v17 = vperm.slane %v404_v16, 0 }
  0x17   : > { %v491_v3 = vpack.c.b16 %v490_v1, %v490_v1  ;;  %v539_v11 = vunpack.c.l.b16 %v1211_v10 }
  0x18   : > { %v486_v5 = vpack.c.b16 %v485_v4, %v485_v4  ;;  %vm406_vm2 = vcmp.eq.s32.totalorder %v405_v17, 1 }
  0x19   : > { %492 = vrot.lane.b32.xlu0 %v491_v3, %s1122_s20  ;;  %v1214_v13 = vpack.c.b16 %v539_v11, %v539_v11  ;;  %vm415_vm4 = vmand %vm406_vm2, %vm414_vm3  ;;  %v468_v11 = vsel %vm466_vm6, %v1211_v10, 0 }
  0x1a   : > { %v1221_v21 = vsel %vm415_vm4, 0.0, %v1126_v20  ;;  %477 = vmatpush.bf16.msra.mxu1 %v468_v11  ;;  %vm566_vm4 = vcmask 523520   ;;  %v995_v11 = vld [vmem:[#allocation3 + $0x8] sm:$0xff] }
  0x1b   : > { %541 = vrot.lane.b32.xlu2 %v1214_v13, %s1122_s20 }
  0x1d   : > { %952 = vmatmul.msk.bf16.vlgmr.msra.gmra.mxu0 %vm417_vm0, %v399_v2 }
  0x21   : > { %487 = vrot.lane.b32.xlu0 %v486_v5, %s1122_s20 }
  0x23   : > { %570 = vrot.lane.b32.xlu2 %v491_v3, %s1125_s9 }
  0x29   : > { %645 = vrot.lane.b32.xlu0 %v491_v3, %s1123_s21 }
  0x2b   : > { %643 = vrot.lane.b32.xlu2 %v486_v5, %s1123_s21 }
  0x75   : > { %v542_v26 = vpop.permute.xlu2 %541 }
  0x76   : > { %v547_v40 = vsel %vm466_vm6, %v542_v26, 0 }
  0x77   : > { %556 = vmatpush.bf16.msra.mxu3 %v547_v40 }
  0x7d   : > { %v571_v30 = vpop.permute.xlu2 %570 }
  0x7e   : > { %v576_v41 = vsel %vm417_vm0, %v571_v30, 0 }
  0x7f   : > { %585 = vmatpush.bf16.xpose.msrb.mxu3 %v576_v41 }
  0x85   : > { %v644_v36 = vpop.permute.xlu2 %643 }
  0x8b   : > { %v493_v6 = vpop.permute.xlu0 %492 }
  0x8c   : > { %v498_v7 = vsel %vm417_vm0, %v493_v6, 0 }
  0x8d   : > { %507 = vmatpush.bf16.xpose.msra.mxu2 %v498_v7 }
  0x93   : > { %v488_v8 = vpop.permute.xlu0 %487 }
  0x94   : > { %954 = vmatmul.msk.bf16.vlgmr.msra.gmra.mxu2 %vm417_vm0, %v488_v8 }
  0x9a   : > { %v433_v33 = vpop.f32.mrf.mxu0 }
  0x9b   : > { %v646_v31 = vpop.permute.xlu0 %645  ;;  %v434_v38 = vadd.f32 %v433_v33, %v1221_v21 }
  0x9c   : > { %v651_v32 = vsel %vm417_vm0, %v646_v31, 0 }
  0x9d   : > { %660 = vmatpush.bf16.xpose.msrb.mxu0 %v651_v32  ;;  %v438_v39 = vsel %vm437_vm5, %v434_v38, -inf }
  0xa2   : > { %v435_v37 = vpop.f32.mrf.mxu0 }
  0xa4   : > { %958 = vmatmul.msk.bf16.vlgmr.msrb.gmra.mxu0 %vm417_vm0, %v644_v36 }
 0x117   : > { %v509_v22 = vpop.f32.mrf.mxu2 }
 0x118   : > { %v510_v23 = vadd.f32 %v509_v22, %v1221_v21 }
 0x11a   : > { %v513_v24 = vsel %vm437_vm5, %v510_v23, -inf }
 0x11b   : > { %514 = vmax.xlane.f32.xlu1 %v513_v24 }
 0x11f   : > { %v511_v25 = vpop.f32.mrf.mxu2 }
 0x121   : > { %v662_v49 = vpop.f32.mrf.mxu0 }
 0x122   : > { %v663_v50 = vadd.f32 %v662_v49, %v1221_v21 }
 0x124   : > { %v666_v53 = vsel %vm437_vm5, %v663_v50, -inf }
 0x125   : > { %667 = vmax.xlane.f32.xlu2 %v666_v53 }
 0x129   : > { %v664_v58 = vpop.f32.mrf.mxu0 }
 0x18e   : > { %v515_v27 = vpop.xlane.xlu1 %514 }
 0x18f   : > { %v516_v28 = vsub.f32 %v510_v23, %v515_v27 }
 0x191   : > { %v517_v29 = vmul.f32 1.442695, %v516_v28 }
 0x193   : > { %1045 = vpow2.f32 %v517_v29 }
 0x198   : > { %v668_v2 = vpop.xlane.xlu2 %667 }
 0x199   : > { %v1046_v34 = vpop.eup %1045  ;;  %v669_v4 = vsub.f32 %v663_v50, %v668_v2  ;;  %v1001_v2 = vld [vmem:[#allocation3 + $0x38] sm:$0xff] }
 0x19a   : > { %v519_v35 = vsel %vm437_vm5, %v1046_v34, 0.0  ;;  %784 = vmatpush.bf16.msrb.mxu1 %v1001_v2 }
 0x19b   : > { %520 = vadd.xlane.f32.xlu1 %v519_v35 }
 0x1b4   : > { %568 = vrot.lane.b32.xlu1 %v486_v5, %s1125_s9  ;;  %v670_v5 = vmul.f32 1.442695, %v669_v4  ;;  %v999_v4 = vld [vmem:[#allocation3 + $0x28] sm:$0xff] }
 0x1de   : > { %439 = vmax.xlane.f32.xlu1 %v438_v39 }
 0x20e   : > { %v521_v42 = vpop.xlane.xlu1 %520 }
 0x20f   : > { %1047 = vrcp.f32 %v521_v42  ;;  %v533_v46 = vand.u32 2147483648, %v521_v42  ;;  %v531_v48 = vand.u32 2147483647, %v521_v42  ;;  %vm527_vm8 = vweird.f32 %v521_v42 }
 0x211   : > { %v534_v52 = vor.u32 1.1754944e-38, %v533_v46  ;;  %vm532_vm10 = vcmp.eq.f32.partialorder %v531_v48, 8.507059e+37 }
 0x215   : > { %v1048_v43 = vpop.eup %1047 }
 0x216   : > { %v523_v44 = vmul.f32 %v1048_v43, %v521_v42  ;;  %vm528_vm7 = vweird.f32 %v1048_v43 }
 0x217   : > { %vm529_vm9 = vmor %vm527_vm8, %vm528_vm7 }
 0x218   : > { %v524_v45 = vsub.f32 1.0, %v523_v44 }
 0x21a   : > { %v525_v47 = vmul.f32 %v1048_v43, %v524_v45 }
 0x21c   : > { %v526_v51 = vadd.f32 %v1048_v43, %v525_v47 }
 0x21e   : > { %v530_v54 = vsel %vm529_vm9, %v1048_v43, %v526_v51 }
 0x21f   : > { %v535_v55 = vsel %vm532_vm10, %v534_v52, %v530_v54 }
 0x220   : > { %v536_v56 = vmul.f32 %v1046_v34, %v535_v55 }
 0x222   : > { %v537_v57 = vpack.c.bf16 %v536_v56, %v536_v56 }
 0x224   : > { %955 = vmatmul.msk.bf16.vlgmr.msra.gmra.mxu3 %vm437_vm5, %v537_v57 }
 0x226   : > { %v569_v59 = vpop.permute.xlu1 %568 }
 0x234   : > { %956 = vmatmul.msk.bf16.vlgmr.msrb.gmra.mxu3 %vm417_vm0, %v569_v59 }
 0x251   : > { %v440_v60 = vpop.xlane.xlu1 %439 }
 0x252   : > { %v441_v61 = vsub.f32 %v434_v38, %v440_v60 }
 0x254   : > { %v442_v62 = vmul.f32 1.442695, %v441_v61 }
 0x256   : > { %1049 = vpow2.f32 %v442_v62 }
 0x257   : > { %1051 = vpow2.f32 %v670_v5  ;;  %v998_v5 = vld [vmem:[#allocation3 + $0x20] sm:$0xff] }
 0x25c   : > { %v1050_v63 = vpop.eup %1049 }
 0x25d   : > { %v444_v0 = vsel %vm437_vm5, %v1050_v63, 0.0  ;;  %v1052_v9 = vpop.eup %1051 }
 0x25e   : > { %445 = vadd.xlane.f32.xlu1 %v444_v0  ;;  %v672_v14 = vsel %vm437_vm5, %v1052_v9, 0.0 }
 0x2a7   : > { %v558_v1 = vpop.f32.mrf.mxu3 }
 0x2a8   : > { %563 = vrot.lane.b32.xlu1 %v558_v1, %s1123_s21 }
 0x2af   : > { %v560_v3 = vpop.f32.mrf.mxu3 }
 0x2b0   : > { %v1000_v3 = vld [vmem:[#allocation3 + $0x30] sm:$0xff] }
 0x2b1   : > { %785 = vmatpush.bf16.msrb.mxu1 %v1000_v3 }
 0x2b5   : > { %786 = vmatpush.bf16.msrb.mxu1 %v999_v4 }
 0x2b7   : > { %v587_v6 = vpop.f32.mrf.mxu3 }
 0x2b8   : > { %v588_v7 = vadd.f32 %v587_v6, %v1221_v21  ;;  %v997_v6 = vld [vmem:[#allocation3 + $0x18] sm:$0xff] }
 0x2b9   : > { %787 = vmatpush.bf16.msrb.mxu1 %v998_v5 }
 0x2ba   : > { %v591_v8 = vsel %vm437_vm5, %v588_v7, -inf }
 0x2bb   : > { %592 = vmax.xlane.f32.xlu0 %v591_v8 }
 0x2bd   : > { %788 = vmatpush.bf16.msrb.mxu1 %v997_v6 }
 0x2bf   : > { %v589_v12 = vpop.f32.mrf.mxu3 }
 0x2c0   : > { %v994_v12 = vld [vmem:[#allocation3] sm:$0xff] }
 0x2c3   : > { %673 = vadd.xlane.f32.xlu0 %v672_v14 }
 0x2d1   : > { %v446_v15 = vpop.xlane.xlu1 %445 }
 0x2d2   : > { %1053 = vrcp.f32 %v446_v15  ;;  %v458_v18 = vand.u32 2147483648, %v446_v15  ;;  %vm452_vm11 = vweird.f32 %v446_v15  ;;  %v456_v20 = vand.u32 2147483647, %v446_v15 }
 0x2d4   : > { %v459_v10 = vor.u32 1.1754944e-38, %v458_v18  ;;  %vm457_vm14 = vcmp.eq.f32.partialorder %v456_v20, 8.507059e+37  ;;  %v797_v18 = vld [vmem:[%s390_s13] sm:$0xff] }
 0x2d7   : > { %691 = vrot.lane.b32.xlu0 %v1214_v13, %s1123_s21 }
 0x2d8   : > { %v1054_v16 = vpop.eup %1053 }
 0x2d9   : > { %v448_v17 = vmul.f32 %v1054_v16, %v446_v15  ;;  %vm453_vm12 = vweird.f32 %v1054_v16 }
 0x2da   : > { %vm454_vm13 = vmor %vm452_vm11, %vm453_vm12 }
 0x2db   : > { %v449_v19 = vsub.f32 1.0, %v448_v17 }
 0x2dd   : > { %v450_v21 = vmul.f32 %v1054_v16, %v449_v19  ;;  %v1044_v19 = vld [vmem:[%s1281_s5] ss:$0 sm:$0xff] }
 0x2df   : > { %v451_v22 = vadd.f32 %v1054_v16, %v450_v21 }
 0x2e1   : > { %v455_v23 = vsel %vm454_vm13, %v1054_v16, %v451_v22 }
 0x2e2   : > { %v460_v24 = vsel %vm457_vm14, %v459_v10, %v455_v23 }
 0x2e3   : > { %v461_v25 = vmul.f32 %v1050_v63, %v460_v24 }
 0x2e5   : > { %v462_v26 = vpack.c.bf16 %v461_v25, %v461_v25 }
 0x2e7   : > { %953 = vmatmul.msk.bf16.vlgmr.msra.gmra.mxu1 %vm437_vm5, %v462_v26 }
 0x31a   : > { %v564_v48 = vpop.permute.xlu1 %563 }
 0x32e   : > { %v593_v27 = vpop.xlane.xlu0 %592 }
 0x32f   : > { %v594_v28 = vsub.f32 %v588_v7, %v593_v27 }
 0x331   : > { %v595_v29 = vmul.f32 1.442695, %v594_v28 }
 0x333   : > { %1055 = vpow2.f32 %v595_v29 }
 0x336   : > { %v674_v30 = vpop.xlane.xlu0 %673 }
 0x337   : > { %1057 = vrcp.f32 %v674_v30  ;;  %v686_v35 = vand.u32 2147483648, %v674_v30  ;;  %vm680_vm15 = vweird.f32 %v674_v30  ;;  %v684_v37 = vand.u32 2147483647, %v674_v30 }
 0x339   : > { %v1056_v31 = vpop.eup %1055  ;;  %v687_v39 = vor.u32 1.1754944e-38, %v686_v35  ;;  %vm685_vm3 = vcmp.eq.f32.partialorder %v684_v37, 8.507059e+37 }
 0x33a   : > { %v597_v32 = vsel %vm437_vm5, %v1056_v31, 0.0 }
 0x33b   : > { %598 = vadd.xlane.f32.xlu2 %v597_v32 }
 0x33d   : > { %v1058_v33 = vpop.eup %1057 }
 0x33e   : > { %v676_v34 = vmul.f32 %v1058_v33, %v674_v30  ;;  %vm681_vm1 = vweird.f32 %v1058_v33 }
 0x33f   : > { %vm682_vm2 = vmor %vm680_vm15, %vm681_vm1 }
 0x340   : > { %v677_v36 = vsub.f32 1.0, %v676_v34 }
 0x342   : > { %v678_v38 = vmul.f32 %v1058_v33, %v677_v36 }
 0x344   : > { %v679_v40 = vadd.f32 %v1058_v33, %v678_v38 }
 0x346   : > { %v683_v41 = vsel %vm682_vm2, %v1058_v33, %v679_v40 }
 0x347   : > { %v688_v42 = vsel %vm685_vm3, %v687_v39, %v683_v41 }
 0x348   : > { %v689_v43 = vmul.f32 %v1052_v9, %v688_v42  ;;  %v996_v9 = vld [vmem:[#allocation3 + $0x10] sm:$0xff] }
 0x349   : > { %v692_v44 = vpop.permute.xlu0 %691  ;;  %789 = vmatpush.bf16.msrb.mxu1 %v996_v9 }
 0x34a   : > { %v697_v45 = vsel %vm466_vm6, %v692_v44, 0  ;;  %v690_v46 = vpack.c.bf16 %v689_v43, %v689_v43 }
 0x34b   : > { %706 = vmatpush.bf16.msrb.mxu2 %v697_v45 }
 0x34d   : > { %790 = vmatpush.bf16.msrb.mxu1 %v995_v11 }
 0x34e   : > { %959 = vmatmul.msk.bf16.vlgmr.msrb.gmra.mxu2 %vm437_vm5, %v690_v46 }
 0x351   : > { %791 = vmatpush.bf16.msrb.mxu1 %v994_v12 }
 0x353   : > { %616 = vrot.lane.b32.xlu2 %v1214_v13, %s1125_s9 }
 0x364   : > { %v479_v47 = vpop.f32.mrf.mxu1 }
 0x365   : > { %483 = vst.msk [vmem:[#allocation2] sm:$0xff] %vm417_vm0, %v479_v47 }
 0x366   : > { %567 = vst.msk [vmem:[#allocation2] sm:$0xff] %vm566_vm4, %v564_v48 }
 0x36c   : > { %v481_v49 = vpop.f32.mrf.mxu1 }
 0x3ae   : > { %v599_v50 = vpop.xlane.xlu2 %598 }
 0x3af   : > { %1059 = vrcp.f32 %v599_v50  ;;  %v611_v56 = vand.u32 2147483648, %v599_v50  ;;  %v609_v13 = vand.u32 2147483647, %v599_v50  ;;  %vm605_vm8 = vweird.f32 %v599_v50 }
 0x3b1   : > { %v612_v59 = vor.u32 1.1754944e-38, %v611_v56  ;;  %vm610_vm0 = vcmp.eq.f32.partialorder %v609_v13, 8.507059e+37 }
 0x3b5   : > { %v1060_v51 = vpop.eup %1059 }
 0x3b6   : > { %v601_v52 = vmul.f32 %v1060_v51, %v599_v50  ;;  %v617_v53 = vpop.permute.xlu2 %616  ;;  %vm606_vm7 = vweird.f32 %v1060_v51 }
 0x3b7   : > { %v622_v54 = vsel %vm466_vm6, %v617_v53, 0  ;;  %vm607_vm9 = vmor %vm605_vm8, %vm606_vm7  ;;  %vm716_vm6 = vcmask 1048320  }
 0x3b8   : > { %v602_v55 = vsub.f32 1.0, %v601_v52  ;;  %631 = vmatpush.bf16.msra.mxu3 %v622_v54 }
 0x3ba   : > { %v603_v57 = vmul.f32 %v1060_v51, %v602_v55 }
 0x3bc   : > { %v604_v58 = vadd.f32 %v1060_v51, %v603_v57 }
 0x3be   : > { %v608_v60 = vsel %vm607_vm9, %v1060_v51, %v604_v58 }
 0x3bf   : > { %v613_v61 = vsel %vm610_vm0, %v612_v59, %v608_v60 }
 0x3c0   : > { %v614_v62 = vmul.f32 %v1056_v31, %v613_v61 }
 0x3c2   : > { %v615_v63 = vpack.c.bf16 %v614_v62, %v614_v62 }
 0x3c4   : > { %957 = vmatmul.msk.bf16.vlgmr.msra.gmra.mxu3 %vm437_vm5, %v615_v63  ;;  %vm641_vm5 = vcmask 785920  }
 0x3d1   : > { %v708_v0 = vpop.f32.mrf.mxu2 }
 0x3d2   : > { %713 = vrot.lane.b32.xlu2 %v708_v0, %s1122_s20 }
 0x3d9   : > { %v710_v1 = vpop.f32.mrf.mxu2 }
 0x42c   : > { %v714_v15 = vpop.permute.xlu2 %713 }
 0x447   : > { %v633_v7 = vpop.f32.mrf.mxu3 }
 0x448   : > { %638 = vrot.lane.b32.xlu0 %v633_v7, %s1125_s9 }
 0x44f   : > { %v635_v8 = vpop.f32.mrf.mxu3 }
 0x4ba   : > { %v639_v14 = vpop.permute.xlu0 %638 }
 0x4bb   : > { %642 = vst.msk [vmem:[#allocation2] sm:$0xff] %vm641_vm5, %v639_v14 }
 0x4bc   : > { %717 = vst.msk [vmem:[#allocation2] sm:$0xff] %vm716_vm6, %v714_v15 }
 0x4c3   : > { %v718_v16 = vld [vmem:[#allocation2] sm:$0xff] }
 0x4c4   : > { %v719_v17 = vpack.c.bf16 %v718_v16, %v718_v16 }
 0x4c6   : > { %792 = vmatmul.bf16.vlgmr.msrb.gmra.mxu1 %v719_v17 }
 0x543   : > { %v793_v20 = vpop.f32.mrf.mxu1 }
 0x544   : > { %v798_v21 = vadd.f32 %v797_v18, %v793_v20 }
 0x546   : > { %v803_v10 = vadd.f32 %v1044_v19, %v798_v21 }
 0x548   : > { %804 = vst [vmem:[%s397_s18] sm:$0xff] %v803_v10 }
 0x54b   : > { %v795_v22 = vpop.f32.mrf.mxu1 }
 0x54c PF: > { %s18_s26 = sadd.s32 1, %s1117_s26   ;;  %s1284_s24 = smov %s1113_s25 }
 0x54d   : > { %p15_p8 = scmp.ge.s32.totalorder %s18_s26, 4   ;;  %s1285_s25 = smov %s1287_s28 }
 0x54f   :  { %17 = sbr.rel (!%p15_p8) target bundleno = 2 (0x2), region = 95 }
 0x554   :  { %830 = vsyncpa [#allocation4], 1 }
 0x555   :  { %832 = vsyncpa [#allocation4 + $0x1], 1 }

// kernel: decoder_forward.15
= control target key start
LH: loop header
LB: loop body
LE: loop exit
PB: predicated region body
PF: predicated region fallthrough
CT: control target
= control target key end

     0   :  { %s391_s1 = inlined_call_operand.vmem [shape: bf16[128,256], index: 1, kind: input, shape index: {}]   ;;  %s392_s0 = inlined_call_operand.vmem [shape: f32[16,128], index: 0, kind: input, shape index: {}]   ;;  %s393_s2 = inlined_call_operand.vmem [shape: f32[1,256], index: 2, kind: input, shape index: {}]   ;;  %s394_s3 = inlined_call_operand.vmem [shape: bf16[16,128], index: 3, kind: output, shape index: {0}]   ;;  %s395_s4 = inlined_call_operand.vmem [shape: bf16[16,128], index: 4, kind: output, shape index: {1}]  }
   0x1   :  { %v223_v0 = vld [vmem:[%s391_s1 + $0x70] sm:$0xf]  ;;  %v244_v1 = vld [vmem:[%s391_s1 + $0x74] sm:$0xf0]  ;;  %v243_v2 = vld [vmem:[%s391_s1 + $0x74] sm:$0xf] }
   0x2   :  { %v224_v3 = vor.u32 %v244_v1, %v223_v0  ;;  %v225_v4 = vld [vmem:[%s391_s1 + $0x78] sm:$0xf0]  ;;  %v215_v5 = vld [vmem:[%s391_s1 + $0x60] sm:$0xf]  ;;  %v242_v6 = vld [vmem:[%s391_s1 + $0x64] sm:$0xf0] }
   0x3   :  { %v228_v7 = vor.u32 %v243_v2, %v225_v4  ;;  %v241_v8 = vld [vmem:[%s391_s1 + $0x64] sm:$0xf]  ;;  %v217_v9 = vld [vmem:[%s391_s1 + $0x68] sm:$0xf0]  ;;  %v216_v10 = vor.u32 %v242_v6, %v215_v5  ;;  %v207_v12 = vld [vmem:[%s391_s1 + $0x50] sm:$0xf] }
   0x4   :  { %121 = vmatpush.bf16.msra.mxu0 %v224_v3  ;;  %v220_v11 = vor.u32 %v241_v8, %v217_v9  ;;  %v240_v13 = vld [vmem:[%s391_s1 + $0x54] sm:$0xf0]  ;;  %v239_v14 = vld [vmem:[%s391_s1 + $0x54] sm:$0xf]  ;;  %v209_v15 = vld [vmem:[%s391_s1 + $0x58] sm:$0xf0] }
   0x5   :  { %135 = vmatpush.bf16.msra.mxu1 %v228_v7  ;;  %v208_v16 = vor.u32 %v240_v13, %v207_v12  ;;  %v212_v17 = vor.u32 %v239_v14, %v209_v15  ;;  %v199_v18 = vld [vmem:[%s391_s1 + $0x40] sm:$0xf]  ;;  %v238_v19 = vld [vmem:[%s391_s1 + $0x44] sm:$0xf0]  ;;  %v237_v20 = vld [vmem:[%s391_s1 + $0x44] sm:$0xf] }
   0x6   :  { %v201_v21 = vld [vmem:[%s391_s1 + $0x48] sm:$0xf0]  ;;  %v200_v22 = vor.u32 %v238_v19, %v199_v18  ;;  %v191_v24 = vld [vmem:[%s391_s1 + $0x30] sm:$0xf]  ;;  %v236_v25 = vld [vmem:[%s391_s1 + $0x34] sm:$0xf0] }
   0x7   :  { %v204_v23 = vor.u32 %v237_v20, %v201_v21  ;;  %v235_v26 = vld [vmem:[%s391_s1 + $0x34] sm:$0xf]  ;;  %v193_v27 = vld [vmem:[%s391_s1 + $0x38] sm:$0xf0]  ;;  %v192_v28 = vor.u32 %v236_v25, %v191_v24  ;;  %v183_v30 = vld [vmem:[%s391_s1 + $0x20] sm:$0xf] }
   0x8   :  { %122 = vmatpush.bf16.msra.mxu0 %v216_v10  ;;  %v196_v29 = vor.u32 %v235_v26, %v193_v27  ;;  %v234_v31 = vld [vmem:[%s391_s1 + $0x24] sm:$0xf0]  ;;  %v233_v32 = vld [vmem:[%s391_s1 + $0x24] sm:$0xf]  ;;  %v185_v33 = vld [vmem:[%s391_s1 + $0x28] sm:$0xf0] }
   0x9   :  { %136 = vmatpush.bf16.msra.mxu1 %v220_v11  ;;  %v184_v34 = vor.u32 %v234_v31, %v183_v30  ;;  %v188_v35 = vor.u32 %v233_v32, %v185_v33  ;;  %v175_v36 = vld [vmem:[%s391_s1 + $0x10] sm:$0xf]  ;;  %v232_v37 = vld [vmem:[%s391_s1 + $0x14] sm:$0xf0]  ;;  %v231_v38 = vld [vmem:[%s391_s1 + $0x14] sm:$0xf] }
   0xa   :  { %v177_v39 = vld [vmem:[%s391_s1 + $0x18] sm:$0xf0]  ;;  %v176_v40 = vor.u32 %v232_v37, %v175_v36  ;;  %v167_v42 = vld [vmem:[%s391_s1] sm:$0xf]  ;;  %v230_v43 = vld [vmem:[%s391_s1 + $0x4] sm:$0xf0] }
   0xb   :  { %v180_v41 = vor.u32 %v231_v38, %v177_v39  ;;  %v229_v44 = vld [vmem:[%s391_s1 + $0x4] sm:$0xf]  ;;  %v169_v45 = vld [vmem:[%s391_s1 + $0x8] sm:$0xf0]  ;;  %v168_v46 = vor.u32 %v230_v43, %v167_v42  ;;  %v35_v53 = vld [vmem:[%s393_s2] sm:$0x3] }
   0xc   :  { %123 = vmatpush.bf16.msra.mxu0 %v208_v16  ;;  %v16_v47 = vld [vmem:[%s392_s0] sm:$0xff]  ;;  %v17_v48 = vld [vmem:[%s392_s0 + $0x8] sm:$0xff]  ;;  %v172_v49 = vor.u32 %v229_v44, %v169_v45  ;;  %v37_v54 = vperm.slane %v35_v53, 0  ;;  %v38_v55 = vperm.slane %v35_v53, 1 }
   0xd   :  { %137 = vmatpush.bf16.msra.mxu1 %v212_v17  ;;  %v18_v50 = vpack.c.bf16 %v17_v48, %v16_v47 }
  0x10   :  { %124 = vmatpush.bf16.msra.mxu0 %v200_v22 }
  0x11   :  { %138 = vmatpush.bf16.msra.mxu1 %v204_v23 }
  0x14   :  { %125 = vmatpush.bf16.msra.mxu0 %v192_v28 }
  0x15   :  { %139 = vmatpush.bf16.msra.mxu1 %v196_v29 }
  0x18   :  { %126 = vmatpush.bf16.msra.mxu0 %v184_v34 }
  0x19   :  { %140 = vmatpush.bf16.msra.mxu1 %v188_v35 }
  0x1c   :  { %127 = vmatpush.bf16.msra.mxu0 %v176_v40 }
  0x1d   :  { %141 = vmatpush.bf16.msra.mxu1 %v180_v41 }
  0x20   :  { %128 = vmatpush.bf16.msra.mxu0 %v168_v46 }
  0x21   :  { %142 = vmatpush.bf16.msra.mxu1 %v172_v49 }
  0x23   :  { %129 = vmatmul.bf16.vlgmr.msra.gmra.mxu0 %v18_v50 }
  0x24   :  { %143 = vmatmul.bf16.vlgmr.msra.gmra.mxu1 %v18_v50 }
  0xa0   :  { %v130_v51 = vpop.f32.mrf.mxu0 }
  0xa1   :  { %v144_v52 = vpop.f32.mrf.mxu1  ;;  %v131_v57 = vadd.f32 %v130_v51, %v37_v54 }
  0xa2   :  { %v145_v60 = vadd.f32 %v144_v52, %v38_v55 }
  0xa8   :  { %v132_v56 = vpop.f32.mrf.mxu0 }
  0xa9   :  { %v133_v58 = vadd.f32 %v132_v56, %v37_v54  ;;  %v146_v59 = vpop.f32.mrf.mxu1 }
  0xaa   :  { %v147_v61 = vadd.f32 %v146_v59, %v38_v55 }
  0xab   :  { %v248_v62 = vpack.c.bf16 %v133_v58, %v131_v57 }
  0xac   :  { %v253_v63 = vpack.c.bf16 %v147_v61, %v145_v60 }
  0xad   :  { %249 = vst [vmem:[%s394_s3] sm:$0xff] %v248_v62  }
  0xae   :  { %254 = vst [vmem:[%s395_s4] sm:$0xff] %v253_v63  }

// kernel: decoder_forward.14
= control target key start
LH: loop header
LB: loop body
LE: loop exit
PB: predicated region body
PF: predicated region fallthrough
CT: control target
= control target key end

     0   :  { %10 = vsyncpa [#allocation3], 0  ;;  %s273_s21 = smov [#allocation2]   ;;  %s274_s23 = smov 64   ;;  %s328_s0 = inlined_call_operand.vmem [shape: f32[16,128], index: 0, kind: input, shape index: {}]   ;;  %s329_s1 = inlined_call_operand.vmem [shape: f32[1,128], index: 1, kind: input, shape index: {}]   ;;  %s330_s2 = inlined_call_operand.vmem [shape: f32[1,128], index: 2, kind: input, shape index: {}]   ;;  %s331_s3 = inlined_call_operand.hbm [shape: bf16[128,128], index: 3, kind: input, shape index: {}]   ;;  %s332_s4 = inlined_call_operand.vmem [shape: f32[1,128], index: 4, kind: input, shape index: {}]   ;;  %s333_s5 = inlined_call_operand.vmem [shape: bf16[16,128], index: 5, kind: output, shape index: {}]  }
   0x1   :  { %s21_s20 = sshll.u32 %s331_s3, 4  ;;  %s23_s22 = sshll.u32 %s273_s21, 4  ;;  %s22_s20 = int_to_ptr.hbm [resolvable:$true] %s21_s20  ;;  %s24_s22 = int_to_ptr.vmem [resolvable:$true] %s23_s22 }
   0x2   :  { %s275_s24 = smov 4  }
   0x3   :  { %29 = dma.hbm_to_vmem [thread:$0]  %s22_s20, 1024, %s24_s22, [#allocation3], %s274_s23, %s274_s23, %s275_s24  }
   0x4   :  { %271 = dma.done.wait [#allocation3], 1024  }
   0x5   :  { %272 = vsyncadd [#allocation3], 4294966272  ;;  %v36_v0 = vld [vmem:[%s328_s0] sm:$0xff]  ;;  %v37_v1 = vld [vmem:[%s328_s0 + $0x8] sm:$0xff]  ;;  %v276_v2 = vmov 128.0  }
   0x6   :  { %38 = vadd.xlane.f32.xlu0 %v36_v0  ;;  %241 = vrcp.f32 %v276_v2  ;;  %v228_v17 = vld [vmem:[#allocation2 + $0x38] sm:$0xff]  ;;  %v227_v18 = vld [vmem:[#allocation2 + $0x30] sm:$0xff]  ;;  %v226_v19 = vld [vmem:[#allocation2 + $0x28] sm:$0xff] }
   0x7   :  { %166 = vmatpush.bf16.msra.mxu0 %v228_v17  ;;  %v225_v20 = vld [vmem:[#allocation2 + $0x20] sm:$0xff]  ;;  %v224_v21 = vld [vmem:[#allocation2 + $0x18] sm:$0xff]  ;;  %v223_v22 = vld [vmem:[#allocation2 + $0x10] sm:$0xff] }
   0x8   :  { %v222_v23 = vld [vmem:[#allocation2 + $0x8] sm:$0xff]  ;;  %v221_v25 = vld [vmem:[#allocation2] sm:$0xff] }
   0x9   :  { %v238_v44 = vld [vmem:[%s329_s1] ss:$0 sm:$0xff] }
   0xa   :  { %v239_v49 = vld [vmem:[%s330_s2] ss:$0 sm:$0xff] }
   0xb   :  { %167 = vmatpush.bf16.msra.mxu0 %v227_v18  ;;  %v240_v55 = vld [vmem:[%s332_s4] ss:$0 sm:$0xff] }
   0xc   :  { %v242_v3 = vpop.eup %241 }
   0xd   :  { %v43_v4 = vmul.f32 128.0, %v242_v3  ;;  %vm47_vm0 = vweird.f32 %v242_v3 }
   0xe   :  { %40 = vadd.xlane.f32.xlu0 %v37_v1 }
   0xf   :  { %v44_v5 = vsub.f32 1.0, %v43_v4  ;;  %168 = vmatpush.bf16.msra.mxu0 %v226_v19 }
  0x11   :  { %v45_v6 = vmul.f32 %v242_v3, %v44_v5 }
  0x13   :  { %v46_v7 = vadd.f32 %v242_v3, %v45_v6  ;;  %169 = vmatpush.bf16.msra.mxu0 %v225_v20 }
  0x15   :  { %v48_v8 = vsel %vm47_vm0, %v242_v3, %v46_v7 }
  0x17   :  { %170 = vmatpush.bf16.msra.mxu0 %v224_v21 }
  0x1b   :  { %171 = vmatpush.bf16.msra.mxu0 %v223_v22 }
  0x1f   :  { %172 = vmatpush.bf16.msra.mxu0 %v222_v23 }
  0x23   :  { %173 = vmatpush.bf16.msra.mxu0 %v221_v25 }
  0x79   :  { %v39_v9 = vpop.xlane.xlu0 %38 }
  0x7a   :  { %v49_v10 = vmul.f32 %v48_v8, %v39_v9 }
  0x7c   :  { %v51_v11 = vsub.f32 %v36_v0, %v49_v10 }
  0x7e   :  { %v53_v12 = vmul.f32 %v51_v11, %v51_v11 }
  0x80   :  { %55 = vadd.xlane.f32.xlu1 %v53_v12 }
  0x81   :  { %v41_v13 = vpop.xlane.xlu0 %40 }
  0x82   :  { %v50_v14 = vmul.f32 %v48_v8, %v41_v13 }
  0x84   :  { %v52_v15 = vsub.f32 %v37_v1, %v50_v14 }
  0x86   :  { %v54_v16 = vmul.f32 %v52_v15, %v52_v15 }
  0x88   :  { %57 = vadd.xlane.f32.xlu1 %v54_v16 }
  0xf3   :  { %v56_v24 = vpop.xlane.xlu1 %55 }
  0xf4   :  { %v59_v26 = vmul.f32 %v56_v24, %v48_v8 }
  0xf6   :  { %v61_v27 = vadd.f32 1e-05, %v59_v26 }
  0xf8   :  { %243 = vrsqrt.f32 %v61_v27  ;;  %vm69_vm2 = vweird.f32 %v61_v27 }
  0xfb   :  { %v58_v28 = vpop.xlane.xlu1 %57 }
  0xfc   :  { %v60_v29 = vmul.f32 %v58_v28, %v48_v8 }
  0xfe   :  { %v244_v30 = vpop.eup %243  ;;  %v62_v31 = vadd.f32 1e-05, %v60_v29 }
  0xff   :  { %v64_v32 = vmul.f32 %v244_v30, %v61_v27  ;;  %vm70_vm1 = vweird.f32 %v244_v30 }
 0x100   :  { %245 = vrsqrt.f32 %v62_v31  ;;  %vm71_vm3 = vmor %vm69_vm2, %vm70_vm1  ;;  %vm79_vm5 = vweird.f32 %v62_v31 }
 0x101   :  { %v65_v33 = vmul.f32 %v244_v30, %v64_v32 }
 0x103   :  { %v66_v34 = vmul.f32 0.5, %v65_v33 }
 0x105   :  { %v67_v35 = vsub.f32 1.5, %v66_v34 }
 0x106   :  { %v246_v36 = vpop.eup %245 }
 0x107   :  { %v68_v37 = vmul.f32 %v244_v30, %v67_v35  ;;  %v74_v38 = vmul.f32 %v246_v36, %v62_v31  ;;  %vm80_vm4 = vweird.f32 %v246_v36 }
 0x108   :  { %vm81_vm6 = vmor %vm79_vm5, %vm80_vm4 }
 0x109   :  { %v75_v39 = vmul.f32 %v246_v36, %v74_v38  ;;  %v72_v41 = vsel %vm71_vm3, %v244_v30, %v68_v37 }
 0x10a   :  { %v83_v43 = vmul.f32 %v72_v41, %v51_v11 }
 0x10b   :  { %v76_v40 = vmul.f32 0.5, %v75_v39 }
 0x10c   :  { %v89_v48 = vmul.f32 %v238_v44, %v83_v43 }
 0x10d   :  { %v77_v42 = vsub.f32 1.5, %v76_v40 }
 0x10e   :  { %v95_v51 = vadd.f32 %v239_v49, %v89_v48 }
 0x10f   :  { %v78_v45 = vmul.f32 %v246_v36, %v77_v42 }
 0x111   :  { %v82_v46 = vsel %vm81_vm6, %v246_v36, %v78_v45 }
 0x112   :  { %v84_v47 = vmul.f32 %v82_v46, %v52_v15 }
 0x114   :  { %v90_v50 = vmul.f32 %v238_v44, %v84_v47 }
 0x116   :  { %v96_v52 = vadd.f32 %v239_v49, %v90_v50 }
 0x118   :  { %v97_v53 = vpack.c.bf16 %v96_v52, %v95_v51 }
 0x11a   :  { %174 = vmatmul.bf16.vlgmr.msra.gmra.mxu0 %v97_v53 }
 0x197   :  { %v175_v54 = vpop.f32.mrf.mxu0 }
 0x198   :  { %v176_v57 = vadd.f32 %v240_v55, %v175_v54 }
 0x19f   :  { %v177_v56 = vpop.f32.mrf.mxu0 }
 0x1a0   :  { %v178_v58 = vadd.f32 %v240_v55, %v177_v56 }
 0x1a2   :  { %v232_v59 = vpack.c.bf16 %v178_v58, %v176_v57 }
 0x1a4   :  { %233 = vst [vmem:[%s333_s5] sm:$0xff] %v232_v59  }
 0x1a5   :  { %188 = vsyncpa [#allocation3], 1 }

// kernel: decoder_forward.21
= control target key start
LH: loop header
LB: loop body
LE: loop exit
PB: predicated region body
PF: predicated region fallthrough
CT: control target
= control target key end

     0   :  { %10 = vsyncpa [#allocation3], 0  ;;  %s301_s18 = smov [#allocation2]   ;;  %s302_s20 = smov 128   ;;  %s347_s0 = inlined_call_operand.vmem [shape: f32[16,128], index: 0, kind: input, shape index: {}]   ;;  %s348_s1 = inlined_call_operand.hbm [shape: bf16[128,256], index: 1, kind: input, shape index: {}]   ;;  %s349_s2 = inlined_call_operand.vmem [shape: f32[1,256], index: 2, kind: input, shape index: {}]   ;;  %s350_s3 = inlined_call_operand.vmem [shape: bf16[16,128], index: 3, kind: output, shape index: {0}]   ;;  %s351_s4 = inlined_call_operand.vmem [shape: bf16[16,128], index: 4, kind: output, shape index: {1}]  }
   0x1   :  { %s17_s17 = sshll.u32 %s348_s1, 4  ;;  %s19_s19 = sshll.u32 %s301_s18, 4  ;;  %s18_s17 = int_to_ptr.hbm [resolvable:$true] %s17_s17  ;;  %s20_s19 = int_to_ptr.vmem [resolvable:$true] %s19_s19 }
   0x2   :  { %s303_s21 = smov 8  }
   0x3   :  { %25 = dma.hbm_to_vmem [thread:$0]  %s18_s17, 2048, %s20_s19, [#allocation3], %s302_s20, %s302_s20, %s303_s21  }
   0x4   :  { %299 = dma.done.wait [#allocation3], 2048  }
   0x5   :  { %300 = vsyncadd [#allocation3], 4294965248  ;;  %v240_v0 = vld [vmem:[#allocation2 + $0x70] sm:$0xf]  ;;  %v261_v1 = vld [vmem:[#allocation2 + $0x74] sm:$0xf0] }
   0x6   :  { %v260_v2 = vld [vmem:[#allocation2 + $0x74] sm:$0xf]  ;;  %v241_v3 = vor.u32 %v261_v1, %v240_v0  ;;  %v242_v4 = vld [vmem:[#allocation2 + $0x78] sm:$0xf0]  ;;  %v232_v5 = vld [vmem:[#allocation2 + $0x60] sm:$0xf] }
   0x7   :  { %v259_v6 = vld [vmem:[#allocation2 + $0x64] sm:$0xf0]  ;;  %v245_v7 = vor.u32 %v260_v2, %v242_v4  ;;  %v258_v8 = vld [vmem:[#allocation2 + $0x64] sm:$0xf]  ;;  %v234_v9 = vld [vmem:[#allocation2 + $0x68] sm:$0xf0] }
   0x8   :  { %137 = vmatpush.bf16.msra.mxu0 %v241_v3  ;;  %v233_v10 = vor.u32 %v259_v6, %v232_v5  ;;  %v237_v11 = vor.u32 %v258_v8, %v234_v9  ;;  %v224_v12 = vld [vmem:[#allocation2 + $0x50] sm:$0xf]  ;;  %v257_v13 = vld [vmem:[#allocation2 + $0x54] sm:$0xf0]  ;;  %v256_v14 = vld [vmem:[#allocation2 + $0x54] sm:$0xf] }
   0x9   :  { %151 = vmatpush.bf16.msra.mxu1 %v245_v7  ;;  %v226_v15 = vld [vmem:[#allocation2 + $0x58] sm:$0xf0]  ;;  %v225_v16 = vor.u32 %v257_v13, %v224_v12  ;;  %v216_v18 = vld [vmem:[#allocation2 + $0x40] sm:$0xf]  ;;  %v255_v19 = vld [vmem:[#allocation2 + $0x44] sm:$0xf0] }
   0xa   :  { %v229_v17 = vor.u32 %v256_v14, %v226_v15  ;;  %v254_v20 = vld [vmem:[#allocation2 + $0x44] sm:$0xf]  ;;  %v218_v21 = vld [vmem:[#allocation2 + $0x48] sm:$0xf0]  ;;  %v217_v22 = vor.u32 %v255_v19, %v216_v18  ;;  %v208_v24 = vld [vmem:[#allocation2 + $0x30] sm:$0xf] }
   0xb   :  { %v221_v23 = vor.u32 %v254_v20, %v218_v21  ;;  %v253_v25 = vld [vmem:[#allocation2 + $0x34] sm:$0xf0]  ;;  %v252_v26 = vld [vmem:[#allocation2 + $0x34] sm:$0xf]  ;;  %v210_v27 = vld [vmem:[#allocation2 + $0x38] sm:$0xf0] }
   0xc   :  { %138 = vmatpush.bf16.msra.mxu0 %v233_v10  ;;  %v209_v28 = vor.u32 %v253_v25, %v208_v24  ;;  %v213_v29 = vor.u32 %v252_v26, %v210_v27  ;;  %v200_v30 = vld [vmem:[#allocation2 + $0x20] sm:$0xf]  ;;  %v251_v31 = vld [vmem:[#allocation2 + $0x24] sm:$0xf0]  ;;  %v250_v32 = vld [vmem:[#allocation2 + $0x24] sm:$0xf] }
   0xd   :  { %152 = vmatpush.bf16.msra.mxu1 %v237_v11  ;;  %v202_v33 = vld [vmem:[#allocation2 + $0x28] sm:$0xf0]  ;;  %v201_v34 = vor.u32 %v251_v31, %v200_v30  ;;  %v192_v36 = vld [vmem:[#allocation2 + $0x10] sm:$0xf]  ;;  %v249_v37 = vld [vmem:[#allocation2 + $0x14] sm:$0xf0] }
   0xe   :  { %v205_v35 = vor.u32 %v250_v32, %v202_v33  ;;  %v248_v38 = vld [vmem:[#allocation2 + $0x14] sm:$0xf]  ;;  %v194_v39 = vld [vmem:[#allocation2 + $0x18] sm:$0xf0]  ;;  %v193_v40 = vor.u32 %v249_v37, %v192_v36  ;;  %v184_v42 = vld [vmem:[#allocation2] sm:$0xf] }
   0xf   :  { %v197_v41 = vor.u32 %v248_v38, %v194_v39  ;;  %v247_v43 = vld [vmem:[#allocation2 + $0x4] sm:$0xf0]  ;;  %v246_v44 = vld [vmem:[#allocation2 + $0x4] sm:$0xf]  ;;  %v186_v45 = vld [vmem:[#allocation2 + $0x8] sm:$0xf0] }
  0x10   :  { %139 = vmatpush.bf16.msra.mxu0 %v225_v16  ;;  %v185_v46 = vor.u32 %v247_v43, %v184_v42  ;;  %v32_v47 = vld [vmem:[%s347_s0] sm:$0xff]  ;;  %v33_v48 = vld [vmem:[%s347_s0 + $0x8] sm:$0xff]  ;;  %v189_v49 = vor.u32 %v246_v44, %v186_v45 }
  0x11   :  { %153 = vmatpush.bf16.msra.mxu1 %v229_v17  ;;  %v34_v50 = vpack.c.bf16 %v33_v48, %v32_v47  ;;  %v51_v53 = vld [vmem:[%s349_s2] sm:$0x3] }
  0x12   :  { %v53_v54 = vperm.slane %v51_v53, 0  ;;  %v54_v55 = vperm.slane %v51_v53, 1 }
  0x14   :  { %140 = vmatpush.bf16.msra.mxu0 %v217_v22 }
  0x15   :  { %154 = vmatpush.bf16.msra.mxu1 %v221_v23 }
  0x18   :  { %141 = vmatpush.bf16.msra.mxu0 %v209_v28 }
  0x19   :  { %155 = vmatpush.bf16.msra.mxu1 %v213_v29 }
  0x1c   :  { %142 = vmatpush.bf16.msra.mxu0 %v201_v34 }
  0x1d   :  { %156 = vmatpush.bf16.msra.mxu1 %v205_v35 }
  0x20   :  { %143 = vmatpush.bf16.msra.mxu0 %v193_v40 }
  0x21   :  { %157 = vmatpush.bf16.msra.mxu1 %v197_v41 }
  0x24   :  { %144 = vmatpush.bf16.msra.mxu0 %v185_v46 }
  0x25   :  { %158 = vmatpush.bf16.msra.mxu1 %v189_v49 }
  0x27   :  { %145 = vmatmul.bf16.vlgmr.msra.gmra.mxu0 %v34_v50 }
  0x28   :  { %159 = vmatmul.bf16.vlgmr.msra.gmra.mxu1 %v34_v50 }
  0xa4   :  { %v146_v51 = vpop.f32.mrf.mxu0 }
  0xa5   :  { %v160_v52 = vpop.f32.mrf.mxu1  ;;  %v147_v57 = vadd.f32 %v146_v51, %v53_v54 }
  0xa6   :  { %v161_v60 = vadd.f32 %v160_v52, %v54_v55 }
  0xac   :  { %v148_v56 = vpop.f32.mrf.mxu0 }
  0xad   :  { %v149_v58 = vadd.f32 %v148_v56, %v53_v54  ;;  %v162_v59 = vpop.f32.mrf.mxu1 }
  0xae   :  { %v163_v61 = vadd.f32 %v162_v59, %v54_v55 }
  0xaf   :  { %v265_v62 = vpack.c.bf16 %v149_v58, %v147_v57 }
  0xb0   :  { %v270_v63 = vpack.c.bf16 %v163_v61, %v161_v60 }
  0xb1   :  { %266 = vst [vmem:[%s350_s3] sm:$0xff] %v265_v62  }
  0xb2   :  { %271 = vst [vmem:[%s351_s4] sm:$0xff] %v270_v63  }
  0xb3   :  { %181 = vsyncpa [#allocation3], 1 }

// kernel: decoder_forward.16
= control target key start
LH: loop header
LB: loop body
LE: loop exit
PB: predicated region body
PF: predicated region fallthrough
CT: control target
= control target key end

     0   :  { %12 = vsyncpa [#allocation4], 0  ;;  %s1158_s24 = smov 0   ;;  %s1160_s25 = smov 0   ;;  %s1267_s0 = inlined_call_operand.vmem [shape: bf16[2,8,128], index: 0, kind: input, shape index: {}]   ;;  %s1268_s1 = inlined_call_operand.vmem [shape: bf16[2,8,128], index: 1, kind: input, shape index: {}]   ;;  %s1269_s2 = inlined_call_operand.vmem [shape: bf16[2,8,128], index: 2, kind: input, shape index: {}]   ;;  %s1270_s3 = inlined_call_operand.vmem [shape: s32[2,1,8], index: 3, kind: input, shape index: {}]   ;;  %s1271_s4 = inlined_call_operand.hbm [shape: bf16[128,128], index: 4, kind: input, shape index: {}]   ;;  %s1272_s5 = inlined_call_operand.vmem [shape: f32[1,128], index: 5, kind: input, shape index: {}]   ;;  %s1273_s6 = inlined_call_operand.vmem [shape: f32[2,8,128], index: 6, kind: input, shape index: {}]   ;;  %s1274_s7 = inlined_call_operand.vmem [shape: f32[2,8,128], index: 7, kind: output, shape index: {}]  }
   0x1   :  { %s1162_s26 = smov 0  }
   0x2 LB: > { %s931_s27 = sadd.s32 4294967295, %s1108_s26   ;;  %s30_s28 = sadd.s32 1, %s1104_s25  ;;  %s1108_s26 = sphi %s1162_s26, %s18_s26   ;;  %s1104_s25 = sphi %s1160_s25, %s1276_s25   ;;  %s1100_s24 = sphi %s1158_s24, %s1275_s24  }
   0x3   : > { %p32_p0 = scmp.ge.s32.totalorder %s30_s28, 2  ;;  %p933_p1 = scmp.ge.s32.totalorder %s1108_s26, 1 }
   0x4   : > { %p239_p2 = scmp.lt.s32.totalorder %s1108_s26, 3  ;;  %p1001_p4 = scmp.eq.s32.totalorder %s931_s27, 0 }
   0x5   : > { %s1278_s28 = smov (%p32_p0, %s30_s28), 0  ;;  %s250_s8 = sshll.u32 %s1271_s4, 4  ;;  %s251_s8 = int_to_ptr.hbm [resolvable:$true] %s250_s8 }
   0x6   : > { %p240_p3 = pnand %p933_p1, %p239_p2  ;;  %s1110_s9 = smov [#allocation3]  }
   0x7   : > { %s252_s10 = sshll.u32 %s1110_s9, 4  ;;  %s1111_s11 = smov 64   ;;  %s253_s10 = int_to_ptr.vmem [resolvable:$true] %s252_s10 }
   0x8   : > { %p997_p5 = pneg %p240_p3  ;;  %s1112_s12 = smov 4  }
   0x9   : > { %311 = sbr.rel (%p240_p3) target bundleno = 1356 (0x54c), region = 48 }
   0xa   : > { %p998_p6 = pnand %p1001_p4, %p997_p5 }
   0xc   : > { %1000 = dma.hbm_to_vmem [thread:$0]  (!%p998_p6), %s251_s8, 1024, %s253_s10, [#allocation4], %s1111_s11, %s1111_s11, %s1112_s12  }
   0xe   : > { %1095 = dma.done.wait (%p1001_p4), [#allocation4], 1024  }
   0xf   : > { %1097 = vsyncadd (%p1001_p4), [#allocation4], 4294966272  ;;  %p366_p7 = scmp.lt.s32.totalorder %s1100_s24, 1  ;;  %s1113_s20 = smov 96   ;;  %vm408_vm0 = vcmask 261120   ;;  %v1115_v14 = vmov 0  }
  0x10   : > { %s1114_s21 = smov 32   ;;  %s1116_s9 = smov 64   ;;  %v1117_v17 = vmov -1e+09   ;;  %vm428_vm3 = vcmask 64512   ;;  %vm457_vm4 = vcmask 1043456  }
  0x11   : > { %s1280_s24 = smov (!%p366_p7, %s1100_s24), 1 }
  0x12   : > { %s938_s13 = sshll.u32 %s1280_s24, 2  ;;  %s383_s8 = scalar_lea.vmem %s1270_s3, %s1280_s24 }
  0x13   : > { %s376_s16 = scalar_lea.vmem %s1268_s1, %s938_s13  ;;  %s372_s19 = scalar_lea.vmem %s1267_s0, %s938_s13  ;;  %v402_v13 = vld [vmem:[%s383_s8] sm:$0x1] }
  0x14   : > { %v400_v0 = vld [vmem:[%s376_s16] sm:$0xf]  ;;  %s380_s27 = scalar_lea.vmem %s1269_s2, %s938_s13  ;;  %vm403_vm1 = vcmp.gt.s32.totalorder %v402_v13, 0  ;;  %s941_s10 = sshll.u32 %s1280_s24, 3 }
  0x15   : > { %v481_v1 = vunpack.c.l.b16 %v400_v0  ;;  %v399_v2 = vld [vmem:[%s372_s19] sm:$0xf]  ;;  %v413_v9 = vsel %vm408_vm0, %v400_v0, 0  ;;  %v404_v15 = vsel %vm403_vm1, 1, %v1115_v14  ;;  %s390_s13 = scalar_lea.vmem %s1273_s6, %s941_s10  ;;  %s397_s18 = scalar_lea.vmem %s1274_s7, %s941_s10 }
  0x16   : > { %v476_v4 = vunpack.c.l.b16 %v399_v2  ;;  %v1198_v10 = vld [vmem:[%s380_s27] sm:$0xf]  ;;  %422 = vmatpush.bf16.xpose.msra.mxu0 %v413_v9  ;;  %v405_v16 = vperm.slane %v404_v15, 0 }
  0x17   : > { %v482_v3 = vpack.c.b16 %v481_v1, %v481_v1  ;;  %v530_v11 = vunpack.c.l.b16 %v1198_v10 }
  0x18   : > { %v477_v5 = vpack.c.b16 %v476_v4, %v476_v4  ;;  %vm406_vm2 = vcmp.eq.s32.totalorder %v405_v16, 1 }
  0x19   : > { %483 = vrot.lane.b32.xlu0 %v482_v3, %s1113_s20  ;;  %v1205_v12 = vpack.c.b16 %v530_v11, %v530_v11  ;;  %v1212_v18 = vsel %vm406_vm2, 0.0, %v1117_v17  ;;  %vm557_vm2 = vcmask 523520  }
  0x1b   : > { %532 = vrot.lane.b32.xlu2 %v1205_v12, %s1113_s20 }
  0x1d   : > { %943 = vmatmul.msk.bf16.vlgmr.msra.gmra.mxu0 %vm408_vm0, %v399_v2 }
  0x21   : > { %478 = vrot.lane.b32.xlu0 %v477_v5, %s1113_s20 }
  0x23   : > { %561 = vrot.lane.b32.xlu2 %v482_v3, %s1116_s9 }
  0x29   : > { %636 = vrot.lane.b32.xlu0 %v482_v3, %s1114_s21 }
  0x2b   : > { %634 = vrot.lane.b32.xlu2 %v477_v5, %s1114_s21 }
  0x75   : > { %v533_v23 = vpop.permute.xlu2 %532 }
  0x76   : > { %v538_v37 = vsel %vm457_vm4, %v533_v23, 0 }
  0x77   : > { %547 = vmatpush.bf16.msra.mxu3 %v538_v37 }
  0x7d   : > { %v562_v27 = vpop.permute.xlu2 %561 }
  0x7e   : > { %v567_v38 = vsel %vm408_vm0, %v562_v27, 0 }
  0x7f   : > { %576 = vmatpush.bf16.xpose.msrb.mxu3 %v567_v38 }
  0x85   : > { %v635_v33 = vpop.permute.xlu2 %634 }
  0x8b   : > { %v484_v6 = vpop.permute.xlu0 %483 }
  0x8c   : > { %v489_v7 = vsel %vm408_vm0, %v484_v6, 0 }
  0x8d   : > { %498 = vmatpush.bf16.xpose.msra.mxu2 %v489_v7  ;;  %v459_v7 = vsel %vm457_vm4, %v1198_v10, 0 }
  0x8e   : > { %468 = vmatpush.bf16.msra.mxu1 %v459_v7  ;;  %v986_v7 = vld [vmem:[#allocation3 + $0x8] sm:$0xff] }
  0x93   : > { %v479_v8 = vpop.permute.xlu0 %478 }
  0x94   : > { %945 = vmatmul.msk.bf16.vlgmr.msra.gmra.mxu2 %vm408_vm0, %v479_v8 }
  0x9a   : > { %v424_v30 = vpop.f32.mrf.mxu0 }
  0x9b   : > { %v637_v28 = vpop.permute.xlu0 %636  ;;  %v425_v35 = vadd.f32 %v424_v30, %v1212_v18 }
  0x9c   : > { %v642_v29 = vsel %vm408_vm0, %v637_v28, 0 }
  0x9d   : > { %651 = vmatpush.bf16.xpose.msrb.mxu0 %v642_v29  ;;  %v429_v36 = vsel %vm428_vm3, %v425_v35, -inf }
  0xa2   : > { %v426_v34 = vpop.f32.mrf.mxu0 }
  0xa4   : > { %949 = vmatmul.msk.bf16.vlgmr.msrb.gmra.mxu0 %vm408_vm0, %v635_v33 }
 0x117   : > { %v500_v19 = vpop.f32.mrf.mxu2 }
 0x118   : > { %v501_v20 = vadd.f32 %v500_v19, %v1212_v18 }
 0x11a   : > { %v504_v21 = vsel %vm428_vm3, %v501_v20, -inf }
 0x11b   : > { %505 = vmax.xlane.f32.xlu1 %v504_v21 }
 0x11f   : > { %v502_v22 = vpop.f32.mrf.mxu2 }
 0x121   : > { %v653_v46 = vpop.f32.mrf.mxu0 }
 0x122   : > { %v654_v47 = vadd.f32 %v653_v46, %v1212_v18 }
 0x124   : > { %v657_v50 = vsel %vm428_vm3, %v654_v47, -inf }
 0x125   : > { %658 = vmax.xlane.f32.xlu2 %v657_v50 }
 0x129   : > { %v655_v55 = vpop.f32.mrf.mxu0 }
 0x18e   : > { %v506_v24 = vpop.xlane.xlu1 %505 }
 0x18f   : > { %v507_v25 = vsub.f32 %v501_v20, %v506_v24 }
 0x191   : > { %v508_v26 = vmul.f32 1.442695, %v507_v25 }
 0x193   : > { %1036 = vpow2.f32 %v508_v26 }
 0x198   : > { %v659_v63 = vpop.xlane.xlu2 %658 }
 0x199   : > { %v1037_v31 = vpop.eup %1036  ;;  %v660_v1 = vsub.f32 %v654_v47, %v659_v63  ;;  %v992_v63 = vld [vmem:[#allocation3 + $0x38] sm:$0xff] }
 0x19a   : > { %v510_v32 = vsel %vm428_vm3, %v1037_v31, 0.0  ;;  %775 = vmatpush.bf16.msrb.mxu1 %v992_v63 }
 0x19b   : > { %511 = vadd.xlane.f32.xlu1 %v510_v32  ;;  %v661_v2 = vmul.f32 1.442695, %v660_v1  ;;  %v990_v1 = vld [vmem:[#allocation3 + $0x28] sm:$0xff] }
 0x1b4   : > { %559 = vrot.lane.b32.xlu1 %v477_v5, %s1116_s9 }
 0x1de   : > { %430 = vmax.xlane.f32.xlu1 %v429_v36 }
 0x20e   : > { %v512_v39 = vpop.xlane.xlu1 %511 }
 0x20f   : > { %1038 = vrcp.f32 %v512_v39  ;;  %v524_v43 = vand.u32 2147483648, %v512_v39  ;;  %v522_v45 = vand.u32 2147483647, %v512_v39  ;;  %vm518_vm6 = vweird.f32 %v512_v39 }
 0x211   : > { %v525_v49 = vor.u32 1.1754944e-38, %v524_v43  ;;  %vm523_vm8 = vcmp.eq.f32.partialorder %v522_v45, 8.507059e+37 }
 0x215   : > { %v1039_v40 = vpop.eup %1038 }
 0x216   : > { %v514_v41 = vmul.f32 %v1039_v40, %v512_v39  ;;  %vm519_vm5 = vweird.f32 %v1039_v40 }
 0x217   : > { %vm520_vm7 = vmor %vm518_vm6, %vm519_vm5 }
 0x218   : > { %v515_v42 = vsub.f32 1.0, %v514_v41 }
 0x21a   : > { %v516_v44 = vmul.f32 %v1039_v40, %v515_v42 }
 0x21c   : > { %v517_v48 = vadd.f32 %v1039_v40, %v516_v44 }
 0x21e   : > { %v521_v51 = vsel %vm520_vm7, %v1039_v40, %v517_v48 }
 0x21f   : > { %v526_v52 = vsel %vm523_vm8, %v525_v49, %v521_v51 }
 0x220   : > { %v527_v53 = vmul.f32 %v1037_v31, %v526_v52 }
 0x222   : > { %v528_v54 = vpack.c.bf16 %v527_v53, %v527_v53 }
 0x224   : > { %946 = vmatmul.msk.bf16.vlgmr.msra.gmra.mxu3 %vm428_vm3, %v528_v54 }
 0x226   : > { %v560_v56 = vpop.permute.xlu1 %559 }
 0x234   : > { %947 = vmatmul.msk.bf16.vlgmr.msrb.gmra.mxu3 %vm408_vm0, %v560_v56 }
 0x251   : > { %v431_v57 = vpop.xlane.xlu1 %430 }
 0x252   : > { %v432_v58 = vsub.f32 %v425_v35, %v431_v57 }
 0x254   : > { %v433_v59 = vmul.f32 1.442695, %v432_v58 }
 0x256   : > { %1040 = vpow2.f32 %v433_v59 }
 0x257   : > { %1042 = vpow2.f32 %v661_v2  ;;  %v989_v2 = vld [vmem:[#allocation3 + $0x20] sm:$0xff] }
 0x25c   : > { %v1041_v60 = vpop.eup %1040 }
 0x25d   : > { %v435_v61 = vsel %vm428_vm3, %v1041_v60, 0.0  ;;  %v1043_v6 = vpop.eup %1042 }
 0x25e   : > { %436 = vadd.xlane.f32.xlu1 %v435_v61  ;;  %v663_v9 = vsel %vm428_vm3, %v1043_v6, 0.0 }
 0x2a7   : > { %v549_v62 = vpop.f32.mrf.mxu3 }
 0x2a8   : > { %554 = vrot.lane.b32.xlu1 %v549_v62, %s1114_s21 }
 0x2af   : > { %v551_v0 = vpop.f32.mrf.mxu3 }
 0x2b0   : > { %v991_v0 = vld [vmem:[#allocation3 + $0x30] sm:$0xff] }
 0x2b1   : > { %776 = vmatpush.bf16.msrb.mxu1 %v991_v0 }
 0x2b5   : > { %777 = vmatpush.bf16.msrb.mxu1 %v990_v1 }
 0x2b7   : > { %v578_v3 = vpop.f32.mrf.mxu3 }
 0x2b8   : > { %v579_v4 = vadd.f32 %v578_v3, %v1212_v18  ;;  %v988_v3 = vld [vmem:[#allocation3 + $0x18] sm:$0xff] }
 0x2b9   : > { %778 = vmatpush.bf16.msrb.mxu1 %v989_v2 }
 0x2ba   : > { %v582_v5 = vsel %vm428_vm3, %v579_v4, -inf }
 0x2bb   : > { %583 = vmax.xlane.f32.xlu0 %v582_v5 }
 0x2bd   : > { %779 = vmatpush.bf16.msrb.mxu1 %v988_v3 }
 0x2bf   : > { %v580_v8 = vpop.f32.mrf.mxu3 }
 0x2c0   : > { %v985_v8 = vld [vmem:[#allocation3] sm:$0xff] }
 0x2c3   : > { %664 = vadd.xlane.f32.xlu0 %v663_v9 }
 0x2d1   : > { %v437_v11 = vpop.xlane.xlu1 %436 }
 0x2d2   : > { %1044 = vrcp.f32 %v437_v11  ;;  %v449_v15 = vand.u32 2147483648, %v437_v11  ;;  %vm443_vm9 = vweird.f32 %v437_v11  ;;  %v447_v17 = vand.u32 2147483647, %v437_v11 }
 0x2d4   : > { %v450_v10 = vor.u32 1.1754944e-38, %v449_v15  ;;  %vm448_vm12 = vcmp.eq.f32.partialorder %v447_v17, 8.507059e+37  ;;  %v788_v15 = vld [vmem:[%s390_s13] sm:$0xff] }
 0x2d7   : > { %682 = vrot.lane.b32.xlu0 %v1205_v12, %s1114_s21 }
 0x2d8   : > { %v1045_v13 = vpop.eup %1044 }
 0x2d9   : > { %v439_v14 = vmul.f32 %v1045_v13, %v437_v11  ;;  %vm444_vm10 = vweird.f32 %v1045_v13 }
 0x2da   : > { %vm445_vm11 = vmor %vm443_vm9, %vm444_vm10 }
 0x2db   : > { %v440_v16 = vsub.f32 1.0, %v439_v14 }
 0x2dd   : > { %v441_v18 = vmul.f32 %v1045_v13, %v440_v16  ;;  %v1035_v16 = vld [vmem:[%s1272_s5] ss:$0 sm:$0xff] }
 0x2df   : > { %v442_v19 = vadd.f32 %v1045_v13, %v441_v18 }
 0x2e1   : > { %v446_v20 = vsel %vm445_vm11, %v1045_v13, %v442_v19 }
 0x2e2   : > { %v451_v21 = vsel %vm448_vm12, %v450_v10, %v446_v20 }
 0x2e3   : > { %v452_v22 = vmul.f32 %v1041_v60, %v451_v21 }
 0x2e5   : > { %v453_v23 = vpack.c.bf16 %v452_v22, %v452_v22 }
 0x2e7   : > { %944 = vmatmul.msk.bf16.vlgmr.msra.gmra.mxu1 %vm428_vm3, %v453_v23 }
 0x31a   : > { %v555_v45 = vpop.permute.xlu1 %554 }
 0x32e   : > { %v584_v24 = vpop.xlane.xlu0 %583 }
 0x32f   : > { %v585_v25 = vsub.f32 %v579_v4, %v584_v24 }
 0x331   : > { %v586_v26 = vmul.f32 1.442695, %v585_v25 }
 0x333   : > { %1046 = vpow2.f32 %v586_v26 }
 0x336   : > { %v665_v27 = vpop.xlane.xlu0 %664 }
 0x337   : > { %1048 = vrcp.f32 %v665_v27  ;;  %v677_v32 = vand.u32 2147483648, %v665_v27  ;;  %vm671_vm13 = vweird.f32 %v665_v27  ;;  %v675_v34 = vand.u32 2147483647, %v665_v27 }
 0x339   : > { %v1047_v28 = vpop.eup %1046  ;;  %v678_v36 = vor.u32 1.1754944e-38, %v677_v32  ;;  %vm676_vm1 = vcmp.eq.f32.partialorder %v675_v34, 8.507059e+37 }
 0x33a   : > { %v588_v29 = vsel %vm428_vm3, %v1047_v28, 0.0 }
 0x33b   : > { %589 = vadd.xlane.f32.xlu2 %v588_v29 }
 0x33d   : > { %v1049_v30 = vpop.eup %1048 }
 0x33e   : > { %v667_v31 = vmul.f32 %v1049_v30, %v665_v27  ;;  %vm672_vm14 = vweird.f32 %v1049_v30 }
 0x33f   : > { %vm673_vm15 = vmor %vm671_vm13, %vm672_vm14 }
 0x340   : > { %v668_v33 = vsub.f32 1.0, %v667_v31 }
 0x342   : > { %v669_v35 = vmul.f32 %v1049_v30, %v668_v33 }
 0x344   : > { %v670_v37 = vadd.f32 %v1049_v30, %v669_v35 }
 0x346   : > { %v674_v38 = vsel %vm673_vm15, %v1049_v30, %v670_v37 }
 0x347   : > { %v679_v39 = vsel %vm676_vm1, %v678_v36, %v674_v38 }
 0x348   : > { %v680_v40 = vmul.f32 %v1043_v6, %v679_v39  ;;  %v987_v6 = vld [vmem:[#allocation3 + $0x10] sm:$0xff] }
 0x349   : > { %v683_v41 = vpop.permute.xlu0 %682  ;;  %780 = vmatpush.bf16.msrb.mxu1 %v987_v6 }
 0x34a   : > { %v688_v42 = vsel %vm457_vm4, %v683_v41, 0  ;;  %v681_v43 = vpack.c.bf16 %v680_v40, %v680_v40 }
 0x34b   : > { %697 = vmatpush.bf16.msrb.mxu2 %v688_v42 }
 0x34d   : > { %781 = vmatpush.bf16.msrb.mxu1 %v986_v7 }
 0x34e   : > { %950 = vmatmul.msk.bf16.vlgmr.msrb.gmra.mxu2 %vm428_vm3, %v681_v43 }
 0x351   : > { %782 = vmatpush.bf16.msrb.mxu1 %v985_v8 }
 0x353   : > { %607 = vrot.lane.b32.xlu2 %v1205_v12, %s1116_s9 }
 0x364   : > { %v470_v44 = vpop.f32.mrf.mxu1 }
 0x365   : > { %474 = vst.msk [vmem:[#allocation2] sm:$0xff] %vm408_vm0, %v470_v44 }
 0x366   : > { %558 = vst.msk [vmem:[#allocation2] sm:$0xff] %vm557_vm2, %v555_v45 }
 0x36c   : > { %v472_v46 = vpop.f32.mrf.mxu1 }
 0x3ae   : > { %v590_v47 = vpop.xlane.xlu2 %589 }
 0x3af   : > { %1050 = vrcp.f32 %v590_v47  ;;  %v602_v53 = vand.u32 2147483648, %v590_v47  ;;  %v600_v12 = vand.u32 2147483647, %v590_v47  ;;  %vm596_vm6 = vweird.f32 %v590_v47 }
 0x3b1   : > { %v603_v56 = vor.u32 1.1754944e-38, %v602_v53  ;;  %vm601_vm0 = vcmp.eq.f32.partialorder %v600_v12, 8.507059e+37 }
 0x3b5   : > { %v1051_v48 = vpop.eup %1050 }
 0x3b6   : > { %v592_v49 = vmul.f32 %v1051_v48, %v590_v47  ;;  %v608_v50 = vpop.permute.xlu2 %607  ;;  %vm597_vm5 = vweird.f32 %v1051_v48 }
 0x3b7   : > { %v613_v51 = vsel %vm457_vm4, %v608_v50, 0  ;;  %vm598_vm7 = vmor %vm596_vm6, %vm597_vm5  ;;  %vm707_vm4 = vcmask 1048320  }
 0x3b8   : > { %v593_v52 = vsub.f32 1.0, %v592_v49  ;;  %622 = vmatpush.bf16.msra.mxu3 %v613_v51 }
 0x3ba   : > { %v594_v54 = vmul.f32 %v1051_v48, %v593_v52 }
 0x3bc   : > { %v595_v55 = vadd.f32 %v1051_v48, %v594_v54 }
 0x3be   : > { %v599_v57 = vsel %vm598_vm7, %v1051_v48, %v595_v55 }
 0x3bf   : > { %v604_v58 = vsel %vm601_vm0, %v603_v56, %v599_v57 }
 0x3c0   : > { %v605_v59 = vmul.f32 %v1047_v28, %v604_v58 }
 0x3c2   : > { %v606_v60 = vpack.c.bf16 %v605_v59, %v605_v59 }
 0x3c4   : > { %948 = vmatmul.msk.bf16.vlgmr.msra.gmra.mxu3 %vm428_vm3, %v606_v60  ;;  %vm632_vm3 = vcmask 785920  }
 0x3d1   : > { %v699_v61 = vpop.f32.mrf.mxu2 }
 0x3d2   : > { %704 = vrot.lane.b32.xlu2 %v699_v61, %s1113_s20 }
 0x3d9   : > { %v701_v62 = vpop.f32.mrf.mxu2 }
 0x42c   : > { %v705_v11 = vpop.permute.xlu2 %704 }
 0x447   : > { %v624_v4 = vpop.f32.mrf.mxu3 }
 0x448   : > { %629 = vrot.lane.b32.xlu0 %v624_v4, %s1116_s9 }
 0x44f   : > { %v626_v5 = vpop.f32.mrf.mxu3 }
 0x4ba   : > { %v630_v9 = vpop.permute.xlu0 %629 }
 0x4bb   : > { %633 = vst.msk [vmem:[#allocation2] sm:$0xff] %vm632_vm3, %v630_v9 }
 0x4bc   : > { %708 = vst.msk [vmem:[#allocation2] sm:$0xff] %vm707_vm4, %v705_v11 }
 0x4c3   : > { %v709_v13 = vld [vmem:[#allocation2] sm:$0xff] }
 0x4c4   : > { %v710_v14 = vpack.c.bf16 %v709_v13, %v709_v13 }
 0x4c6   : > { %783 = vmatmul.bf16.vlgmr.msrb.gmra.mxu1 %v710_v14 }
 0x543   : > { %v784_v17 = vpop.f32.mrf.mxu1 }
 0x544   : > { %v789_v18 = vadd.f32 %v788_v15, %v784_v17 }
 0x546   : > { %v794_v10 = vadd.f32 %v1035_v16, %v789_v18 }
 0x548   : > { %795 = vst [vmem:[%s397_s18] sm:$0xff] %v794_v10 }
 0x54b   : > { %v786_v19 = vpop.f32.mrf.mxu1 }
 0x54c PF: > { %s18_s26 = sadd.s32 1, %s1108_s26   ;;  %s1275_s24 = smov %s1104_s25 }
 0x54d   : > { %p15_p8 = scmp.ge.s32.totalorder %s18_s26, 4   ;;  %s1276_s25 = smov %s1278_s28 }
 0x54f   :  { %17 = sbr.rel (!%p15_p8) target bundleno = 2 (0x2), region = 95 }
 0x554   :  { %821 = vsyncpa [#allocation4], 1 }
 0x555   :  { %823 = vsyncpa [#allocation4 + $0x1], 1 }

// kernel: decoder_forward.18
= control target key start
LH: loop header
LB: loop body
LE: loop exit
PB: predicated region body
PF: predicated region fallthrough
CT: control target
= control target key end

     0   :  { %13 = vsyncpa [#allocation3], 0  ;;  %s639_s0 = inlined_call_operand.vmem [shape: f32[16,128], index: 0, kind: input, shape index: {}]   ;;  %s640_s1 = inlined_call_operand.vmem [shape: f32[1,128], index: 1, kind: input, shape index: {}]   ;;  %s641_s2 = inlined_call_operand.hbm [shape: f32[1,128], index: 2, kind: input, shape index: {}]   ;;  %s642_s3 = inlined_call_operand.hbm [shape: bf16[128,384], index: 3, kind: input, shape index: {}]   ;;  %s643_s4 = inlined_call_operand.vmem [shape: f32[1,384], index: 4, kind: input, shape index: {}]   ;;  %s644_s5 = inlined_call_operand.vmem [shape: bf16[16,128], index: 5, kind: output, shape index: {0}]   ;;  %s645_s6 = inlined_call_operand.vmem [shape: bf16[16,128], index: 6, kind: output, shape index: {1}]   ;;  %s646_s7 = inlined_call_operand.vmem [shape: bf16[16,128], index: 7, kind: output, shape index: {2}]  }
   0x1   :  { %s24_s26 = sshll.u32 %s641_s2, 4  ;;  %s25_s26 = int_to_ptr.hbm [resolvable:$true] %s24_s26 }
   0x2   :  { %14 = vsyncpa [#allocation5], 0  ;;  %s551_s27 = smov [#allocation2]   ;;  %s34_s8 = sshll.u32 %s642_s3, 4  ;;  %s35_s8 = int_to_ptr.hbm [resolvable:$true] %s34_s8 }
   0x3   :  { %s26_s28 = sshll.u32 %s551_s27, 4  ;;  %s552_s9 = smov [#allocation4]   ;;  %s27_s28 = int_to_ptr.vmem [resolvable:$true] %s26_s28 }
   0x4   :  { %29 = dma.hbm_to_vmem [thread:$0]  %s25_s26, 16, %s27_s28, [#allocation3]  }
   0x5   :  { %s36_s10 = sshll.u32 %s552_s9, 4  ;;  %s553_s11 = smov 192   ;;  %s37_s10 = int_to_ptr.vmem [resolvable:$true] %s36_s10 }
   0x6   :  { %s554_s12 = smov 12  }
   0x7   :  { %42 = dma.hbm_to_vmem [thread:$0]  %s35_s8, 3072, %s37_s10, [#allocation5], %s553_s11, %s553_s11, %s554_s12  }
   0x8   :  { %547 = dma.done.wait [#allocation3], 16  }
   0x9   :  { %548 = vsyncadd [#allocation3], 4294967280 }
   0xa   :  { %549 = dma.done.wait [#allocation5], 3072  }
   0xb   :  { %550 = vsyncadd [#allocation5], 4294964224  ;;  %v53_v0 = vld [vmem:[%s639_s0] sm:$0xff]  ;;  %v54_v1 = vld [vmem:[%s639_s0 + $0x8] sm:$0xff]  ;;  %v555_v2 = vmov 128.0  }
   0xc   :  { %55 = vadd.xlane.f32.xlu0 %v53_v0  ;;  %493 = vrcp.f32 %v555_v2  ;;  %v437_v17 = vld [vmem:[#allocation4 + $0xa8] sm:$0xf]  ;;  %v469_v18 = vld [vmem:[#allocation4 + $0xb0] sm:$0xf0]  ;;  %v468_v19 = vld [vmem:[#allocation4 + $0xac] sm:$0xf] }
   0xd   :  { %v438_v20 = vor.u32 %v469_v18, %v437_v17  ;;  %v439_v21 = vld [vmem:[#allocation4 + $0xb4] sm:$0xf0]  ;;  %v445_v22 = vld [vmem:[#allocation4 + $0xb0] sm:$0xf]  ;;  %v470_v23 = vld [vmem:[#allocation4 + $0xb8] sm:$0xf0] }
   0xe   :  { %v442_v24 = vor.u32 %v468_v19, %v439_v21  ;;  %v446_v25 = vor.u32 %v470_v23, %v445_v22  ;;  %v425_v26 = vld [vmem:[#allocation4 + $0x90] sm:$0xf]  ;;  %v466_v27 = vld [vmem:[#allocation4 + $0x98] sm:$0xf0]  ;;  %v465_v28 = vld [vmem:[#allocation4 + $0x94] sm:$0xf] }
   0xf   :  { %283 = vmatpush.bf16.msra.mxu0 %v438_v20  ;;  %v426_v29 = vor.u32 %v466_v27, %v425_v26  ;;  %v427_v30 = vld [vmem:[#allocation4 + $0x9c] sm:$0xf0]  ;;  %v433_v31 = vld [vmem:[#allocation4 + $0x98] sm:$0xf]  ;;  %v467_v32 = vld [vmem:[#allocation4 + $0xa0] sm:$0xf0] }
  0x10   :  { %297 = vmatpush.bf16.msra.mxu1 %v442_v24  ;;  %311 = vmatpush.bf16.msra.mxu2 %v446_v25  ;;  %v430_v33 = vor.u32 %v465_v28, %v427_v30  ;;  %v434_v34 = vor.u32 %v467_v32, %v433_v31  ;;  %v413_v35 = vld [vmem:[#allocation4 + $0x78] sm:$0xf]  ;;  %v463_v36 = vld [vmem:[#allocation4 + $0x80] sm:$0xf0]  ;;  %v462_v37 = vld [vmem:[#allocation4 + $0x7c] sm:$0xf] }
  0x11   :  { %v414_v38 = vor.u32 %v463_v36, %v413_v35  ;;  %v415_v39 = vld [vmem:[#allocation4 + $0x84] sm:$0xf0]  ;;  %v421_v40 = vld [vmem:[#allocation4 + $0x80] sm:$0xf]  ;;  %v464_v41 = vld [vmem:[#allocation4 + $0x88] sm:$0xf0] }
  0x12   :  { %v494_v3 = vpop.eup %493  ;;  %v418_v42 = vor.u32 %v462_v37, %v415_v39  ;;  %v422_v43 = vor.u32 %v464_v41, %v421_v40  ;;  %v401_v44 = vld [vmem:[#allocation4 + $0x60] sm:$0xf]  ;;  %v460_v45 = vld [vmem:[#allocation4 + $0x68] sm:$0xf0]  ;;  %v459_v46 = vld [vmem:[#allocation4 + $0x64] sm:$0xf] }
  0x13   :  { %v60_v4 = vmul.f32 128.0, %v494_v3  ;;  %vm64_vm0 = vweird.f32 %v494_v3  ;;  %284 = vmatpush.bf16.msra.mxu0 %v426_v29  ;;  %v402_v47 = vor.u32 %v460_v45, %v401_v44  ;;  %v403_v48 = vld [vmem:[#allocation4 + $0x6c] sm:$0xf0]  ;;  %v409_v49 = vld [vmem:[#allocation4 + $0x68] sm:$0xf] }
  0x14   :  { %57 = vadd.xlane.f32.xlu0 %v54_v1  ;;  %298 = vmatpush.bf16.msra.mxu1 %v430_v33  ;;  %v461_v50 = vld [vmem:[#allocation4 + $0x70] sm:$0xf0]  ;;  %v406_v51 = vor.u32 %v459_v46, %v403_v48  ;;  %v389_v53 = vld [vmem:[#allocation4 + $0x48] sm:$0xf]  ;;  %v456_v55 = vld [vmem:[#allocation4 + $0x4c] sm:$0xf] }
  0x15   :  { %v61_v5 = vsub.f32 1.0, %v60_v4  ;;  %312 = vmatpush.bf16.msra.mxu2 %v434_v34  ;;  %v410_v52 = vor.u32 %v461_v50, %v409_v49  ;;  %v457_v54 = vld [vmem:[#allocation4 + $0x50] sm:$0xf0]  ;;  %v391_v57 = vld [vmem:[#allocation4 + $0x54] sm:$0xf0] }
  0x16   :  { %v390_v56 = vor.u32 %v457_v54, %v389_v53  ;;  %v397_v58 = vld [vmem:[#allocation4 + $0x50] sm:$0xf]  ;;  %v458_v59 = vld [vmem:[#allocation4 + $0x58] sm:$0xf0]  ;;  %v394_v60 = vor.u32 %v456_v55, %v391_v57  ;;  %v379_v2 = vld [vmem:[#allocation4 + $0x3c] sm:$0xf0] }
  0x17   :  { %v62_v6 = vmul.f32 %v494_v3, %v61_v5  ;;  %285 = vmatpush.bf16.msra.mxu0 %v414_v38  ;;  %v398_v61 = vor.u32 %v458_v59, %v397_v58  ;;  %v377_v62 = vld [vmem:[#allocation4 + $0x30] sm:$0xf]  ;;  %v454_v63 = vld [vmem:[#allocation4 + $0x38] sm:$0xf0]  ;;  %v455_v4 = vld [vmem:[#allocation4 + $0x40] sm:$0xf0] }
  0x18   :  { %299 = vmatpush.bf16.msra.mxu1 %v418_v42  ;;  %v353_v19 = vld [vmem:[#allocation4] sm:$0xf]  ;;  %v448_v20 = vld [vmem:[#allocation4 + $0x8] sm:$0xf0]  ;;  %v447_v21 = vld [vmem:[#allocation4 + $0x4] sm:$0xf] }
  0x19   :  { %v63_v7 = vadd.f32 %v494_v3, %v62_v6  ;;  %313 = vmatpush.bf16.msra.mxu2 %v422_v43  ;;  %v354_v23 = vor.u32 %v448_v20, %v353_v19  ;;  %v355_v24 = vld [vmem:[#allocation4 + $0xc] sm:$0xf0]  ;;  %v361_v25 = vld [vmem:[#allocation4 + $0x8] sm:$0xf]  ;;  %v449_v26 = vld [vmem:[#allocation4 + $0x10] sm:$0xf0] }
  0x1a   :  { %v358_v28 = vor.u32 %v447_v21, %v355_v24  ;;  %v362_v29 = vor.u32 %v449_v26, %v361_v25  ;;  %v491_v46 = vld [vmem:[%s640_s1] ss:$0 sm:$0xff] }
  0x1b   :  { %v608_v8 = vsel %vm64_vm0, %v494_v3, %v63_v7  ;;  %286 = vmatpush.bf16.msra.mxu0 %v402_v47  ;;  %v385_v3 = vld [vmem:[#allocation4 + $0x38] sm:$0xf]  ;;  %v147_v57 = vld [vmem:[%s643_s4] sm:$0x7] }
  0x1c   :  { %300 = vmatpush.bf16.msra.mxu1 %v406_v51  ;;  %v386_v6 = vor.u32 %v455_v4, %v385_v3  ;;  %v365_v7 = vld [vmem:[#allocation4 + $0x18] sm:$0xf]  ;;  %v492_v51 = vld [vmem:[#allocation2] ss:$0 sm:$0xff]  ;;  %v149_v58 = vperm.slane %v147_v57, 0  ;;  %v150_v59 = vperm.slane %v147_v57, 1 }
  0x1d   :  { %314 = vmatpush.bf16.msra.mxu2 %v410_v52  ;;  %v151_v4 = vperm.slane %v147_v57, 2 }
  0x1f   :  { %287 = vmatpush.bf16.msra.mxu0 %v390_v56 }
  0x20   :  { %301 = vmatpush.bf16.msra.mxu1 %v394_v60 }
  0x21   :  { %315 = vmatpush.bf16.msra.mxu2 %v398_v61 }
  0x25   :  { %316 = vmatpush.bf16.msra.mxu2 %v386_v6 }
  0x7f   :  { %v56_v9 = vpop.xlane.xlu0 %55 }
  0x80   :  { %v66_v10 = vmul.f32 %v608_v8, %v56_v9  ;;  %v451_v9 = vld [vmem:[#allocation4 + $0x20] sm:$0xf0] }
  0x82   :  { %v611_v11 = vsub.f32 %v53_v0, %v66_v10  ;;  %v453_v0 = vld [vmem:[#allocation4 + $0x34] sm:$0xf]  ;;  %v450_v10 = vld [vmem:[#allocation4 + $0x1c] sm:$0xf] }
  0x83   :  { %v382_v5 = vor.u32 %v453_v0, %v379_v2 }
  0x84   :  { %v70_v12 = vmul.f32 %v611_v11, %v611_v11 }
  0x85   :  { %302 = vmatpush.bf16.msra.mxu1 %v382_v5 }
  0x86   :  { %72 = vadd.xlane.f32.xlu1 %v70_v12  ;;  %v366_v12 = vor.u32 %v451_v9, %v365_v7 }
  0x87   :  { %v58_v13 = vpop.xlane.xlu0 %57 }
  0x88   :  { %v67_v14 = vmul.f32 %v608_v8, %v58_v13  ;;  %v367_v13 = vld [vmem:[#allocation4 + $0x24] sm:$0xf0] }
  0x89   :  { %v370_v17 = vor.u32 %v450_v10, %v367_v13 }
  0x8a   :  { %v616_v15 = vsub.f32 %v54_v1, %v67_v14  ;;  %v378_v1 = vor.u32 %v454_v63, %v377_v62  ;;  %v373_v14 = vld [vmem:[#allocation4 + $0x20] sm:$0xf] }
  0x8b   :  { %303 = vmatpush.bf16.msra.mxu1 %v370_v17 }
  0x8c   :  { %v71_v16 = vmul.f32 %v616_v15, %v616_v15  ;;  %288 = vmatpush.bf16.msra.mxu0 %v378_v1 }
  0x8e   :  { %74 = vadd.xlane.f32.xlu1 %v71_v16  ;;  %v452_v16 = vld [vmem:[#allocation4 + $0x28] sm:$0xf0] }
  0x8f   :  { %v374_v18 = vor.u32 %v452_v16, %v373_v14  ;;  %304 = vmatpush.bf16.msra.mxu1 %v358_v28 }
  0x90   :  { %289 = vmatpush.bf16.msra.mxu0 %v366_v12 }
  0x91   :  { %317 = vmatpush.bf16.msra.mxu2 %v374_v18 }
  0x94   :  { %290 = vmatpush.bf16.msra.mxu0 %v354_v23 }
  0x95   :  { %318 = vmatpush.bf16.msra.mxu2 %v362_v29 }
  0xf9   :  { %v73_v22 = vpop.xlane.xlu1 %72 }
  0xfa   :  { %v76_v27 = vmul.f32 %v73_v22, %v608_v8 }
  0xfc   :  { %v78_v30 = vadd.f32 1e-05, %v76_v27 }
  0xfe   :  { %495 = vrsqrt.f32 %v78_v30  ;;  %vm86_vm2 = vweird.f32 %v78_v30 }
 0x101   :  { %v75_v31 = vpop.xlane.xlu1 %74 }
 0x102   :  { %v77_v32 = vmul.f32 %v75_v31, %v608_v8 }
 0x104   :  { %v496_v33 = vpop.eup %495  ;;  %v79_v34 = vadd.f32 1e-05, %v77_v32 }
 0x105   :  { %v81_v35 = vmul.f32 %v496_v33, %v78_v30  ;;  %vm87_vm1 = vweird.f32 %v496_v33 }
 0x106   :  { %497 = vrsqrt.f32 %v79_v34  ;;  %vm88_vm3 = vmor %vm86_vm2, %vm87_vm1  ;;  %vm96_vm5 = vweird.f32 %v79_v34 }
 0x107   :  { %v82_v36 = vmul.f32 %v496_v33, %v81_v35 }
 0x109   :  { %v83_v37 = vmul.f32 0.5, %v82_v36 }
 0x10b   :  { %v84_v38 = vsub.f32 1.5, %v83_v37 }
 0x10c   :  { %v498_v39 = vpop.eup %497 }
 0x10d   :  { %v85_v40 = vmul.f32 %v496_v33, %v84_v38  ;;  %v91_v41 = vmul.f32 %v498_v39, %v79_v34  ;;  %vm97_vm4 = vweird.f32 %v498_v39 }
 0x10e   :  { %vm98_vm6 = vmor %vm96_vm5, %vm97_vm4 }
 0x10f   :  { %v92_v42 = vmul.f32 %v498_v39, %v91_v41  ;;  %v89_v43 = vsel %vm88_vm3, %v496_v33, %v85_v40 }
 0x110   :  { %v100_v8 = vmul.f32 %v89_v43, %v611_v11 }
 0x111   :  { %v93_v44 = vmul.f32 0.5, %v92_v42 }
 0x112   :  { %v106_v50 = vmul.f32 %v491_v46, %v100_v8 }
 0x113   :  { %v94_v45 = vsub.f32 1.5, %v93_v44 }
 0x114   :  { %v112_v53 = vadd.f32 %v492_v51, %v106_v50 }
 0x115   :  { %v95_v47 = vmul.f32 %v498_v39, %v94_v45 }
 0x117   :  { %v99_v48 = vsel %vm98_vm6, %v498_v39, %v95_v47 }
 0x118   :  { %v101_v49 = vmul.f32 %v99_v48, %v616_v15 }
 0x11a   :  { %v107_v52 = vmul.f32 %v491_v46, %v101_v49 }
 0x11c   :  { %v113_v54 = vadd.f32 %v492_v51, %v107_v52 }
 0x11e   :  { %v114_v55 = vpack.c.bf16 %v113_v54, %v112_v53 }
 0x120   :  { %291 = vmatmul.bf16.vlgmr.msra.gmra.mxu0 %v114_v55  ;;  %305 = vmatmul.bf16.vlgmr.msra.gmra.mxu1 %v114_v55 }
 0x121   :  { %319 = vmatmul.bf16.vlgmr.msra.gmra.mxu2 %v114_v55 }
 0x19d   :  { %v292_v11 = vpop.f32.mrf.mxu0  ;;  %v306_v56 = vpop.f32.mrf.mxu1 }
 0x19e   :  { %v293_v62 = vadd.f32 %v292_v11, %v149_v58  ;;  %v307_v63 = vadd.f32 %v306_v56, %v150_v59 }
 0x1a4   :  { %v320_v60 = vpop.f32.mrf.mxu2 }
 0x1a5   :  { %v294_v61 = vpop.f32.mrf.mxu0  ;;  %v308_v15 = vpop.f32.mrf.mxu1  ;;  %v321_v6 = vadd.f32 %v320_v60, %v151_v4 }
 0x1a6   :  { %v295_v0 = vadd.f32 %v294_v61, %v149_v58  ;;  %v309_v1 = vadd.f32 %v308_v15, %v150_v59 }
 0x1a8   :  { %v474_v2 = vpack.c.bf16 %v295_v0, %v293_v62  ;;  %v479_v3 = vpack.c.bf16 %v309_v1, %v307_v63 }
 0x1aa   :  { %475 = vst [vmem:[%s644_s5] sm:$0xff] %v474_v2  }
 0x1ab   :  { %480 = vst [vmem:[%s645_s6] sm:$0xff] %v479_v3  }
 0x1ac   :  { %v322_v5 = vpop.f32.mrf.mxu2 }
 0x1ad   :  { %v323_v7 = vadd.f32 %v322_v5, %v151_v4 }
 0x1af   :  { %v484_v9 = vpack.c.bf16 %v323_v7, %v321_v6 }
 0x1b1   :  { %485 = vst [vmem:[%s646_s7] sm:$0xff] %v484_v9  }
 0x1b2   :  { %349 = vsyncpa [#allocation3], 1 }
 0x1b3   :  { %350 = vsyncpa [#allocation5], 1 }

// kernel: decoder_forward.17
= control target key start
LH: loop header
LB: loop body
LE: loop exit
PB: predicated region body
PF: predicated region fallthrough
CT: control target
= control target key end

     0   :  { %v1054_v2 = vmov 128.0   ;;  %s1438_s0 = inlined_call_operand.vmem [shape: f32[16,128], index: 0, kind: input, shape index: {}]   ;;  %s1439_s1 = inlined_call_operand.vmem [shape: f32[1,128], index: 1, kind: input, shape index: {}]   ;;  %s1440_s2 = inlined_call_operand.vmem [shape: f32[1,128], index: 2, kind: input, shape index: {}]   ;;  %s1441_s3 = inlined_call_operand.vmem [shape: bf16[128,512], index: 3, kind: input, shape index: {}]   ;;  %s1442_s5 = inlined_call_operand.vmem [shape: bf16[512,128], index: 5, kind: input, shape index: {}]   ;;  %s1443_s4 = inlined_call_operand.vmem [shape: f32[1,512], index: 4, kind: input, shape index: {}]   ;;  %s1444_s6 = inlined_call_operand.vmem [shape: f32[1,128], index: 6, kind: input, shape index: {}]   ;;  %s1445_s7 = inlined_call_operand.vmem [shape: f32[16,128], index: 7, kind: output, shape index: {}]  }
   0x1   :  { %v1098_v0 = vld [vmem:[%s1438_s0] sm:$0xff]  ;;  %v1104_v1 = vld [vmem:[%s1438_s0 + $0x8] sm:$0xff]  ;;  %1048 = vrcp.f32 %v1054_v2  ;;  %v1005_v18 = vld [vmem:[%s1441_s3 + $0xec] sm:$0xf0] }
   0x2   :  { %32 = vadd.xlane.f32.xlu0 %v1098_v0  ;;  %v832_v17 = vld [vmem:[%s1441_s3 + $0xe0] sm:$0xf]  ;;  %v1003_v19 = vld [vmem:[%s1441_s3 + $0xe4] sm:$0xf]  ;;  %v834_v21 = vld [vmem:[%s1441_s3 + $0xf0] sm:$0xf0] }
   0x3   :  { %v833_v20 = vor.u32 %v1005_v18, %v832_v17  ;;  %v840_v22 = vld [vmem:[%s1441_s3 + $0xe8] sm:$0xf]  ;;  %v1006_v23 = vld [vmem:[%s1441_s3 + $0xf4] sm:$0xf0]  ;;  %v837_v24 = vor.u32 %v1003_v19, %v834_v21  ;;  %v1004_v26 = vld [vmem:[%s1441_s3 + $0xec] sm:$0xf] }
   0x4   :  { %v841_v25 = vor.u32 %v1006_v23, %v840_v22  ;;  %v842_v27 = vld [vmem:[%s1441_s3 + $0xf8] sm:$0xf0]  ;;  %v816_v29 = vld [vmem:[%s1441_s3 + $0xc0] sm:$0xf]  ;;  %v1001_v30 = vld [vmem:[%s1441_s3 + $0xcc] sm:$0xf0] }
   0x5   :  { %307 = vmatpush.bf16.msra.mxu0 %v833_v20  ;;  %v845_v28 = vor.u32 %v1004_v26, %v842_v27  ;;  %321 = vmatpush.bf16.msra.mxu1 %v837_v24  ;;  %v999_v31 = vld [vmem:[%s1441_s3 + $0xc4] sm:$0xf]  ;;  %v817_v32 = vor.u32 %v1001_v30, %v816_v29  ;;  %v818_v33 = vld [vmem:[%s1441_s3 + $0xd0] sm:$0xf0]  ;;  %v824_v34 = vld [vmem:[%s1441_s3 + $0xc8] sm:$0xf] }
   0x6   :  { %335 = vmatpush.bf16.msra.mxu2 %v841_v25  ;;  %v1002_v35 = vld [vmem:[%s1441_s3 + $0xd4] sm:$0xf0]  ;;  %v821_v36 = vor.u32 %v999_v31, %v818_v33  ;;  %v1000_v38 = vld [vmem:[%s1441_s3 + $0xcc] sm:$0xf]  ;;  %v826_v39 = vld [vmem:[%s1441_s3 + $0xd8] sm:$0xf0] }
   0x7   :  { %v1049_v3 = vpop.eup %1048  ;;  %349 = vmatpush.bf16.msra.mxu3 %v845_v28  ;;  %v825_v37 = vor.u32 %v1002_v35, %v824_v34  ;;  %v829_v40 = vor.u32 %v1000_v38, %v826_v39  ;;  %v800_v41 = vld [vmem:[%s1441_s3 + $0xa0] sm:$0xf]  ;;  %v997_v42 = vld [vmem:[%s1441_s3 + $0xac] sm:$0xf0]  ;;  %v995_v43 = vld [vmem:[%s1441_s3 + $0xa4] sm:$0xf] }
   0x8   :  { %v37_v4 = vmul.f32 128.0, %v1049_v3  ;;  %vm41_vm0 = vweird.f32 %v1049_v3  ;;  %v801_v44 = vor.u32 %v997_v42, %v800_v41  ;;  %v802_v45 = vld [vmem:[%s1441_s3 + $0xb0] sm:$0xf0]  ;;  %v808_v46 = vld [vmem:[%s1441_s3 + $0xa8] sm:$0xf] }
   0x9   :  { %308 = vmatpush.bf16.msra.mxu0 %v817_v32  ;;  %322 = vmatpush.bf16.msra.mxu1 %v821_v36  ;;  %v998_v47 = vld [vmem:[%s1441_s3 + $0xb4] sm:$0xf0]  ;;  %v805_v48 = vor.u32 %v995_v43, %v802_v45  ;;  %v996_v50 = vld [vmem:[%s1441_s3 + $0xac] sm:$0xf]  ;;  %v810_v51 = vld [vmem:[%s1441_s3 + $0xb8] sm:$0xf0] }
   0xa   :  { %34 = vadd.xlane.f32.xlu0 %v1104_v1  ;;  %v38_v5 = vsub.f32 1.0, %v37_v4  ;;  %336 = vmatpush.bf16.msra.mxu2 %v825_v37  ;;  %v809_v49 = vor.u32 %v998_v47, %v808_v46  ;;  %v813_v52 = vor.u32 %v996_v50, %v810_v51  ;;  %v784_v53 = vld [vmem:[%s1441_s3 + $0x80] sm:$0xf]  ;;  %v993_v54 = vld [vmem:[%s1441_s3 + $0x8c] sm:$0xf0] }
   0xb   :  { %350 = vmatpush.bf16.msra.mxu3 %v829_v40  ;;  %v991_v55 = vld [vmem:[%s1441_s3 + $0x84] sm:$0xf]  ;;  %v785_v56 = vor.u32 %v993_v54, %v784_v53  ;;  %v786_v57 = vld [vmem:[%s1441_s3 + $0x90] sm:$0xf0]  ;;  %v792_v58 = vld [vmem:[%s1441_s3 + $0x88] sm:$0xf] }
   0xc   :  { %v39_v6 = vmul.f32 %v1049_v3, %v38_v5  ;;  %v994_v59 = vld [vmem:[%s1441_s3 + $0x94] sm:$0xf0]  ;;  %v789_v60 = vor.u32 %v991_v55, %v786_v57  ;;  %v992_v62 = vld [vmem:[%s1441_s3 + $0x8c] sm:$0xf]  ;;  %v794_v63 = vld [vmem:[%s1441_s3 + $0x98] sm:$0xf0] }
   0xd   :  { %309 = vmatpush.bf16.msra.mxu0 %v801_v44  ;;  %323 = vmatpush.bf16.msra.mxu1 %v805_v48  ;;  %v793_v61 = vor.u32 %v994_v59, %v792_v58  ;;  %v797_v2 = vor.u32 %v992_v62, %v794_v63  ;;  %v989_v4 = vld [vmem:[%s1441_s3 + $0x6c] sm:$0xf0]  ;;  %v987_v5 = vld [vmem:[%s1441_s3 + $0x64] sm:$0xf]  ;;  %v778_v17 = vld [vmem:[%s1441_s3 + $0x78] sm:$0xf0] }
   0xe   :  { %v40_v7 = vadd.f32 %v1049_v3, %v39_v6  ;;  %337 = vmatpush.bf16.msra.mxu2 %v809_v49  ;;  %v752_v20 = vld [vmem:[%s1441_s3 + $0x40] sm:$0xf]  ;;  %v985_v21 = vld [vmem:[%s1441_s3 + $0x4c] sm:$0xf0]  ;;  %v983_v22 = vld [vmem:[%s1441_s3 + $0x44] sm:$0xf] }
   0xf   :  { %351 = vmatpush.bf16.msra.mxu3 %v813_v52  ;;  %v753_v24 = vor.u32 %v985_v21, %v752_v20  ;;  %v754_v25 = vld [vmem:[%s1441_s3 + $0x50] sm:$0xf0]  ;;  %v760_v26 = vld [vmem:[%s1441_s3 + $0x48] sm:$0xf]  ;;  %v986_v28 = vld [vmem:[%s1441_s3 + $0x54] sm:$0xf0] }
  0x10   :  { %v1107_v8 = vsel %vm41_vm0, %v1049_v3, %v40_v7  ;;  %v768_v3 = vld [vmem:[%s1441_s3 + $0x60] sm:$0xf]  ;;  %v770_v7 = vld [vmem:[%s1441_s3 + $0x70] sm:$0xf0]  ;;  %v757_v27 = vor.u32 %v983_v22, %v754_v25  ;;  %v984_v29 = vld [vmem:[%s1441_s3 + $0x4c] sm:$0xf]  ;;  %v761_v31 = vor.u32 %v986_v28, %v760_v26 }
  0x11   :  { %310 = vmatpush.bf16.msra.mxu0 %v785_v56  ;;  %324 = vmatpush.bf16.msra.mxu1 %v789_v60  ;;  %v769_v6 = vor.u32 %v989_v4, %v768_v3  ;;  %v762_v30 = vld [vmem:[%s1441_s3 + $0x58] sm:$0xf0]  ;;  %v736_v33 = vld [vmem:[%s1441_s3 + $0x20] sm:$0xf]  ;;  %v981_v34 = vld [vmem:[%s1441_s3 + $0x2c] sm:$0xf0] }
  0x12   :  { %338 = vmatpush.bf16.msra.mxu2 %v793_v61  ;;  %v765_v32 = vor.u32 %v984_v29, %v762_v30  ;;  %v979_v35 = vld [vmem:[%s1441_s3 + $0x24] sm:$0xf]  ;;  %v737_v36 = vor.u32 %v981_v34, %v736_v33  ;;  %v738_v37 = vld [vmem:[%s1441_s3 + $0x30] sm:$0xf0]  ;;  %v744_v38 = vld [vmem:[%s1441_s3 + $0x28] sm:$0xf] }
  0x13   :  { %352 = vmatpush.bf16.msra.mxu3 %v797_v2  ;;  %v982_v39 = vld [vmem:[%s1441_s3 + $0x34] sm:$0xf0]  ;;  %v741_v41 = vor.u32 %v979_v35, %v738_v37  ;;  %v980_v43 = vld [vmem:[%s1441_s3 + $0x2c] sm:$0xf]  ;;  %v746_v44 = vld [vmem:[%s1441_s3 + $0x38] sm:$0xf0] }
  0x14   :  { %v745_v42 = vor.u32 %v982_v39, %v744_v38  ;;  %v720_v45 = vld [vmem:[%s1441_s3] sm:$0xf]  ;;  %v749_v47 = vor.u32 %v980_v43, %v746_v44  ;;  %v977_v48 = vld [vmem:[%s1441_s3 + $0xc] sm:$0xf0]  ;;  %v975_v49 = vld [vmem:[%s1441_s3 + $0x4] sm:$0xf] }
  0x15   :  { %311 = vmatpush.bf16.msra.mxu0 %v769_v6  ;;  %v722_v50 = vld [vmem:[%s1441_s3 + $0x10] sm:$0xf0]  ;;  %v721_v51 = vor.u32 %v977_v48, %v720_v45  ;;  %v978_v53 = vld [vmem:[%s1441_s3 + $0x14] sm:$0xf0]  ;;  %v976_v54 = vld [vmem:[%s1441_s3 + $0xc] sm:$0xf] }
  0x16   :  { %v725_v52 = vor.u32 %v975_v49, %v722_v50  ;;  %v730_v58 = vld [vmem:[%s1441_s3 + $0x18] sm:$0xf0]  ;;  %v1028_v21 = vld [vmem:[%s1442_s5 + $0xa8] sm:$0xff]  ;;  %v1011_v26 = vld [vmem:[%s1442_s5 + $0x20] sm:$0xff] }
  0x17   :  { %v733_v60 = vor.u32 %v976_v54, %v730_v58  ;;  %v1014_v63 = vld [vmem:[%s1442_s5 + $0x38] sm:$0xff]  ;;  %v1036_v22 = vld [vmem:[%s1442_s5 + $0xe8] sm:$0xff]  ;;  %v1027_v38 = vld [vmem:[%s1442_s5 + $0xa0] sm:$0xff] }
  0x18   :  { %v1022_v2 = vld [vmem:[%s1442_s5 + $0x78] sm:$0xff]  ;;  %v1035_v39 = vld [vmem:[%s1442_s5 + $0xe0] sm:$0xff]  ;;  %v1008_v44 = vld [vmem:[%s1442_s5 + $0x8] sm:$0xff] }
  0x19   :  { %312 = vmatpush.bf16.msra.mxu0 %v753_v24  ;;  %v1030_v4 = vld [vmem:[%s1442_s5 + $0xb8] sm:$0xff]  ;;  %v1045_v24 = vld [vmem:[%s1439_s1] ss:$0 sm:$0xff]  ;;  %v1016_v45 = vld [vmem:[%s1442_s5 + $0x48] sm:$0xff] }
  0x1a   :  { %v1010_v37 = vld [vmem:[%s1442_s5 + $0x18] sm:$0xff]  ;;  %v1007_v48 = vld [vmem:[%s1442_s5] sm:$0xff]  ;;  %v1024_v50 = vld [vmem:[%s1442_s5 + $0x88] sm:$0xff] }
  0x1b   :  { %v1034_v43 = vld [vmem:[%s1442_s5 + $0xd8] sm:$0xff]  ;;  %v1015_v49 = vld [vmem:[%s1442_s5 + $0x40] sm:$0xff] }
  0x1d   :  { %313 = vmatpush.bf16.msra.mxu0 %v737_v36 }
  0x21   :  { %314 = vmatpush.bf16.msra.mxu0 %v721_v51  ;;  %v1032_v51 = vld [vmem:[%s1442_s5 + $0xc8] sm:$0xff] }
  0x25   :  { %633 = vmatpush.bf16.msrb.mxu0 %v1014_v63 }
  0x75   :  { %v33_v9 = vpop.xlane.xlu0 %32 }
  0x76   :  { %v43_v10 = vmul.f32 %v1107_v8, %v33_v9  ;;  %v776_v9 = vld [vmem:[%s1441_s3 + $0x68] sm:$0xf] }
  0x78   :  { %v1111_v11 = vsub.f32 %v1098_v0, %v43_v10  ;;  %v990_v10 = vld [vmem:[%s1441_s3 + $0x74] sm:$0xf0] }
  0x7a   :  { %v47_v12 = vmul.f32 %v1111_v11, %v1111_v11 }
  0x7c   :  { %49 = vadd.xlane.f32.xlu1 %v47_v12 }
  0x7d   :  { %v35_v13 = vpop.xlane.xlu0 %34 }
  0x7e   :  { %v44_v14 = vmul.f32 %v1107_v8, %v35_v13  ;;  %v773_v13 = vor.u32 %v987_v5, %v770_v7  ;;  %v1038_v5 = vld [vmem:[%s1442_s5 + $0xf8] sm:$0xff]  ;;  %v1013_v7 = vld [vmem:[%s1442_s5 + $0x30] sm:$0xff] }
  0x7f   :  { %634 = vmatpush.bf16.msrb.mxu0 %v1013_v7 }
  0x80   :  { %v1117_v15 = vsub.f32 %v1104_v1, %v44_v14  ;;  %v777_v14 = vor.u32 %v990_v10, %v776_v9  ;;  %325 = vmatpush.bf16.msra.mxu1 %v773_v13  ;;  %v1021_v9 = vld [vmem:[%s1442_s5 + $0x70] sm:$0xff] }
  0x81   :  { %v1029_v13 = vld [vmem:[%s1442_s5 + $0xb0] sm:$0xff] }
  0x82   :  { %v48_v16 = vmul.f32 %v1117_v15, %v1117_v15  ;;  %339 = vmatpush.bf16.msra.mxu2 %v777_v14  ;;  %v1037_v14 = vld [vmem:[%s1442_s5 + $0xf0] sm:$0xff] }
  0x84   :  { %51 = vadd.xlane.f32.xlu1 %v48_v16  ;;  %v988_v16 = vld [vmem:[%s1441_s3 + $0x6c] sm:$0xf]  ;;  %326 = vmatpush.bf16.msra.mxu1 %v757_v27  ;;  %v1019_v27 = vld [vmem:[%s1442_s5 + $0x60] sm:$0xff] }
  0x85   :  { %v781_v19 = vor.u32 %v988_v16, %v778_v17  ;;  %v1012_v17 = vld [vmem:[%s1442_s5 + $0x28] sm:$0xff] }
  0x86   :  { %340 = vmatpush.bf16.msra.mxu2 %v761_v31  ;;  %635 = vmatpush.bf16.msrb.mxu0 %v1012_v17 }
  0x87   :  { %353 = vmatpush.bf16.msra.mxu3 %v781_v19 }
  0x88   :  { %327 = vmatpush.bf16.msra.mxu1 %v741_v41  ;;  %v1017_v41 = vld [vmem:[%s1442_s5 + $0x50] sm:$0xff] }
  0x8a   :  { %341 = vmatpush.bf16.msra.mxu2 %v745_v42  ;;  %636 = vmatpush.bf16.msrb.mxu0 %v1011_v26  ;;  %v1026_v42 = vld [vmem:[%s1442_s5 + $0x98] sm:$0xff] }
  0x8b   :  { %354 = vmatpush.bf16.msra.mxu3 %v765_v32 }
  0x8c   :  { %328 = vmatpush.bf16.msra.mxu1 %v725_v52  ;;  %v1023_v52 = vld [vmem:[%s1442_s5 + $0x80] sm:$0xff] }
  0x8e   :  { %637 = vmatpush.bf16.msrb.mxu0 %v1010_v37 }
  0x8f   :  { %355 = vmatpush.bf16.msra.mxu3 %v749_v47  ;;  %v1033_v47 = vld [vmem:[%s1442_s5 + $0xd0] sm:$0xff] }
  0x90   :  { %647 = vmatpush.bf16.msrb.mxu1 %v1022_v2 }
  0x93   :  { %356 = vmatpush.bf16.msra.mxu3 %v733_v60 }
  0x94   :  { %648 = vmatpush.bf16.msrb.mxu1 %v1021_v9 }
  0x97   :  { %675 = vmatpush.bf16.msrb.mxu3 %v1038_v5 }
  0x9b   :  { %676 = vmatpush.bf16.msrb.mxu3 %v1037_v14 }
  0x9f   :  { %677 = vmatpush.bf16.msrb.mxu3 %v1036_v22 }
  0xa3   :  { %678 = vmatpush.bf16.msrb.mxu3 %v1035_v39 }
  0xa7   :  { %679 = vmatpush.bf16.msrb.mxu3 %v1034_v43 }
  0xab   :  { %680 = vmatpush.bf16.msrb.mxu3 %v1033_v47 }
  0xaf   :  { %681 = vmatpush.bf16.msrb.mxu3 %v1032_v51 }
  0xef   :  { %v50_v12 = vpop.xlane.xlu1 %49 }
  0xf0   :  { %v53_v18 = vmul.f32 %v50_v12, %v1107_v8 }
  0xf2   :  { %v1251_v23 = vadd.f32 1e-05, %v53_v18  ;;  %v1020_v18 = vld [vmem:[%s1442_s5 + $0x68] sm:$0xff] }
  0xf3   :  { %649 = vmatpush.bf16.msrb.mxu1 %v1020_v18 }
  0xf4   :  { %1050 = vrsqrt.f32 %v1251_v23  ;;  %vm63_vm2 = vweird.f32 %v1251_v23 }
  0xf7   :  { %v52_v40 = vpop.xlane.xlu1 %51  ;;  %650 = vmatpush.bf16.msrb.mxu1 %v1019_v27 }
  0xf8   :  { %v54_v46 = vmul.f32 %v52_v40, %v1107_v8  ;;  %v728_v8 = vld [vmem:[%s1441_s3 + $0x8] sm:$0xf]  ;;  %v1009_v40 = vld [vmem:[%s1442_s5 + $0x10] sm:$0xff] }
  0xf9   :  { %v729_v57 = vor.u32 %v978_v53, %v728_v8  ;;  %638 = vmatpush.bf16.msrb.mxu0 %v1009_v40  ;;  %v1031_v8 = vld [vmem:[%s1442_s5 + $0xc0] sm:$0xff] }
  0xfa   :  { %v1051_v55 = vpop.eup %1050  ;;  %v56_v56 = vadd.f32 1e-05, %v54_v46  ;;  %v1025_v46 = vld [vmem:[%s1442_s5 + $0x90] sm:$0xff]  ;;  %682 = vmatpush.bf16.msrb.mxu3 %v1031_v8  ;;  %v131_v53 = vld [vmem:[%s1443_s4] sm:$0xf] }
  0xfb   :  { %v58_v59 = vmul.f32 %v1051_v55, %v1251_v23  ;;  %342 = vmatpush.bf16.msra.mxu2 %v729_v57  ;;  %vm64_vm1 = vweird.f32 %v1051_v55  ;;  %v134_v57 = vperm.slane %v131_v53, 1  ;;  %v136_v5 = vperm.slane %v131_v53, 3 }
  0xfc   :  { %1052 = vrsqrt.f32 %v56_v56  ;;  %vm65_vm3 = vmor %vm63_vm2, %vm64_vm1  ;;  %vm73_vm5 = vweird.f32 %v56_v56 }
  0xfd   :  { %v59_v61 = vmul.f32 %v1051_v55, %v58_v59  ;;  %639 = vmatpush.bf16.msrb.mxu0 %v1008_v44 }
  0xff   :  { %v60_v62 = vmul.f32 0.5, %v59_v61  ;;  %661 = vmatpush.bf16.msrb.mxu2 %v1030_v4  ;;  %v135_v4 = vperm.slane %v131_v53, 2 }
 0x101   :  { %v61_v3 = vsub.f32 1.5, %v60_v62  ;;  %640 = vmatpush.bf16.msrb.mxu0 %v1007_v48 }
 0x102   :  { %v1053_v6 = vpop.eup %1052 }
 0x103   :  { %v62_v10 = vmul.f32 %v1051_v55, %v61_v3  ;;  %v68_v12 = vmul.f32 %v1053_v6, %v56_v56  ;;  %662 = vmatpush.bf16.msrb.mxu2 %v1029_v13  ;;  %vm74_vm4 = vweird.f32 %v1053_v6  ;;  %v133_v56 = vperm.slane %v131_v53, 0 }
 0x104   :  { %vm75_vm6 = vmor %vm73_vm5, %vm74_vm4 }
 0x105   :  { %v69_v16 = vmul.f32 %v1053_v6, %v68_v12  ;;  %v66_v19 = vsel %vm65_vm3, %v1051_v55, %v62_v10 }
 0x106   :  { %v77_v25 = vmul.f32 %v66_v19, %v1111_v11  ;;  %v1046_v11 = vld [vmem:[%s1440_s2] ss:$0 sm:$0xff] }
 0x107   :  { %v70_v20 = vmul.f32 0.5, %v69_v16  ;;  %663 = vmatpush.bf16.msrb.mxu2 %v1028_v21 }
 0x108   :  { %v83_v30 = vmul.f32 %v1045_v24, %v77_v25 }
 0x109   :  { %v71_v23 = vsub.f32 1.5, %v70_v20 }
 0x10a   :  { %v89_v33 = vadd.f32 %v1046_v11, %v83_v30 }
 0x10b   :  { %v72_v28 = vmul.f32 %v1053_v6, %v71_v23  ;;  %664 = vmatpush.bf16.msrb.mxu2 %v1027_v38 }
 0x10d   :  { %v76_v29 = vsel %vm75_vm6, %v1053_v6, %v72_v28 }
 0x10e   :  { %v78_v31 = vmul.f32 %v76_v29, %v1117_v15  ;;  %v1018_v15 = vld [vmem:[%s1442_s5 + $0x58] sm:$0xff] }
 0x10f   :  { %651 = vmatpush.bf16.msrb.mxu1 %v1018_v15  ;;  %665 = vmatpush.bf16.msrb.mxu2 %v1026_v42 }
 0x110   :  { %v84_v32 = vmul.f32 %v1045_v24, %v78_v31 }
 0x112   :  { %v90_v34 = vadd.f32 %v1046_v11, %v84_v32 }
 0x113   :  { %652 = vmatpush.bf16.msrb.mxu1 %v1017_v41  ;;  %666 = vmatpush.bf16.msrb.mxu2 %v1025_v46 }
 0x114   :  { %v1042_v35 = vpack.c.bf16 %v90_v34, %v89_v33  ;;  %v1047_v33 = vld [vmem:[%s1444_s6] ss:$0 sm:$0xff] }
 0x116   :  { %1043 = vst [vmem:[#allocation2] sm:$0xff] %v1042_v35  }
 0x117   :  { %653 = vmatpush.bf16.msrb.mxu1 %v1016_v45  ;;  %667 = vmatpush.bf16.msrb.mxu2 %v1024_v50 }
 0x11b   :  { %654 = vmatpush.bf16.msrb.mxu1 %v1015_v49  ;;  %668 = vmatpush.bf16.msrb.mxu2 %v1023_v52 }
 0x11d   :  { %v974_v36 = vld [vmem:[#allocation2] sm:$0xff] }
 0x11e   :  { %315 = vmatmul.bf16.vlgmr.msra.gmra.mxu0 %v974_v36  ;;  %329 = vmatmul.bf16.vlgmr.msra.gmra.mxu1 %v974_v36 }
 0x11f   :  { %343 = vmatmul.bf16.vlgmr.msra.gmra.mxu2 %v974_v36  ;;  %357 = vmatmul.bf16.vlgmr.msra.gmra.mxu3 %v974_v36 }
 0x19b   :  { %v316_v54 = vpop.f32.mrf.mxu0  ;;  %v330_v55 = vpop.f32.mrf.mxu1 }
 0x19c   :  { %v317_v58 = vadd.f32 %v316_v54, %v133_v56  ;;  %v331_v59 = vadd.f32 %v330_v55, %v134_v57 }
 0x19e   :  { %v363_v6 = vmax.f32 %v317_v58, 0.0  ;;  %v364_v7 = vmax.f32 %v331_v59, 0.0 }
 0x1a2   :  { %v344_v60 = vpop.f32.mrf.mxu2  ;;  %v358_v61 = vpop.f32.mrf.mxu3 }
 0x1a3   :  { %v318_v62 = vpop.f32.mrf.mxu0  ;;  %v332_v63 = vpop.f32.mrf.mxu1  ;;  %v345_v14 = vadd.f32 %v344_v60, %v135_v4  ;;  %v359_v16 = vadd.f32 %v358_v61, %v136_v5 }
 0x1a4   :  { %v319_v2 = vadd.f32 %v318_v62, %v133_v56  ;;  %v333_v3 = vadd.f32 %v332_v63, %v134_v57 }
 0x1a5   :  { %v365_v21 = vmax.f32 %v345_v14, 0.0  ;;  %v366_v22 = vmax.f32 %v359_v16, 0.0 }
 0x1a6   :  { %v367_v9 = vmax.f32 %v319_v2, 0.0  ;;  %v368_v10 = vmax.f32 %v333_v3, 0.0 }
 0x1a8   :  { %v373_v12 = vpack.c.bf16 %v367_v9, %v363_v6  ;;  %v374_v13 = vpack.c.bf16 %v368_v10, %v364_v7 }
 0x1aa   :  { %v346_v17 = vpop.f32.mrf.mxu2  ;;  %v360_v18 = vpop.f32.mrf.mxu3  ;;  %641 = vmatmul.bf16.vlgmr.msrb.gmra.mxu0 %v373_v12  ;;  %655 = vmatmul.bf16.vlgmr.msrb.gmra.mxu1 %v374_v13 }
 0x1ab   :  { %v347_v19 = vadd.f32 %v346_v17, %v135_v4  ;;  %v361_v20 = vadd.f32 %v360_v18, %v136_v5 }
 0x1ad   :  { %v369_v23 = vmax.f32 %v347_v19, 0.0  ;;  %v370_v24 = vmax.f32 %v361_v20, 0.0 }
 0x1af   :  { %v375_v25 = vpack.c.bf16 %v369_v23, %v365_v21  ;;  %v376_v26 = vpack.c.bf16 %v370_v24, %v366_v22 }
 0x1b1   :  { %669 = vmatmul.bf16.vlgmr.msrb.gmra.mxu2 %v375_v25  ;;  %683 = vmatmul.bf16.vlgmr.msrb.gmra.mxu3 %v376_v26 }
 0x227   :  { %v642_v27 = vpop.f32.mrf.mxu0  ;;  %v656_v28 = vpop.f32.mrf.mxu1 }
 0x228   :  { %v657_v29 = vadd.f32 %v656_v28, %v642_v27 }
 0x22f   :  { %v644_v34 = vpop.f32.mrf.mxu0  ;;  %v658_v35 = vpop.f32.mrf.mxu1 }
 0x230   :  { %v659_v37 = vadd.f32 %v658_v35, %v644_v34 }
 0x234   :  { %v670_v11 = vpop.f32.mrf.mxu2  ;;  %v684_v30 = vpop.f32.mrf.mxu3 }
 0x235   :  { %v671_v31 = vadd.f32 %v670_v11, %v657_v29 }
 0x237   :  { %v685_v32 = vadd.f32 %v684_v30, %v671_v31 }
 0x239   :  { %v700_v36 = vadd.f32 %v685_v32, %v1098_v0 }
 0x23b   :  { %v706_v15 = vadd.f32 %v1047_v33, %v700_v36 }
 0x23c   :  { %v672_v38 = vpop.f32.mrf.mxu2  ;;  %v686_v40 = vpop.f32.mrf.mxu3 }
 0x23d   :  { %708 = vst [vmem:[%s1445_s7] sm:$0xff] %v706_v15  ;;  %v673_v39 = vadd.f32 %v672_v38, %v659_v37 }
 0x23f   :  { %v687_v41 = vadd.f32 %v686_v40, %v673_v39 }
 0x241   :  { %v701_v42 = vadd.f32 %v687_v41, %v1104_v1 }
 0x243   :  { %v707_v43 = vadd.f32 %v1047_v33, %v701_v42 }
 0x245   :  { %709 = vst [vmem:[%s1445_s7 + $0x8] sm:$0xff] %v707_v43 }

// kernel: decoder_forward.23
= control target key start
LH: loop header
LB: loop body
LE: loop exit
PB: predicated region body
PF: predicated region fallthrough
CT: control target
= control target key end

     0   :  { %12 = vsyncpa [#allocation5], 0  ;;  %s1298_s0 = inlined_call_operand.vmem [shape: f32[16,128], index: 0, kind: input, shape index: {}]   ;;  %s1299_s1 = inlined_call_operand.vmem [shape: f32[1,128], index: 1, kind: input, shape index: {}]   ;;  %s1300_s2 = inlined_call_operand.vmem [shape: f32[1,128], index: 2, kind: input, shape index: {}]   ;;  %s1301_s3 = inlined_call_operand.hbm [shape: bf16[128,512], index: 3, kind: input, shape index: {}]   ;;  %s1302_s4 = inlined_call_operand.vmem [shape: f32[1,512], index: 4, kind: input, shape index: {}]   ;;  %s1303_s5 = inlined_call_operand.hbm [shape: bf16[512,128], index: 5, kind: input, shape index: {}]   ;;  %s1304_s6 = inlined_call_operand.vmem [shape: f32[1,128], index: 6, kind: input, shape index: {}]   ;;  %s1305_s7 = inlined_call_operand.hbm [shape: f32[16,128], index: 7, kind: output, shape index: {}]  }
   0x1   :  { %13 = vsyncpa [#allocation8], 0 }
   0x2   :  { %14 = vsyncpa [#allocation6], 0  ;;  %s25_s26 = sshll.u32 %s1301_s3, 4  ;;  %s1190_s27 = smov [#allocation4]   ;;  %s26_s26 = int_to_ptr.hbm [resolvable:$true] %s25_s26 }
   0x3   :  { %s27_s28 = sshll.u32 %s1190_s27, 4  ;;  %s40_s8 = sshll.u32 %s1303_s5, 4  ;;  %s28_s28 = int_to_ptr.vmem [resolvable:$true] %s27_s28  ;;  %s41_s8 = int_to_ptr.hbm [resolvable:$true] %s40_s8 }
   0x4   :  { %s1191_s9 = smov 256   ;;  %s1192_s10 = smov 16  }
   0x5   :  { %33 = dma.hbm_to_vmem [thread:$0]  %s26_s26, 4096, %s28_s28, [#allocation5], %s1191_s9, %s1191_s9, %s1192_s10  }
   0x6   :  { %s1193_s11 = smov [#allocation7]   ;;  %s1194_s13 = smov 64  }
   0x7   :  { %s42_s12 = sshll.u32 %s1193_s11, 4  ;;  %s1195_s14 = smov 4   ;;  %s43_s12 = int_to_ptr.vmem [resolvable:$true] %s42_s12 }
   0x8   :  { %48 = dma.hbm_to_vmem [thread:$0]  %s41_s8, 4096, %s43_s12, [#allocation8], %s1194_s13, %s1194_s13, %s1195_s14  }
   0x9   :  { %1184 = dma.done.wait [#allocation5], 4096  }
   0xa   :  { %1185 = vsyncadd [#allocation5], 4294963200 }
   0xb   :  { %1186 = dma.done.wait [#allocation8], 4096  }
   0xc   :  { %1187 = vsyncadd [#allocation8], 4294963200  ;;  %v1249_v0 = vld [vmem:[%s1298_s0] sm:$0xff]  ;;  %v1255_v1 = vld [vmem:[%s1298_s0 + $0x8] sm:$0xff]  ;;  %v1196_v2 = vmov 128.0   ;;  %s1197_s21 = smov [#allocation9]  }
   0xd   :  { %65 = vadd.xlane.f32.xlu0 %v1249_v0  ;;  %1106 = vrcp.f32 %v1196_v2  ;;  %v881_v17 = vld [vmem:[#allocation4 + $0xe0] sm:$0xf]  ;;  %v1054_v18 = vld [vmem:[#allocation4 + $0xec] sm:$0xf0]  ;;  %v1052_v19 = vld [vmem:[#allocation4 + $0xe4] sm:$0xf] }
   0xe   :  { %v882_v20 = vor.u32 %v1054_v18, %v881_v17  ;;  %v883_v21 = vld [vmem:[#allocation4 + $0xf0] sm:$0xf0]  ;;  %v889_v22 = vld [vmem:[#allocation4 + $0xe8] sm:$0xf]  ;;  %v1055_v23 = vld [vmem:[#allocation4 + $0xf4] sm:$0xf0] }
   0xf   :  { %v886_v24 = vor.u32 %v1052_v19, %v883_v21  ;;  %v890_v25 = vor.u32 %v1055_v23, %v889_v22  ;;  %v1053_v26 = vld [vmem:[#allocation4 + $0xec] sm:$0xf]  ;;  %v891_v27 = vld [vmem:[#allocation4 + $0xf8] sm:$0xf0]  ;;  %v865_v29 = vld [vmem:[#allocation4 + $0xc0] sm:$0xf] }
  0x10   :  { %340 = vmatpush.bf16.msra.mxu0 %v882_v20  ;;  %v894_v28 = vor.u32 %v1053_v26, %v891_v27  ;;  %v1050_v30 = vld [vmem:[#allocation4 + $0xcc] sm:$0xf0]  ;;  %v1048_v31 = vld [vmem:[#allocation4 + $0xc4] sm:$0xf]  ;;  %v867_v33 = vld [vmem:[#allocation4 + $0xd0] sm:$0xf0] }
  0x11   :  { %354 = vmatpush.bf16.msra.mxu1 %v886_v24  ;;  %368 = vmatpush.bf16.msra.mxu2 %v890_v25  ;;  %v866_v32 = vor.u32 %v1050_v30, %v865_v29  ;;  %v873_v34 = vld [vmem:[#allocation4 + $0xc8] sm:$0xf]  ;;  %v1051_v35 = vld [vmem:[#allocation4 + $0xd4] sm:$0xf0]  ;;  %v870_v36 = vor.u32 %v1048_v31, %v867_v33  ;;  %v1049_v38 = vld [vmem:[#allocation4 + $0xcc] sm:$0xf] }
  0x12   :  { %382 = vmatpush.bf16.msra.mxu3 %v894_v28  ;;  %v874_v37 = vor.u32 %v1051_v35, %v873_v34  ;;  %v875_v39 = vld [vmem:[#allocation4 + $0xd8] sm:$0xf0]  ;;  %v849_v41 = vld [vmem:[#allocation4 + $0xa0] sm:$0xf]  ;;  %v1046_v42 = vld [vmem:[#allocation4 + $0xac] sm:$0xf0] }
  0x13   :  { %v1107_v3 = vpop.eup %1106  ;;  %v878_v40 = vor.u32 %v1049_v38, %v875_v39  ;;  %v1044_v43 = vld [vmem:[#allocation4 + $0xa4] sm:$0xf]  ;;  %v850_v44 = vor.u32 %v1046_v42, %v849_v41  ;;  %v851_v45 = vld [vmem:[#allocation4 + $0xb0] sm:$0xf0]  ;;  %v857_v46 = vld [vmem:[#allocation4 + $0xa8] sm:$0xf] }
  0x14   :  { %v70_v4 = vmul.f32 128.0, %v1107_v3  ;;  %vm74_vm0 = vweird.f32 %v1107_v3  ;;  %341 = vmatpush.bf16.msra.mxu0 %v866_v32  ;;  %v1047_v47 = vld [vmem:[#allocation4 + $0xb4] sm:$0xf0]  ;;  %v854_v48 = vor.u32 %v1044_v43, %v851_v45  ;;  %v1045_v50 = vld [vmem:[#allocation4 + $0xac] sm:$0xf]  ;;  %s747_s22 = sshll.u32 %s1197_s21, 4  ;;  %s748_s22 = int_to_ptr.vmem [resolvable:$true] %s747_s22 }
  0x15   :  { %67 = vadd.xlane.f32.xlu0 %v1255_v1  ;;  %355 = vmatpush.bf16.msra.mxu1 %v870_v36  ;;  %v858_v49 = vor.u32 %v1047_v47, %v857_v46  ;;  %v859_v51 = vld [vmem:[#allocation4 + $0xb8] sm:$0xf0]  ;;  %v833_v53 = vld [vmem:[#allocation4 + $0x80] sm:$0xf]  ;;  %v1042_v54 = vld [vmem:[#allocation4 + $0x8c] sm:$0xf0] }
  0x16   :  { %v71_v5 = vsub.f32 1.0, %v70_v4  ;;  %369 = vmatpush.bf16.msra.mxu2 %v874_v37  ;;  %383 = vmatpush.bf16.msra.mxu3 %v878_v40  ;;  %v862_v52 = vor.u32 %v1045_v50, %v859_v51  ;;  %v1040_v55 = vld [vmem:[#allocation4 + $0x84] sm:$0xf]  ;;  %v834_v56 = vor.u32 %v1042_v54, %v833_v53  ;;  %v835_v57 = vld [vmem:[#allocation4 + $0x90] sm:$0xf0]  ;;  %s749_s25 = sshll.u32 %s1305_s7, 4  ;;  %s750_s25 = int_to_ptr.hbm [resolvable:$true] %s749_s25 }
  0x17   :  { %v841_v58 = vld [vmem:[#allocation4 + $0x88] sm:$0xf]  ;;  %v1043_v59 = vld [vmem:[#allocation4 + $0x94] sm:$0xf0]  ;;  %v838_v60 = vor.u32 %v1040_v55, %v835_v57  ;;  %v1041_v62 = vld [vmem:[#allocation4 + $0x8c] sm:$0xf] }
  0x18   :  { %v72_v6 = vmul.f32 %v1107_v3, %v71_v5  ;;  %342 = vmatpush.bf16.msra.mxu0 %v850_v44  ;;  %v842_v61 = vor.u32 %v1043_v59, %v841_v58  ;;  %v843_v63 = vld [vmem:[#allocation4 + $0x98] sm:$0xf0]  ;;  %v1038_v4 = vld [vmem:[#allocation4 + $0x6c] sm:$0xf0]  ;;  %v1036_v5 = vld [vmem:[#allocation4 + $0x64] sm:$0xf] }
  0x19   :  { %356 = vmatpush.bf16.msra.mxu1 %v854_v48  ;;  %v846_v2 = vor.u32 %v1041_v62, %v843_v63  ;;  %v827_v17 = vld [vmem:[#allocation4 + $0x78] sm:$0xf0]  ;;  %v801_v20 = vld [vmem:[#allocation4 + $0x40] sm:$0xf]  ;;  %v1034_v21 = vld [vmem:[#allocation4 + $0x4c] sm:$0xf0] }
  0x1a   :  { %v73_v7 = vadd.f32 %v1107_v3, %v72_v6  ;;  %370 = vmatpush.bf16.msra.mxu2 %v858_v49  ;;  %384 = vmatpush.bf16.msra.mxu3 %v862_v52  ;;  %v1032_v22 = vld [vmem:[#allocation4 + $0x44] sm:$0xf]  ;;  %v802_v24 = vor.u32 %v1034_v21, %v801_v20  ;;  %v803_v25 = vld [vmem:[#allocation4 + $0x50] sm:$0xf0]  ;;  %v809_v26 = vld [vmem:[#allocation4 + $0x48] sm:$0xf] }
  0x1b   :  { %v806_v27 = vor.u32 %v1032_v22, %v803_v25  ;;  %v1035_v28 = vld [vmem:[#allocation4 + $0x54] sm:$0xf0]  ;;  %v1033_v29 = vld [vmem:[#allocation4 + $0x4c] sm:$0xf]  ;;  %v811_v30 = vld [vmem:[#allocation4 + $0x58] sm:$0xf0] }
  0x1c   :  { %v1258_v8 = vsel %vm74_vm0, %v1107_v3, %v73_v7  ;;  %343 = vmatpush.bf16.msra.mxu0 %v834_v56  ;;  %v817_v3 = vld [vmem:[#allocation4 + $0x60] sm:$0xf]  ;;  %v819_v7 = vld [vmem:[#allocation4 + $0x70] sm:$0xf0]  ;;  %v810_v31 = vor.u32 %v1035_v28, %v809_v26  ;;  %v814_v32 = vor.u32 %v1033_v29, %v811_v30  ;;  %v1030_v34 = vld [vmem:[#allocation4 + $0x2c] sm:$0xf0] }
  0x1d   :  { %357 = vmatpush.bf16.msra.mxu1 %v838_v60  ;;  %v818_v6 = vor.u32 %v1038_v4, %v817_v3  ;;  %v785_v33 = vld [vmem:[#allocation4 + $0x20] sm:$0xf]  ;;  %v1028_v35 = vld [vmem:[#allocation4 + $0x24] sm:$0xf]  ;;  %v787_v37 = vld [vmem:[#allocation4 + $0x30] sm:$0xf0] }
  0x1e   :  { %371 = vmatpush.bf16.msra.mxu2 %v842_v61  ;;  %385 = vmatpush.bf16.msra.mxu3 %v846_v2  ;;  %v786_v36 = vor.u32 %v1030_v34, %v785_v33  ;;  %v793_v38 = vld [vmem:[#allocation4 + $0x28] sm:$0xf]  ;;  %v1031_v39 = vld [vmem:[#allocation4 + $0x34] sm:$0xf0]  ;;  %v790_v41 = vor.u32 %v1028_v35, %v787_v37  ;;  %v1029_v43 = vld [vmem:[#allocation4 + $0x2c] sm:$0xf] }
  0x1f   :  { %v794_v42 = vor.u32 %v1031_v39, %v793_v38  ;;  %v795_v44 = vld [vmem:[#allocation4 + $0x38] sm:$0xf0]  ;;  %v769_v45 = vld [vmem:[#allocation4] sm:$0xf]  ;;  %v1026_v48 = vld [vmem:[#allocation4 + $0xc] sm:$0xf0] }
  0x20   :  { %344 = vmatpush.bf16.msra.mxu0 %v818_v6  ;;  %v798_v47 = vor.u32 %v1029_v43, %v795_v44  ;;  %v1024_v49 = vld [vmem:[#allocation4 + $0x4] sm:$0xf]  ;;  %v771_v50 = vld [vmem:[#allocation4 + $0x10] sm:$0xf0]  ;;  %v770_v51 = vor.u32 %v1026_v48, %v769_v45  ;;  %v777_v53 = vld [vmem:[#allocation4 + $0x8] sm:$0xf] }
  0x21   :  { %v774_v52 = vor.u32 %v1024_v49, %v771_v50  ;;  %v1027_v54 = vld [vmem:[#allocation4 + $0x14] sm:$0xf0]  ;;  %v1025_v55 = vld [vmem:[#allocation4 + $0xc] sm:$0xf]  ;;  %v779_v59 = vld [vmem:[#allocation4 + $0x18] sm:$0xf0] }
  0x22   :  { %v778_v58 = vor.u32 %v1027_v54, %v777_v53  ;;  %v1063_v63 = vld [vmem:[#allocation7 + $0x38] sm:$0xff]  ;;  %v1077_v21 = vld [vmem:[#allocation7 + $0xa8] sm:$0xff]  ;;  %v1060_v26 = vld [vmem:[#allocation7 + $0x20] sm:$0xff]  ;;  %s1199_s26 = smov 8  }
  0x23   :  { %v1071_v2 = vld [vmem:[#allocation7 + $0x78] sm:$0xff]  ;;  %v1085_v22 = vld [vmem:[#allocation7 + $0xe8] sm:$0xff]  ;;  %v1076_v39 = vld [vmem:[#allocation7 + $0xa0] sm:$0xff] }
  0x24   :  { %345 = vmatpush.bf16.msra.mxu0 %v802_v24  ;;  %v1079_v4 = vld [vmem:[#allocation7 + $0xb8] sm:$0xff]  ;;  %v1057_v44 = vld [vmem:[#allocation7 + $0x8] sm:$0xff]  ;;  %v1056_v48 = vld [vmem:[#allocation7] sm:$0xff] }
  0x25   :  { %v1103_v25 = vld [vmem:[%s1299_s1] ss:$0 sm:$0xff]  ;;  %v1065_v45 = vld [vmem:[#allocation7 + $0x48] sm:$0xff]  ;;  %v1064_v49 = vld [vmem:[#allocation7 + $0x40] sm:$0xff] }
  0x26   :  { %v1104_v30 = vld [vmem:[%s1300_s2] ss:$0 sm:$0xff]  ;;  %v1073_v50 = vld [vmem:[#allocation7 + $0x88] sm:$0xff]  ;;  %v1080_v53 = vld [vmem:[#allocation7 + $0xc0] sm:$0xff] }
  0x27   :  { %v1059_v37 = vld [vmem:[#allocation7 + $0x18] sm:$0xff] }
  0x28   :  { %346 = vmatpush.bf16.msra.mxu0 %v786_v36  ;;  %v1067_v38 = vld [vmem:[#allocation7 + $0x58] sm:$0xff] }
  0x29   :  { %v1083_v43 = vld [vmem:[#allocation7 + $0xd8] sm:$0xff] }
  0x2a   :  { %v164_v54 = vld [vmem:[%s1302_s4] sm:$0xf] }
  0x2c   :  { %347 = vmatpush.bf16.msra.mxu0 %v770_v51  ;;  %v1081_v51 = vld [vmem:[#allocation7 + $0xc8] sm:$0xff] }
  0x30   :  { %666 = vmatpush.bf16.msrb.mxu0 %v1063_v63 }
  0x80   :  { %v66_v9 = vpop.xlane.xlu0 %65 }
  0x81   :  { %v76_v10 = vmul.f32 %v1258_v8, %v66_v9  ;;  %v825_v9 = vld [vmem:[#allocation4 + $0x68] sm:$0xf] }
  0x83   :  { %v1262_v11 = vsub.f32 %v1249_v0, %v76_v10  ;;  %v1039_v10 = vld [vmem:[#allocation4 + $0x74] sm:$0xf0] }
  0x85   :  { %v80_v12 = vmul.f32 %v1262_v11, %v1262_v11 }
  0x87   :  { %82 = vadd.xlane.f32.xlu1 %v80_v12 }
  0x88   :  { %v68_v13 = vpop.xlane.xlu0 %67 }
  0x89   :  { %v77_v14 = vmul.f32 %v1258_v8, %v68_v13  ;;  %v822_v13 = vor.u32 %v1036_v5, %v819_v7  ;;  %v1087_v5 = vld [vmem:[#allocation7 + $0xf8] sm:$0xff]  ;;  %v1062_v7 = vld [vmem:[#allocation7 + $0x30] sm:$0xff] }
  0x8a   :  { %667 = vmatpush.bf16.msrb.mxu0 %v1062_v7 }
  0x8b   :  { %v1268_v15 = vsub.f32 %v1255_v1, %v77_v14  ;;  %v826_v14 = vor.u32 %v1039_v10, %v825_v9  ;;  %358 = vmatpush.bf16.msra.mxu1 %v822_v13  ;;  %v1070_v9 = vld [vmem:[#allocation7 + $0x70] sm:$0xff] }
  0x8c   :  { %v1078_v13 = vld [vmem:[#allocation7 + $0xb0] sm:$0xff] }
  0x8d   :  { %v81_v16 = vmul.f32 %v1268_v15, %v1268_v15  ;;  %372 = vmatpush.bf16.msra.mxu2 %v826_v14  ;;  %v1086_v14 = vld [vmem:[#allocation7 + $0xf0] sm:$0xff] }
  0x8f   :  { %84 = vadd.xlane.f32.xlu1 %v81_v16  ;;  %v1037_v16 = vld [vmem:[#allocation4 + $0x6c] sm:$0xf]  ;;  %359 = vmatpush.bf16.msra.mxu1 %v806_v27  ;;  %v1068_v27 = vld [vmem:[#allocation7 + $0x60] sm:$0xff] }
  0x90   :  { %v830_v19 = vor.u32 %v1037_v16, %v827_v17  ;;  %v1061_v17 = vld [vmem:[#allocation7 + $0x28] sm:$0xff] }
  0x91   :  { %373 = vmatpush.bf16.msra.mxu2 %v810_v31  ;;  %668 = vmatpush.bf16.msrb.mxu0 %v1061_v17 }
  0x92   :  { %386 = vmatpush.bf16.msra.mxu3 %v830_v19 }
  0x93   :  { %360 = vmatpush.bf16.msra.mxu1 %v790_v41  ;;  %v1066_v41 = vld [vmem:[#allocation7 + $0x50] sm:$0xff] }
  0x95   :  { %374 = vmatpush.bf16.msra.mxu2 %v794_v42  ;;  %669 = vmatpush.bf16.msrb.mxu0 %v1060_v26  ;;  %v1075_v42 = vld [vmem:[#allocation7 + $0x98] sm:$0xff] }
  0x96   :  { %387 = vmatpush.bf16.msra.mxu3 %v814_v32 }
  0x97   :  { %361 = vmatpush.bf16.msra.mxu1 %v774_v52  ;;  %v1072_v52 = vld [vmem:[#allocation7 + $0x80] sm:$0xff] }
  0x99   :  { %375 = vmatpush.bf16.msra.mxu2 %v778_v58  ;;  %670 = vmatpush.bf16.msrb.mxu0 %v1059_v37  ;;  %v167_v58 = vperm.slane %v164_v54, 1 }
  0x9a   :  { %388 = vmatpush.bf16.msra.mxu3 %v798_v47  ;;  %v1082_v47 = vld [vmem:[#allocation7 + $0xd0] sm:$0xff] }
  0x9b   :  { %680 = vmatpush.bf16.msrb.mxu1 %v1071_v2 }
  0x9d   :  { %694 = vmatpush.bf16.msrb.mxu2 %v1079_v4  ;;  %v168_v4 = vperm.slane %v164_v54, 2 }
  0x9f   :  { %681 = vmatpush.bf16.msrb.mxu1 %v1070_v9 }
  0xa1   :  { %695 = vmatpush.bf16.msrb.mxu2 %v1078_v13 }
  0xa5   :  { %696 = vmatpush.bf16.msrb.mxu2 %v1077_v21 }
  0xa9   :  { %697 = vmatpush.bf16.msrb.mxu2 %v1076_v39 }
  0xad   :  { %698 = vmatpush.bf16.msrb.mxu2 %v1075_v42 }
  0xfa   :  { %v83_v12 = vpop.xlane.xlu1 %82 }
  0xfb   :  { %v86_v18 = vmul.f32 %v83_v12, %v1258_v8 }
  0xfd   :  { %v1273_v23 = vadd.f32 1e-05, %v86_v18  ;;  %v1069_v18 = vld [vmem:[#allocation7 + $0x68] sm:$0xff] }
  0xfe   :  { %682 = vmatpush.bf16.msrb.mxu1 %v1069_v18 }
  0xff   :  { %1108 = vrsqrt.f32 %v1273_v23  ;;  %vm96_vm2 = vweird.f32 %v1273_v23 }
 0x102   :  { %v85_v40 = vpop.xlane.xlu1 %84  ;;  %683 = vmatpush.bf16.msrb.mxu1 %v1068_v27 }
 0x103   :  { %v87_v46 = vmul.f32 %v85_v40, %v1258_v8  ;;  %v782_v8 = vor.u32 %v1025_v55, %v779_v59  ;;  %v1084_v40 = vld [vmem:[#allocation7 + $0xe0] sm:$0xff] }
 0x105   :  { %v1109_v56 = vpop.eup %1108  ;;  %v89_v57 = vadd.f32 1e-05, %v87_v46  ;;  %389 = vmatpush.bf16.msra.mxu3 %v782_v8  ;;  %v1074_v46 = vld [vmem:[#allocation7 + $0x90] sm:$0xff] }
 0x106   :  { %v91_v60 = vmul.f32 %v1109_v56, %v1273_v23  ;;  %vm97_vm1 = vweird.f32 %v1109_v56  ;;  %684 = vmatpush.bf16.msrb.mxu1 %v1067_v38  ;;  %699 = vmatpush.bf16.msrb.mxu2 %v1074_v46 }
 0x107   :  { %1110 = vrsqrt.f32 %v89_v57  ;;  %vm98_vm3 = vmor %vm96_vm2, %vm97_vm1  ;;  %vm106_vm5 = vweird.f32 %v89_v57 }
 0x108   :  { %v92_v61 = vmul.f32 %v1109_v56, %v91_v60 }
 0x109   :  { %708 = vmatpush.bf16.msrb.mxu3 %v1087_v5  ;;  %v169_v5 = vperm.slane %v164_v54, 3 }
 0x10a   :  { %v93_v62 = vmul.f32 0.5, %v92_v61  ;;  %685 = vmatpush.bf16.msrb.mxu1 %v1066_v41  ;;  %700 = vmatpush.bf16.msrb.mxu2 %v1073_v50 }
 0x10c   :  { %v94_v3 = vsub.f32 1.5, %v93_v62 }
 0x10d   :  { %v1111_v6 = vpop.eup %1110  ;;  %709 = vmatpush.bf16.msrb.mxu3 %v1086_v14 }
 0x10e   :  { %v95_v10 = vmul.f32 %v1109_v56, %v94_v3  ;;  %v101_v12 = vmul.f32 %v1111_v6, %v89_v57  ;;  %vm107_vm4 = vweird.f32 %v1111_v6  ;;  %686 = vmatpush.bf16.msrb.mxu1 %v1065_v45  ;;  %701 = vmatpush.bf16.msrb.mxu2 %v1072_v52  ;;  %v166_v57 = vperm.slane %v164_v54, 0 }
 0x10f   :  { %vm108_vm6 = vmor %vm106_vm5, %vm107_vm4 }
 0x110   :  { %v102_v16 = vmul.f32 %v1111_v6, %v101_v12  ;;  %v99_v19 = vsel %vm98_vm3, %v1109_v56, %v95_v10 }
 0x111   :  { %v110_v23 = vmul.f32 %v99_v19, %v1262_v11  ;;  %710 = vmatpush.bf16.msrb.mxu3 %v1085_v22 }
 0x112   :  { %v103_v20 = vmul.f32 0.5, %v102_v16  ;;  %687 = vmatpush.bf16.msrb.mxu1 %v1064_v49 }
 0x113   :  { %v116_v31 = vmul.f32 %v1103_v25, %v110_v23 }
 0x114   :  { %v104_v24 = vsub.f32 1.5, %v103_v20 }
 0x115   :  { %v122_v33 = vadd.f32 %v1104_v30, %v116_v31  ;;  %711 = vmatpush.bf16.msrb.mxu3 %v1084_v40 }
 0x116   :  { %v105_v28 = vmul.f32 %v1111_v6, %v104_v24 }
 0x118   :  { %v109_v29 = vsel %vm108_vm6, %v1111_v6, %v105_v28 }
 0x119   :  { %v111_v32 = vmul.f32 %v109_v29, %v1268_v15  ;;  %v1058_v15 = vld [vmem:[#allocation7 + $0x10] sm:$0xff]  ;;  %712 = vmatpush.bf16.msrb.mxu3 %v1083_v43 }
 0x11a   :  { %671 = vmatpush.bf16.msrb.mxu0 %v1058_v15 }
 0x11b   :  { %v117_v11 = vmul.f32 %v1103_v25, %v111_v32 }
 0x11d   :  { %v123_v34 = vadd.f32 %v1104_v30, %v117_v11  ;;  %713 = vmatpush.bf16.msrb.mxu3 %v1082_v47 }
 0x11e   :  { %672 = vmatpush.bf16.msrb.mxu0 %v1057_v44 }
 0x11f   :  { %v1091_v35 = vpack.c.bf16 %v123_v34, %v122_v33  ;;  %v1105_v33 = vld [vmem:[%s1304_s6] ss:$0 sm:$0xff]  ;;  %s1198_s6 = smov 128  }
 0x121   :  { %1092 = vst [vmem:[#allocation2] sm:$0xff] %v1091_v35   ;;  %714 = vmatpush.bf16.msrb.mxu3 %v1081_v51 }
 0x122   :  { %673 = vmatpush.bf16.msrb.mxu0 %v1056_v48 }
 0x125   :  { %715 = vmatpush.bf16.msrb.mxu3 %v1080_v53 }
 0x128   :  { %v1023_v36 = vld [vmem:[#allocation2] sm:$0xff] }
 0x129   :  { %348 = vmatmul.bf16.vlgmr.msra.gmra.mxu0 %v1023_v36  ;;  %362 = vmatmul.bf16.vlgmr.msra.gmra.mxu1 %v1023_v36 }
 0x12a   :  { %376 = vmatmul.bf16.vlgmr.msra.gmra.mxu2 %v1023_v36  ;;  %390 = vmatmul.bf16.vlgmr.msra.gmra.mxu3 %v1023_v36 }
 0x1a6   :  { %v349_v55 = vpop.f32.mrf.mxu0  ;;  %v363_v56 = vpop.f32.mrf.mxu1 }
 0x1a7   :  { %v350_v59 = vadd.f32 %v349_v55, %v166_v57  ;;  %v364_v60 = vadd.f32 %v363_v56, %v167_v58 }
 0x1a9   :  { %v396_v6 = vmax.f32 %v350_v59, 0.0  ;;  %v397_v7 = vmax.f32 %v364_v60, 0.0 }
 0x1ad   :  { %v377_v8 = vpop.f32.mrf.mxu2  ;;  %v391_v61 = vpop.f32.mrf.mxu3 }
 0x1ae   :  { %v351_v62 = vpop.f32.mrf.mxu0  ;;  %v365_v63 = vpop.f32.mrf.mxu1  ;;  %v378_v14 = vadd.f32 %v377_v8, %v168_v4  ;;  %v392_v16 = vadd.f32 %v391_v61, %v169_v5 }
 0x1af   :  { %v352_v2 = vadd.f32 %v351_v62, %v166_v57  ;;  %v366_v3 = vadd.f32 %v365_v63, %v167_v58 }
 0x1b0   :  { %v398_v21 = vmax.f32 %v378_v14, 0.0  ;;  %v399_v22 = vmax.f32 %v392_v16, 0.0 }
 0x1b1   :  { %v400_v9 = vmax.f32 %v352_v2, 0.0  ;;  %v401_v10 = vmax.f32 %v366_v3, 0.0 }
 0x1b3   :  { %v406_v12 = vpack.c.bf16 %v400_v9, %v396_v6  ;;  %v407_v13 = vpack.c.bf16 %v401_v10, %v397_v7 }
 0x1b5   :  { %v379_v17 = vpop.f32.mrf.mxu2  ;;  %v393_v18 = vpop.f32.mrf.mxu3  ;;  %674 = vmatmul.bf16.vlgmr.msrb.gmra.mxu0 %v406_v12  ;;  %688 = vmatmul.bf16.vlgmr.msrb.gmra.mxu1 %v407_v13 }
 0x1b6   :  { %v380_v19 = vadd.f32 %v379_v17, %v168_v4  ;;  %v394_v20 = vadd.f32 %v393_v18, %v169_v5 }
 0x1b8   :  { %v402_v24 = vmax.f32 %v380_v19, 0.0  ;;  %v403_v25 = vmax.f32 %v394_v20, 0.0 }
 0x1ba   :  { %v408_v23 = vpack.c.bf16 %v402_v24, %v398_v21  ;;  %v409_v26 = vpack.c.bf16 %v403_v25, %v399_v22 }
 0x1bc   :  { %702 = vmatmul.bf16.vlgmr.msrb.gmra.mxu2 %v408_v23  ;;  %716 = vmatmul.bf16.vlgmr.msrb.gmra.mxu3 %v409_v26 }
 0x232   :  { %v675_v27 = vpop.f32.mrf.mxu0  ;;  %v689_v28 = vpop.f32.mrf.mxu1 }
 0x233   :  { %v690_v29 = vadd.f32 %v689_v28, %v675_v27 }
 0x23a   :  { %v677_v34 = vpop.f32.mrf.mxu0  ;;  %v691_v35 = vpop.f32.mrf.mxu1 }
 0x23b   :  { %v692_v37 = vadd.f32 %v691_v35, %v677_v34 }
 0x23f   :  { %v703_v30 = vpop.f32.mrf.mxu2  ;;  %v717_v31 = vpop.f32.mrf.mxu3 }
 0x240   :  { %v704_v32 = vadd.f32 %v703_v30, %v690_v29 }
 0x242   :  { %v718_v11 = vadd.f32 %v717_v31, %v704_v32 }
 0x244   :  { %v733_v36 = vadd.f32 %v718_v11, %v1249_v0 }
 0x246   :  { %v739_v38 = vadd.f32 %v1105_v33, %v733_v36 }
 0x247   :  { %v705_v39 = vpop.f32.mrf.mxu2  ;;  %v719_v15 = vpop.f32.mrf.mxu3 }
 0x248   :  { %741 = vst [vmem:[#allocation9] sm:$0xff] %v739_v38  ;;  %v706_v40 = vadd.f32 %v705_v39, %v692_v37 }
 0x24a   :  { %v720_v41 = vadd.f32 %v719_v15, %v706_v40 }
 0x24c   :  { %v734_v42 = vadd.f32 %v720_v41, %v1255_v1 }
 0x24e   :  { %v740_v43 = vadd.f32 %v1105_v33, %v734_v42 }
 0x250   :  { %742 = vst [vmem:[#allocation9 + $0x8] sm:$0xff] %v740_v43 }
 0x251   :  { %755 = dma.vmem_to_hbm [thread:$0]  %s748_s22, 256, %s750_s25, [#allocation6], %s1198_s6, %s1198_s6, %s1199_s26  }
 0x252   :  { %1188 = dma.done.wait [#allocation6], 256  }
 0x253   :  { %1189 = vsyncadd [#allocation6], 4294967040 }
 0x254   :  { %760 = vsyncpa [#allocation5], 1 }
 0x255   :  { %761 = vsyncpa [#allocation8], 1 }
 0x256   :  { %762 = vsyncpa [#allocation6], 1 }

</bundles_post_ra>
